<compile_context>
chip_gen: v5e
topology: v5e:2x2
jax: 0.10.0
libtpu: 0.0.40
codegen_flags: <defaults>
</compile_context>

<pallas_src>
import functools

import jax
import jax.numpy as jnp
from jax import lax
from jax.experimental import pallas as pl
from jax.experimental.pallas import tpu as pltpu


def _round_up(x, m):
    return ((x + m - 1) // m) * m


# ----------------------------------------------------------------------------
# Fused kernel: GCN encoder + linear + GRU/attention decoder + log_softmax
# ----------------------------------------------------------------------------
def gcn2seq_fused_kernel(V, x_ref, a_ref, w1_ref, b1_ref, w2_ref, b2_ref,
                         lw_ref, lb_ref, emb_ref,
                         wih_ref, bih_ref, whh_ref, bhh_ref,
                         woh_ref, woc_ref, bo_ref,
                         out_ref, h_all_scr, ctx_all_scr):
    """One grid step = one batch element.

    x_ref   : (1, S, E)  embedded source tokens
    a_ref   : (S, S)     normalized path-graph adjacency (with self loops)
    emb_ref : (1, T, E)  embedded teacher-forced decoder inputs
    out_ref : (T, Vp)    log-softmax rows for this batch element (Vp padded)
    """
    f32 = jnp.float32
    BB, S, E = x_ref.shape            # BB == 1 (one batch element per step)
    T = emb_ref.shape[1]
    H = w1_ref.shape[1]
    Vp = out_ref.shape[1]

    a_b = jnp.broadcast_to(a_ref[...], (BB, S, S))

    # -------- GCN encoder: two layers of relu(A @ (X @ W) + b) --------------
    xw1 = jnp.dot(x_ref[...].reshape(BB * S, E), w1_ref[...],
                  preferred_element_type=f32).reshape(BB, S, H)
    h1 = jnp.maximum(
        jnp.einsum('bst,bth->bsh', a_b, xw1, preferred_element_type=f32)
        + b1_ref[...][None], 0.0)
    hw2 = jnp.dot(h1.reshape(BB * S, H), w2_ref[...],
                  preferred_element_type=f32).reshape(BB, S, H)
    enc_h = jnp.maximum(
        jnp.einsum('bst,bth->bsh', a_b, hw2, preferred_element_type=f32)
        + b2_ref[...][None], 0.0)                                  # (BB, S, H)

    # -------- dec_h0 = tanh(Linear(mean-pooled encoder state)) --------------
    pooled = jnp.mean(enc_h, axis=1)                               # (BB, H)
    h = jnp.tanh(jnp.dot(pooled, lw_ref[...], preferred_element_type=f32)
                 + lb_ref[...])                                    # (BB, H)

    # -------- hoisted input-gate matmuls (teacher-forced, time-invariant) ---
    emb_flat = emb_ref[...].reshape(BB * T, E)
    gates_x = []
    for g in range(3):                                             # [r, z, n]
        gx = jnp.dot(emb_flat, wih_ref[g],
                     preferred_element_type=f32) + bih_ref[g]
        gates_x.append(gx.reshape(BB, T, H))
    gxr, gxz, gxn = gates_x

    # -------- GRU recurrence + dot-product attention (T static, unrolled) ---
    for t in range(T):
        ghr = jnp.dot(h, whh_ref[0], preferred_element_type=f32) + bhh_ref[0]
        ghz = jnp.dot(h, whh_ref[1], preferred_element_type=f32) + bhh_ref[1]
        ghn = jnp.dot(h, whh_ref[2], preferred_element_type=f32) + bhh_ref[2]
        r = jax.nn.sigmoid(gxr[:, t, :] + ghr)
        z = jax.nn.sigmoid(gxz[:, t, :] + ghz)
        n = jnp.tanh(gxn[:, t, :] + r * ghn)
        h = (1.0 - z) * n + z * h                                  # (BB, H)

        # attention over encoder states via MXU contractions
        scores = jnp.einsum('bqh,bsh->bqs', h[:, None, :], enc_h,
                            preferred_element_type=f32)[:, 0, :]   # (BB, S)
        m = jnp.max(scores, axis=-1, keepdims=True)
        e = jnp.exp(scores - m)
        attn = e * pl.reciprocal(jnp.sum(e, axis=-1, keepdims=True),
                                 approx=True)
        ctx = jnp.einsum('bqs,bsh->bqh', attn[:, None, :], enc_h,
                         preferred_element_type=f32)[:, 0, :]      # (BB, H)

        h_all_scr[:, t:t + 1, :] = h[:, None, :]
        ctx_all_scr[:, t:t + 1, :] = ctx[:, None, :]

    # -------- batched output projection + fused log_softmax (lane-dense) ----
    h_all = h_all_scr[...].reshape(BB * T, H)
    c_all = ctx_all_scr[...].reshape(BB * T, H)
    logits = (jnp.dot(h_all, woh_ref[...], preferred_element_type=f32)
              + jnp.dot(c_all, woc_ref[...], preferred_element_type=f32)
              + bo_ref[...])                                       # (T, Vp)
    col = lax.broadcasted_iota(jnp.int32, (BB * T, Vp), 1)
    logits = jnp.where(col < V, logits, -1e30)                     # mask pad cols
    mx = jnp.max(logits, axis=-1, keepdims=True)
    sh = logits - mx
    lse = jnp.log(jnp.sum(jnp.exp(sh), axis=-1, keepdims=True))
    out_ref[...] = sh - lse


# ----------------------------------------------------------------------------
# Model glue (embedding lookups, adjacency construction, parameter init)
# ----------------------------------------------------------------------------
def normalized_path_adjacency(S):
    # A_hat = D^-1/2 (A + I) D^-1/2 for a chain graph over the token positions
    a = (jnp.eye(S, dtype=jnp.float32)
         + jnp.eye(S, k=1, dtype=jnp.float32)
         + jnp.eye(S, k=-1, dtype=jnp.float32))
    d_inv_sqrt = 1.0 / jnp.sqrt(jnp.sum(a, axis=-1))
    return a * d_inv_sqrt[:, None] * d_inv_sqrt[None, :]


def init_params(key, src_nword, trg_nword, embed_dim, hidden_dim):
    ks = jax.random.split(key, 10)
    s = 0.1
    return {
        "src_embed": s * jax.random.normal(ks[0], (src_nword, embed_dim), jnp.float32),
        "gcn_w1": s * jax.random.normal(ks[1], (embed_dim, hidden_dim), jnp.float32),
        "gcn_b1": jnp.zeros((hidden_dim,), jnp.float32),
        "gcn_w2": s * jax.random.normal(ks[2], (hidden_dim, hidden_dim), jnp.float32),
        "gcn_b2": jnp.zeros((hidden_dim,), jnp.float32),
        "lin_w": s * jax.random.normal(ks[3], (hidden_dim, hidden_dim), jnp.float32),
        "lin_b": jnp.zeros((hidden_dim,), jnp.float32),
        "trg_embed": s * jax.random.normal(ks[4], (trg_nword, embed_dim), jnp.float32),
        "dec_w_ih": s * jax.random.normal(ks[5], (embed_dim, 3 * hidden_dim), jnp.float32),
        "dec_b_ih": jnp.zeros((3 * hidden_dim,), jnp.float32),
        "dec_w_hh": s * jax.random.normal(ks[6], (hidden_dim, 3 * hidden_dim), jnp.float32),
        "dec_b_hh": jnp.zeros((3 * hidden_dim,), jnp.float32),
        "dec_w_out_h": s * jax.random.normal(ks[7], (hidden_dim, trg_nword), jnp.float32),
        "dec_w_out_c": s * jax.random.normal(ks[8], (hidden_dim, trg_nword), jnp.float32),
        "dec_b_out": jnp.zeros((trg_nword,), jnp.float32),
    }


@functools.partial(jax.jit, static_argnames=("max_len", "trg_soi"))
def gcn2seq_forward(params, source, target, max_len, trg_soi):
    """Mirrors GCN2Seq.forward: returns log_softmax(out.view(-1, trg_nword))."""
    B, S = source.shape
    E = params["src_embed"].shape[1]
    H = params["lin_w"].shape[0]
    V = params["dec_b_out"].shape[0]
    Vp = _round_up(V, 128)

    # ----- embeddings / adjacency (tiny gathers stay in XLA) -----
    x = jnp.take(params["src_embed"], source, axis=0)              # (B, S, E)
    a_hat = normalized_path_adjacency(S)                           # (S, S)
    # TODO(synk): src_length masking of padded positions is not applied.
    if target is None:
        # TODO(synk): greedy feedback decoding not implemented; SOS fed each step.
        target = jnp.full((B, max_len), trg_soi, dtype=jnp.int32)
    emb = jnp.take(params["trg_embed"], target, axis=0)            # (B, T, E)
    T = emb.shape[1]

    # gate-separated GRU weights ([r, z, n]) -> no lane-slicing in the kernel
    wih3 = params["dec_w_ih"].reshape(E, 3, H).transpose(1, 0, 2)  # (3, E, H)
    whh3 = params["dec_w_hh"].reshape(H, 3, H).transpose(1, 0, 2)  # (3, H, H)
    bih3 = params["dec_b_ih"].reshape(3, 1, H)
    bhh3 = params["dec_b_hh"].reshape(3, 1, H)

    # vocab projection padded to a full 128-lane tile (masked inside kernel)
    pad = Vp - V
    woh = jnp.pad(params["dec_w_out_h"], ((0, 0), (0, pad)))
    woc = jnp.pad(params["dec_w_out_c"], ((0, 0), (0, pad)))
    bo = jnp.pad(params["dec_b_out"], ((0, pad),)).reshape(1, Vp)

    kernel = functools.partial(gcn2seq_fused_kernel, V)
    fixed = lambda *shape: pl.BlockSpec(shape, lambda b, _s=shape: (0,) * len(_s))

    out_padded = pl.pallas_call(
        kernel,
        out_shape=jax.ShapeDtypeStruct((B * T, Vp), jnp.float32),
        grid=(B,),
        in_specs=[
            pl.BlockSpec((1, S, E), lambda b: (b, 0, 0)),          # x (src emb)
            fixed(S, S),                                           # a_hat
            fixed(E, H), fixed(1, H),                              # gcn w1, b1
            fixed(H, H), fixed(1, H),                              # gcn w2, b2
            fixed(H, H), fixed(1, H),                              # lin w, b
            pl.BlockSpec((1, T, E), lambda b: (b, 0, 0)),          # trg emb
            fixed(3, E, H), fixed(3, 1, H),                        # w_ih, b_ih
            fixed(3, H, H), fixed(3, 1, H),                        # w_hh, b_hh
            fixed(H, Vp), fixed(H, Vp), fixed(1, Vp),              # out proj
        ],
        out_specs=pl.BlockSpec((T, Vp), lambda b: (b, 0)),
        scratch_shapes=[pltpu.VMEM((1, T, H), jnp.float32),
                        pltpu.VMEM((1, T, H), jnp.float32)],
        compiler_params=pltpu.CompilerParams(
            dimension_semantics=("parallel",)),
    )(x, a_hat,
      params["gcn_w1"], params["gcn_b1"].reshape(1, H),
      params["gcn_w2"], params["gcn_b2"].reshape(1, H),
      params["lin_w"], params["lin_b"].reshape(1, H),
      emb, wih3, bih3, whh3, bhh3, woh, woc, bo)

    return out_padded[:, :V]                                       # (B*T, V)


# ----------------------------------------------------------------------------
if __name__ == "__main__":
    src_nword, trg_nword = 30, 20
    num_layer, embed_dim, hidden_dim = 1, 16, 32
    max_len, trg_soi = 8, 1
    B, S = 2, 8

    key = jax.random.PRNGKey(0)
    pkey, skey, tkey = jax.random.split(key, 3)
    params = init_params(pkey, src_nword, trg_nword, embed_dim, hidden_dim)

    source = jax.random.randint(skey, (B, S), 0, src_nword, dtype=jnp.int32)
    target = jax.random.randint(tkey, (B, max_len), 0, trg_nword, dtype=jnp.int32)

    out = gcn2seq_forward(params, source, target, max_len, trg_soi)
    out = jax.block_until_ready(out)

    assert out.shape == (B * max_len, trg_nword)
    assert bool(jnp.all(jnp.isfinite(out)))
    # rows of log_softmax must exp-sum to 1
    assert bool(jnp.allclose(jnp.sum(jnp.exp(out), axis=-1), 1.0, atol=1e-4))
    print("KERNEL_OK")
</pallas_src>

<mosaic_0001>
module attributes {stable_mosaic.version = 11 : i64} {
  func.func @gcn2seq_fused_kernel(%arg0: i32, %arg1: memref<1x8x16xf32, #tpu.memory_space<vmem>>, %arg2: memref<8x8xf32, #tpu.memory_space<vmem>>, %arg3: memref<16x32xf32, #tpu.memory_space<vmem>>, %arg4: memref<1x32xf32, #tpu.memory_space<vmem>>, %arg5: memref<32x32xf32, #tpu.memory_space<vmem>>, %arg6: memref<1x32xf32, #tpu.memory_space<vmem>>, %arg7: memref<32x32xf32, #tpu.memory_space<vmem>>, %arg8: memref<1x32xf32, #tpu.memory_space<vmem>>, %arg9: memref<1x8x16xf32, #tpu.memory_space<vmem>>, %arg10: memref<3x16x32xf32, #tpu.memory_space<vmem>>, %arg11: memref<3x1x32xf32, #tpu.memory_space<vmem>>, %arg12: memref<3x32x32xf32, #tpu.memory_space<vmem>>, %arg13: memref<3x1x32xf32, #tpu.memory_space<vmem>>, %arg14: memref<32x128xf32, #tpu.memory_space<vmem>>, %arg15: memref<32x128xf32, #tpu.memory_space<vmem>>, %arg16: memref<1x128xf32, #tpu.memory_space<vmem>>, %arg17: memref<8x128xf32, #tpu.memory_space<vmem>>, %arg18: memref<1x8x32xf32, #tpu.memory_space<vmem>>, %arg19: memref<1x8x32xf32, #tpu.memory_space<vmem>>) attributes {dimension_semantics = [#tpu.dimension_semantics<parallel>], iteration_bounds = array<i64: 2>, scalar_prefetch = 0 : i64, scratch_operands = 2 : i64, tpu.core_type = #tpu.core_type<tc>, window_params = [{transform_indices = @transform_0, window_bounds = array<i64: 1, 8, 16>}, {pipeline_mode = #tpu.pipeline_mode<synchronous>, transform_indices = @transform_1, window_bounds = array<i64: 8, 8>}, {pipeline_mode = #tpu.pipeline_mode<synchronous>, transform_indices = @transform_2, window_bounds = array<i64: 16, 32>}, {pipeline_mode = #tpu.pipeline_mode<synchronous>, transform_indices = @transform_3, window_bounds = array<i64: 1, 32>}, {pipeline_mode = #tpu.pipeline_mode<synchronous>, transform_indices = @transform_4, window_bounds = array<i64: 32, 32>}, {pipeline_mode = #tpu.pipeline_mode<synchronous>, transform_indices = @transform_5, window_bounds = array<i64: 1, 32>}, {pipeline_mode = #tpu.pipeline_mode<synchronous>, transform_indices = @transform_6, window_bounds = array<i64: 32, 32>}, {pipeline_mode = #tpu.pipeline_mode<synchronous>, transform_indices = @transform_7, window_bounds = array<i64: 1, 32>}, {transform_indices = @transform_8, window_bounds = array<i64: 1, 8, 16>}, {pipeline_mode = #tpu.pipeline_mode<synchronous>, transform_indices = @transform_9, window_bounds = array<i64: 3, 16, 32>}, {pipeline_mode = #tpu.pipeline_mode<synchronous>, transform_indices = @transform_10, window_bounds = array<i64: 3, 1, 32>}, {pipeline_mode = #tpu.pipeline_mode<synchronous>, transform_indices = @transform_11, window_bounds = array<i64: 3, 32, 32>}, {pipeline_mode = #tpu.pipeline_mode<synchronous>, transform_indices = @transform_12, window_bounds = array<i64: 3, 1, 32>}, {pipeline_mode = #tpu.pipeline_mode<synchronous>, transform_indices = @transform_13, window_bounds = array<i64: 32, 128>}, {pipeline_mode = #tpu.pipeline_mode<synchronous>, transform_indices = @transform_14, window_bounds = array<i64: 32, 128>}, {pipeline_mode = #tpu.pipeline_mode<synchronous>, transform_indices = @transform_15, window_bounds = array<i64: 1, 128>}, {transform_indices = @transform_16, window_bounds = array<i64: 8, 128>}]} {
    %c0 = arith.constant 0 : index
    %c0_0 = arith.constant 0 : index
    %0 = vector.load %arg2[%c0, %c0_0] : memref<8x8xf32, #tpu.memory_space<vmem>>, vector<8x8xf32>
    %1 = vector.shape_cast %0 : vector<8x8xf32> to vector<1x8x8xf32>
    %c0_1 = arith.constant 0 : index
    %c0_2 = arith.constant 0 : index
    %c0_3 = arith.constant 0 : index
    %2 = vector.load %arg1[%c0_1, %c0_2, %c0_3] : memref<1x8x16xf32, #tpu.memory_space<vmem>>, vector<1x8x16xf32>
    %3 = vector.shape_cast %2 : vector<1x8x16xf32> to vector<8x16xf32>
    %c0_4 = arith.constant 0 : index
    %c0_5 = arith.constant 0 : index
    %4 = vector.load %arg3[%c0_4, %c0_5] : memref<16x32xf32, #tpu.memory_space<vmem>>, vector<16x32xf32>
    %cst = arith.constant dense<0.000000e+00> : vector<8x32xf32>
    %5 = tpu.matmul %3, %4, %cst {dimension_numbers = #tpu.dot_dimension_numbers<[1], [0], [0], [1], [0, 0, 1, 1], [], []>} : vector<8x16xf32>, vector<16x32xf32>, vector<8x32xf32> -> vector<8x32xf32>
    %6 = vector.shape_cast %5 : vector<8x32xf32> to vector<1x8x32xf32>
    "tpu.trace_start"() <{level = 10 : i32, message = "bst,bth->bsh"}> : () -> ()
    %cst_6 = arith.constant dense<0.000000e+00> : vector<1x8x32xf32>
    %7 = tpu.matmul %1, %6, %cst_6 {dimension_numbers = #tpu.dot_dimension_numbers<[2], [1], [1], [2], [0, 0, 0, 1, 1, 2], [0], [0]>} : vector<1x8x8xf32>, vector<1x8x32xf32>, vector<1x8x32xf32> -> vector<1x8x32xf32>
    "tpu.trace_stop"() : () -> ()
    %c0_7 = arith.constant 0 : index
    %c0_8 = arith.constant 0 : index
    %8 = vector.load %arg4[%c0_7, %c0_8] : memref<1x32xf32, #tpu.memory_space<vmem>>, vector<1x32xf32>
    %9 = vector.shape_cast %8 : vector<1x32xf32> to vector<1x1x32xf32>
    %10 = vector.broadcast %9 : vector<1x1x32xf32> to vector<1x8x32xf32>
    %11 = arith.addf %7, %10 : vector<1x8x32xf32>
    %cst_9 = arith.constant 0.000000e+00 : f32
    %12 = vector.broadcast %cst_9 : f32 to vector<1x8x32xf32>
    %13 = arith.maximumf %11, %12 : vector<1x8x32xf32>
    %14 = vector.shape_cast %13 : vector<1x8x32xf32> to vector<8x32xf32>
    %c0_10 = arith.constant 0 : index
    %c0_11 = arith.constant 0 : index
    %15 = vector.load %arg5[%c0_10, %c0_11] : memref<32x32xf32, #tpu.memory_space<vmem>>, vector<32x32xf32>
    %cst_12 = arith.constant dense<0.000000e+00> : vector<8x32xf32>
    %16 = tpu.matmul %14, %15, %cst_12 {dimension_numbers = #tpu.dot_dimension_numbers<[1], [0], [0], [1], [0, 0, 1, 1], [], []>} : vector<8x32xf32>, vector<32x32xf32>, vector<8x32xf32> -> vector<8x32xf32>
    %17 = vector.shape_cast %16 : vector<8x32xf32> to vector<1x8x32xf32>
    "tpu.trace_start"() <{level = 10 : i32, message = "bst,bth->bsh"}> : () -> ()
    %cst_13 = arith.constant dense<0.000000e+00> : vector<1x8x32xf32>
    %18 = tpu.matmul %1, %17, %cst_13 {dimension_numbers = #tpu.dot_dimension_numbers<[2], [1], [1], [2], [0, 0, 0, 1, 1, 2], [0], [0]>} : vector<1x8x8xf32>, vector<1x8x32xf32>, vector<1x8x32xf32> -> vector<1x8x32xf32>
    "tpu.trace_stop"() : () -> ()
    %c0_14 = arith.constant 0 : index
    %c0_15 = arith.constant 0 : index
    %19 = vector.load %arg6[%c0_14, %c0_15] : memref<1x32xf32, #tpu.memory_space<vmem>>, vector<1x32xf32>
    %20 = vector.shape_cast %19 : vector<1x32xf32> to vector<1x1x32xf32>
    %21 = vector.broadcast %20 : vector<1x1x32xf32> to vector<1x8x32xf32>
    %22 = arith.addf %18, %21 : vector<1x8x32xf32>
    %cst_16 = arith.constant 0.000000e+00 : f32
    %23 = vector.broadcast %cst_16 : f32 to vector<1x8x32xf32>
    %24 = arith.maximumf %22, %23 : vector<1x8x32xf32>
    %cst_17 = arith.constant dense<0.000000e+00> : vector<1x32xf32>
    %25 = vector.multi_reduction <add>, %24, %cst_17 [1] : vector<1x8x32xf32> to vector<1x32xf32>
    %cst_18 = arith.constant 8.000000e+00 : f32
    %26 = vector.broadcast %cst_18 : f32 to vector<1x32xf32>
    %27 = arith.divf %25, %26 : vector<1x32xf32>
    %c0_19 = arith.constant 0 : index
    %c0_20 = arith.constant 0 : index
    %28 = vector.load %arg7[%c0_19, %c0_20] : memref<32x32xf32, #tpu.memory_space<vmem>>, vector<32x32xf32>
    %cst_21 = arith.constant dense<0.000000e+00> : vector<1x32xf32>
    %29 = tpu.matmul %27, %28, %cst_21 {dimension_numbers = #tpu.dot_dimension_numbers<[1], [0], [0], [1], [0, 0, 1, 1], [], []>} : vector<1x32xf32>, vector<32x32xf32>, vector<1x32xf32> -> vector<1x32xf32>
    %c0_22 = arith.constant 0 : index
    %c0_23 = arith.constant 0 : index
    %30 = vector.load %arg8[%c0_22, %c0_23] : memref<1x32xf32, #tpu.memory_space<vmem>>, vector<1x32xf32>
    %31 = arith.addf %29, %30 : vector<1x32xf32>
    %32 = math.tanh %31 : vector<1x32xf32>
    %c0_24 = arith.constant 0 : index
    %c0_25 = arith.constant 0 : index
    %c0_26 = arith.constant 0 : index
    %33 = vector.load %arg9[%c0_24, %c0_25, %c0_26] : memref<1x8x16xf32, #tpu.memory_space<vmem>>, vector<1x8x16xf32>
    %34 = vector.shape_cast %33 : vector<1x8x16xf32> to vector<8x16xf32>
    %c0_27 = arith.constant 0 : index
    %c0_28 = arith.constant 0 : index
    %c0_29 = arith.constant 0 : index
    %35 = vector.load %arg10[%c0_27, %c0_28, %c0_29] : memref<3x16x32xf32, #tpu.memory_space<vmem>>, vector<1x16x32xf32>
    %36 = vector.shape_cast %35 : vector<1x16x32xf32> to vector<16x32xf32>
    %cst_30 = arith.constant dense<0.000000e+00> : vector<8x32xf32>
    %37 = tpu.matmul %34, %36, %cst_30 {dimension_numbers = #tpu.dot_dimension_numbers<[1], [0], [0], [1], [0, 0, 1, 1], [], []>} : vector<8x16xf32>, vector<16x32xf32>, vector<8x32xf32> -> vector<8x32xf32>
    %c0_31 = arith.constant 0 : index
    %c0_32 = arith.constant 0 : index
    %c0_33 = arith.constant 0 : index
    %38 = vector.load %arg11[%c0_31, %c0_32, %c0_33] : memref<3x1x32xf32, #tpu.memory_space<vmem>>, vector<1x1x32xf32>
    %39 = vector.shape_cast %38 : vector<1x1x32xf32> to vector<1x32xf32>
    %40 = vector.broadcast %39 : vector<1x32xf32> to vector<8x32xf32>
    %41 = arith.addf %37, %40 : vector<8x32xf32>
    %42 = vector.shape_cast %41 : vector<8x32xf32> to vector<1x8x32xf32>
    %c1 = arith.constant 1 : index
    %c0_34 = arith.constant 0 : index
    %c0_35 = arith.constant 0 : index
    %43 = vector.load %arg10[%c1, %c0_34, %c0_35] : memref<3x16x32xf32, #tpu.memory_space<vmem>>, vector<1x16x32xf32>
    %44 = vector.shape_cast %43 : vector<1x16x32xf32> to vector<16x32xf32>
    %cst_36 = arith.constant dense<0.000000e+00> : vector<8x32xf32>
    %45 = tpu.matmul %34, %44, %cst_36 {dimension_numbers = #tpu.dot_dimension_numbers<[1], [0], [0], [1], [0, 0, 1, 1], [], []>} : vector<8x16xf32>, vector<16x32xf32>, vector<8x32xf32> -> vector<8x32xf32>
    %c1_37 = arith.constant 1 : index
    %c0_38 = arith.constant 0 : index
    %c0_39 = arith.constant 0 : index
    %46 = vector.load %arg11[%c1_37, %c0_38, %c0_39] : memref<3x1x32xf32, #tpu.memory_space<vmem>>, vector<1x1x32xf32>
    %47 = vector.shape_cast %46 : vector<1x1x32xf32> to vector<1x32xf32>
    %48 = vector.broadcast %47 : vector<1x32xf32> to vector<8x32xf32>
    %49 = arith.addf %45, %48 : vector<8x32xf32>
    %50 = vector.shape_cast %49 : vector<8x32xf32> to vector<1x8x32xf32>
    %c2 = arith.constant 2 : index
    %c0_40 = arith.constant 0 : index
    %c0_41 = arith.constant 0 : index
    %51 = vector.load %arg10[%c2, %c0_40, %c0_41] : memref<3x16x32xf32, #tpu.memory_space<vmem>>, vector<1x16x32xf32>
    %52 = vector.shape_cast %51 : vector<1x16x32xf32> to vector<16x32xf32>
    %cst_42 = arith.constant dense<0.000000e+00> : vector<8x32xf32>
    %53 = tpu.matmul %34, %52, %cst_42 {dimension_numbers = #tpu.dot_dimension_numbers<[1], [0], [0], [1], [0, 0, 1, 1], [], []>} : vector<8x16xf32>, vector<16x32xf32>, vector<8x32xf32> -> vector<8x32xf32>
    %c2_43 = arith.constant 2 : index
    %c0_44 = arith.constant 0 : index
    %c0_45 = arith.constant 0 : index
    %54 = vector.load %arg11[%c2_43, %c0_44, %c0_45] : memref<3x1x32xf32, #tpu.memory_space<vmem>>, vector<1x1x32xf32>
    %55 = vector.shape_cast %54 : vector<1x1x32xf32> to vector<1x32xf32>
    %56 = vector.broadcast %55 : vector<1x32xf32> to vector<8x32xf32>
    %57 = arith.addf %53, %56 : vector<8x32xf32>
    %58 = vector.shape_cast %57 : vector<8x32xf32> to vector<1x8x32xf32>
    %c0_46 = arith.constant 0 : index
    %c0_47 = arith.constant 0 : index
    %c0_48 = arith.constant 0 : index
    %59 = vector.load %arg12[%c0_46, %c0_47, %c0_48] : memref<3x32x32xf32, #tpu.memory_space<vmem>>, vector<1x32x32xf32>
    %60 = vector.shape_cast %59 : vector<1x32x32xf32> to vector<32x32xf32>
    %cst_49 = arith.constant dense<0.000000e+00> : vector<1x32xf32>
    %61 = tpu.matmul %32, %60, %cst_49 {dimension_numbers = #tpu.dot_dimension_numbers<[1], [0], [0], [1], [0, 0, 1, 1], [], []>} : vector<1x32xf32>, vector<32x32xf32>, vector<1x32xf32> -> vector<1x32xf32>
    %c0_50 = arith.constant 0 : index
    %c0_51 = arith.constant 0 : index
    %c0_52 = arith.constant 0 : index
    %62 = vector.load %arg13[%c0_50, %c0_51, %c0_52] : memref<3x1x32xf32, #tpu.memory_space<vmem>>, vector<1x1x32xf32>
    %63 = vector.shape_cast %62 : vector<1x1x32xf32> to vector<1x32xf32>
    %64 = arith.addf %61, %63 : vector<1x32xf32>
    %c1_53 = arith.constant 1 : index
    %c0_54 = arith.constant 0 : index
    %c0_55 = arith.constant 0 : index
    %65 = vector.load %arg12[%c1_53, %c0_54, %c0_55] : memref<3x32x32xf32, #tpu.memory_space<vmem>>, vector<1x32x32xf32>
    %66 = vector.shape_cast %65 : vector<1x32x32xf32> to vector<32x32xf32>
    %cst_56 = arith.constant dense<0.000000e+00> : vector<1x32xf32>
    %67 = tpu.matmul %32, %66, %cst_56 {dimension_numbers = #tpu.dot_dimension_numbers<[1], [0], [0], [1], [0, 0, 1, 1], [], []>} : vector<1x32xf32>, vector<32x32xf32>, vector<1x32xf32> -> vector<1x32xf32>
    %c1_57 = arith.constant 1 : index
    %c0_58 = arith.constant 0 : index
    %c0_59 = arith.constant 0 : index
    %68 = vector.load %arg13[%c1_57, %c0_58, %c0_59] : memref<3x1x32xf32, #tpu.memory_space<vmem>>, vector<1x1x32xf32>
    %69 = vector.shape_cast %68 : vector<1x1x32xf32> to vector<1x32xf32>
    %70 = arith.addf %67, %69 : vector<1x32xf32>
    %c2_60 = arith.constant 2 : index
    %c0_61 = arith.constant 0 : index
    %c0_62 = arith.constant 0 : index
    %71 = vector.load %arg12[%c2_60, %c0_61, %c0_62] : memref<3x32x32xf32, #tpu.memory_space<vmem>>, vector<1x32x32xf32>
    %72 = vector.shape_cast %71 : vector<1x32x32xf32> to vector<32x32xf32>
    %cst_63 = arith.constant dense<0.000000e+00> : vector<1x32xf32>
    %73 = tpu.matmul %32, %72, %cst_63 {dimension_numbers = #tpu.dot_dimension_numbers<[1], [0], [0], [1], [0, 0, 1, 1], [], []>} : vector<1x32xf32>, vector<32x32xf32>, vector<1x32xf32> -> vector<1x32xf32>
    %c2_64 = arith.constant 2 : index
    %c0_65 = arith.constant 0 : index
    %c0_66 = arith.constant 0 : index
    %74 = vector.load %arg13[%c2_64, %c0_65, %c0_66] : memref<3x1x32xf32, #tpu.memory_space<vmem>>, vector<1x1x32xf32>
    %75 = vector.shape_cast %74 : vector<1x1x32xf32> to vector<1x32xf32>
    %76 = arith.addf %73, %75 : vector<1x32xf32>
    %77 = vector.extract_strided_slice %42 {offsets = [0, 0, 0], sizes = [1, 1, 32], strides = [1, 1, 1]} : vector<1x8x32xf32> to vector<1x1x32xf32>
    %78 = vector.shape_cast %77 : vector<1x1x32xf32> to vector<1x32xf32>
    %79 = arith.addf %78, %64 : vector<1x32xf32>
    %80 = arith.negf %79 : vector<1x32xf32>
    %81 = math.exp %80 : vector<1x32xf32>
    %cst_67 = arith.constant 1.000000e+00 : f32
    %82 = vector.broadcast %cst_67 : f32 to vector<1x32xf32>
    %83 = arith.addf %82, %81 : vector<1x32xf32>
    %84 = arith.divf %82, %83 : vector<1x32xf32>
    %85 = vector.extract_strided_slice %50 {offsets = [0, 0, 0], sizes = [1, 1, 32], strides = [1, 1, 1]} : vector<1x8x32xf32> to vector<1x1x32xf32>
    %86 = vector.shape_cast %85 : vector<1x1x32xf32> to vector<1x32xf32>
    %87 = arith.addf %86, %70 : vector<1x32xf32>
    %88 = arith.negf %87 : vector<1x32xf32>
    %89 = math.exp %88 : vector<1x32xf32>
    %cst_68 = arith.constant 1.000000e+00 : f32
    %90 = vector.broadcast %cst_68 : f32 to vector<1x32xf32>
    %91 = arith.addf %90, %89 : vector<1x32xf32>
    %92 = arith.divf %90, %91 : vector<1x32xf32>
    %93 = vector.extract_strided_slice %58 {offsets = [0, 0, 0], sizes = [1, 1, 32], strides = [1, 1, 1]} : vector<1x8x32xf32> to vector<1x1x32xf32>
    %94 = vector.shape_cast %93 : vector<1x1x32xf32> to vector<1x32xf32>
    %95 = arith.mulf %84, %76 : vector<1x32xf32>
    %96 = arith.addf %94, %95 : vector<1x32xf32>
    %97 = math.tanh %96 : vector<1x32xf32>
    %cst_69 = arith.constant 1.000000e+00 : f32
    %98 = vector.broadcast %cst_69 : f32 to vector<1x32xf32>
    %99 = arith.subf %98, %92 : vector<1x32xf32>
    %100 = arith.mulf %99, %97 : vector<1x32xf32>
    %101 = arith.mulf %92, %32 : vector<1x32xf32>
    %102 = arith.addf %100, %101 : vector<1x32xf32>
    %103 = vector.shape_cast %102 : vector<1x32xf32> to vector<1x1x32xf32>
    "tpu.trace_start"() <{level = 10 : i32, message = "bqh,bsh->bqs"}> : () -> ()
    %cst_70 = arith.constant dense<0.000000e+00> : vector<1x1x8xf32>
    %104 = tpu.matmul %103, %24, %cst_70 {dimension_numbers = #tpu.dot_dimension_numbers<[2], [2], [1], [1], [0, 0, 0, 1, 1, 1], [0], [0]>} : vector<1x1x32xf32>, vector<1x8x32xf32>, vector<1x1x8xf32> -> vector<1x1x8xf32>
    "tpu.trace_stop"() : () -> ()
    %105 = vector.shape_cast %104 : vector<1x1x8xf32> to vector<1x8xf32>
    %cst_71 = arith.constant dense<0xFF800000> : vector<1xf32>
    %106 = vector.multi_reduction <maximumf>, %105, %cst_71 [1] : vector<1x8xf32> to vector<1xf32>
    %107 = vector.shape_cast %106 : vector<1xf32> to vector<1x1xf32>
    %108 = vector.broadcast %107 : vector<1x1xf32> to vector<1x8xf32>
    %109 = arith.subf %105, %108 : vector<1x8xf32>
    %110 = math.exp %109 : vector<1x8xf32>
    %cst_72 = arith.constant dense<0.000000e+00> : vector<1xf32>
    %111 = vector.multi_reduction <add>, %110, %cst_72 [1] : vector<1x8xf32> to vector<1xf32>
    %112 = vector.shape_cast %111 : vector<1xf32> to vector<1x1xf32>
    %113 = tpu.reciprocal %112 {approx = true} : vector<1x1xf32> -> vector<1x1xf32>
    %114 = vector.broadcast %113 : vector<1x1xf32> to vector<1x8xf32>
    %115 = arith.mulf %110, %114 : vector<1x8xf32>
    %116 = vector.shape_cast %115 : vector<1x8xf32> to vector<1x1x8xf32>
    "tpu.trace_start"() <{level = 10 : i32, message = "bqs,bsh->bqh"}> : () -> ()
    %cst_73 = arith.constant dense<0.000000e+00> : vector<1x1x32xf32>
    %117 = tpu.matmul %116, %24, %cst_73 {dimension_numbers = #tpu.dot_dimension_numbers<[2], [1], [1], [2], [0, 0, 0, 1, 1, 2], [0], [0]>} : vector<1x1x8xf32>, vector<1x8x32xf32>, vector<1x1x32xf32> -> vector<1x1x32xf32>
    "tpu.trace_stop"() : () -> ()
    %118 = vector.shape_cast %117 : vector<1x1x32xf32> to vector<1x32xf32>
    %119 = vector.shape_cast %102 : vector<1x32xf32> to vector<1x1x32xf32>
    %c0_74 = arith.constant 0 : index
    %c0_75 = arith.constant 0 : index
    %c0_76 = arith.constant 0 : index
    %120 = vector.load %arg18[%c0_74, %c0_75, %c0_76] : memref<1x8x32xf32, #tpu.memory_space<vmem>>, vector<1x1x32xf32>
    tpu.vector_store %arg18[%c0_74, %c0_75, %c0_76], %119 {strides = array<i32>} : memref<1x8x32xf32, #tpu.memory_space<vmem>>, vector<1x1x32xf32>,
    %121 = vector.shape_cast %118 : vector<1x32xf32> to vector<1x1x32xf32>
    %c0_77 = arith.constant 0 : index
    %c0_78 = arith.constant 0 : index
    %c0_79 = arith.constant 0 : index
    %122 = vector.load %arg19[%c0_77, %c0_78, %c0_79] : memref<1x8x32xf32, #tpu.memory_space<vmem>>, vector<1x1x32xf32>
    tpu.vector_store %arg19[%c0_77, %c0_78, %c0_79], %121 {strides = array<i32>} : memref<1x8x32xf32, #tpu.memory_space<vmem>>, vector<1x1x32xf32>,
    %c0_80 = arith.constant 0 : index
    %c0_81 = arith.constant 0 : index
    %c0_82 = arith.constant 0 : index
    %123 = vector.load %arg12[%c0_80, %c0_81, %c0_82] : memref<3x32x32xf32, #tpu.memory_space<vmem>>, vector<1x32x32xf32>
    %124 = vector.shape_cast %123 : vector<1x32x32xf32> to vector<32x32xf32>
    %cst_83 = arith.constant dense<0.000000e+00> : vector<1x32xf32>
    %125 = tpu.matmul %102, %124, %cst_83 {dimension_numbers = #tpu.dot_dimension_numbers<[1], [0], [0], [1], [0, 0, 1, 1], [], []>} : vector<1x32xf32>, vector<32x32xf32>, vector<1x32xf32> -> vector<1x32xf32>
    %c0_84 = arith.constant 0 : index
    %c0_85 = arith.constant 0 : index
    %c0_86 = arith.constant 0 : index
    %126 = vector.load %arg13[%c0_84, %c0_85, %c0_86] : memref<3x1x32xf32, #tpu.memory_space<vmem>>, vector<1x1x32xf32>
    %127 = vector.shape_cast %126 : vector<1x1x32xf32> to vector<1x32xf32>
    %128 = arith.addf %125, %127 : vector<1x32xf32>
    %c1_87 = arith.constant 1 : index
    %c0_88 = arith.constant 0 : index
    %c0_89 = arith.constant 0 : index
    %129 = vector.load %arg12[%c1_87, %c0_88, %c0_89] : memref<3x32x32xf32, #tpu.memory_space<vmem>>, vector<1x32x32xf32>
    %130 = vector.shape_cast %129 : vector<1x32x32xf32> to vector<32x32xf32>
    %cst_90 = arith.constant dense<0.000000e+00> : vector<1x32xf32>
    %131 = tpu.matmul %102, %130, %cst_90 {dimension_numbers = #tpu.dot_dimension_numbers<[1], [0], [0], [1], [0, 0, 1, 1], [], []>} : vector<1x32xf32>, vector<32x32xf32>, vector<1x32xf32> -> vector<1x32xf32>
    %c1_91 = arith.constant 1 : index
    %c0_92 = arith.constant 0 : index
    %c0_93 = arith.constant 0 : index
    %132 = vector.load %arg13[%c1_91, %c0_92, %c0_93] : memref<3x1x32xf32, #tpu.memory_space<vmem>>, vector<1x1x32xf32>
    %133 = vector.shape_cast %132 : vector<1x1x32xf32> to vector<1x32xf32>
    %134 = arith.addf %131, %133 : vector<1x32xf32>
    %c2_94 = arith.constant 2 : index
    %c0_95 = arith.constant 0 : index
    %c0_96 = arith.constant 0 : index
    %135 = vector.load %arg12[%c2_94, %c0_95, %c0_96] : memref<3x32x32xf32, #tpu.memory_space<vmem>>, vector<1x32x32xf32>
    %136 = vector.shape_cast %135 : vector<1x32x32xf32> to vector<32x32xf32>
    %cst_97 = arith.constant dense<0.000000e+00> : vector<1x32xf32>
    %137 = tpu.matmul %102, %136, %cst_97 {dimension_numbers = #tpu.dot_dimension_numbers<[1], [0], [0], [1], [0, 0, 1, 1], [], []>} : vector<1x32xf32>, vector<32x32xf32>, vector<1x32xf32> -> vector<1x32xf32>
    %c2_98 = arith.constant 2 : index
    %c0_99 = arith.constant 0 : index
    %c0_100 = arith.constant 0 : index
    %138 = vector.load %arg13[%c2_98, %c0_99, %c0_100] : memref<3x1x32xf32, #tpu.memory_space<vmem>>, vector<1x1x32xf32>
    %139 = vector.shape_cast %138 : vector<1x1x32xf32> to vector<1x32xf32>
    %140 = arith.addf %137, %139 : vector<1x32xf32>
    %141 = vector.extract_strided_slice %42 {offsets = [0, 1, 0], sizes = [1, 1, 32], strides = [1, 1, 1]} : vector<1x8x32xf32> to vector<1x1x32xf32>
    %142 = vector.shape_cast %141 : vector<1x1x32xf32> to vector<1x32xf32>
    %143 = arith.addf %142, %128 : vector<1x32xf32>
    %144 = arith.negf %143 : vector<1x32xf32>
    %145 = math.exp %144 : vector<1x32xf32>
    %cst_101 = arith.constant 1.000000e+00 : f32
    %146 = vector.broadcast %cst_101 : f32 to vector<1x32xf32>
    %147 = arith.addf %146, %145 : vector<1x32xf32>
    %148 = arith.divf %146, %147 : vector<1x32xf32>
    %149 = vector.extract_strided_slice %50 {offsets = [0, 1, 0], sizes = [1, 1, 32], strides = [1, 1, 1]} : vector<1x8x32xf32> to vector<1x1x32xf32>
    %150 = vector.shape_cast %149 : vector<1x1x32xf32> to vector<1x32xf32>
    %151 = arith.addf %150, %134 : vector<1x32xf32>
    %152 = arith.negf %151 : vector<1x32xf32>
    %153 = math.exp %152 : vector<1x32xf32>
    %cst_102 = arith.constant 1.000000e+00 : f32
    %154 = vector.broadcast %cst_102 : f32 to vector<1x32xf32>
    %155 = arith.addf %154, %153 : vector<1x32xf32>
    %156 = arith.divf %154, %155 : vector<1x32xf32>
    %157 = vector.extract_strided_slice %58 {offsets = [0, 1, 0], sizes = [1, 1, 32], strides = [1, 1, 1]} : vector<1x8x32xf32> to vector<1x1x32xf32>
    %158 = vector.shape_cast %157 : vector<1x1x32xf32> to vector<1x32xf32>
    %159 = arith.mulf %148, %140 : vector<1x32xf32>
    %160 = arith.addf %158, %159 : vector<1x32xf32>
    %161 = math.tanh %160 : vector<1x32xf32>
    %cst_103 = arith.constant 1.000000e+00 : f32
    %162 = vector.broadcast %cst_103 : f32 to vector<1x32xf32>
    %163 = arith.subf %162, %156 : vector<1x32xf32>
    %164 = arith.mulf %163, %161 : vector<1x32xf32>
    %165 = arith.mulf %156, %102 : vector<1x32xf32>
    %166 = arith.addf %164, %165 : vector<1x32xf32>
    %167 = vector.shape_cast %166 : vector<1x32xf32> to vector<1x1x32xf32>
    "tpu.trace_start"() <{level = 10 : i32, message = "bqh,bsh->bqs"}> : () -> ()
    %cst_104 = arith.constant dense<0.000000e+00> : vector<1x1x8xf32>
    %168 = tpu.matmul %167, %24, %cst_104 {dimension_numbers = #tpu.dot_dimension_numbers<[2], [2], [1], [1], [0, 0, 0, 1, 1, 1], [0], [0]>} : vector<1x1x32xf32>, vector<1x8x32xf32>, vector<1x1x8xf32> -> vector<1x1x8xf32>
    "tpu.trace_stop"() : () -> ()
    %169 = vector.shape_cast %168 : vector<1x1x8xf32> to vector<1x8xf32>
    %cst_105 = arith.constant dense<0xFF800000> : vector<1xf32>
    %170 = vector.multi_reduction <maximumf>, %169, %cst_105 [1] : vector<1x8xf32> to vector<1xf32>
    %171 = vector.shape_cast %170 : vector<1xf32> to vector<1x1xf32>
    %172 = vector.broadcast %171 : vector<1x1xf32> to vector<1x8xf32>
    %173 = arith.subf %169, %172 : vector<1x8xf32>
    %174 = math.exp %173 : vector<1x8xf32>
    %cst_106 = arith.constant dense<0.000000e+00> : vector<1xf32>
    %175 = vector.multi_reduction <add>, %174, %cst_106 [1] : vector<1x8xf32> to vector<1xf32>
    %176 = vector.shape_cast %175 : vector<1xf32> to vector<1x1xf32>
    %177 = tpu.reciprocal %176 {approx = true} : vector<1x1xf32> -> vector<1x1xf32>
    %178 = vector.broadcast %177 : vector<1x1xf32> to vector<1x8xf32>
    %179 = arith.mulf %174, %178 : vector<1x8xf32>
    %180 = vector.shape_cast %179 : vector<1x8xf32> to vector<1x1x8xf32>
    "tpu.trace_start"() <{level = 10 : i32, message = "bqs,bsh->bqh"}> : () -> ()
    %cst_107 = arith.constant dense<0.000000e+00> : vector<1x1x32xf32>
    %181 = tpu.matmul %180, %24, %cst_107 {dimension_numbers = #tpu.dot_dimension_numbers<[2], [1], [1], [2], [0, 0, 0, 1, 1, 2], [0], [0]>} : vector<1x1x8xf32>, vector<1x8x32xf32>, vector<1x1x32xf32> -> vector<1x1x32xf32>
    "tpu.trace_stop"() : () -> ()
    %182 = vector.shape_cast %181 : vector<1x1x32xf32> to vector<1x32xf32>
    %183 = vector.shape_cast %166 : vector<1x32xf32> to vector<1x1x32xf32>
    %c0_108 = arith.constant 0 : index
    %c1_109 = arith.constant 1 : index
    %c0_110 = arith.constant 0 : index
    %184 = vector.load %arg18[%c0_108, %c1_109, %c0_110] : memref<1x8x32xf32, #tpu.memory_space<vmem>>, vector<1x1x32xf32>
    tpu.vector_store %arg18[%c0_108, %c1_109, %c0_110], %183 {strides = array<i32>} : memref<1x8x32xf32, #tpu.memory_space<vmem>>, vector<1x1x32xf32>,
    %185 = vector.shape_cast %182 : vector<1x32xf32> to vector<1x1x32xf32>
    %c0_111 = arith.constant 0 : index
    %c1_112 = arith.constant 1 : index
    %c0_113 = arith.constant 0 : index
    %186 = vector.load %arg19[%c0_111, %c1_112, %c0_113] : memref<1x8x32xf32, #tpu.memory_space<vmem>>, vector<1x1x32xf32>
    tpu.vector_store %arg19[%c0_111, %c1_112, %c0_113], %185 {strides = array<i32>} : memref<1x8x32xf32, #tpu.memory_space<vmem>>, vector<1x1x32xf32>,
    %c0_114 = arith.constant 0 : index
    %c0_115 = arith.constant 0 : index
    %c0_116 = arith.constant 0 : index
    %187 = vector.load %arg12[%c0_114, %c0_115, %c0_116] : memref<3x32x32xf32, #tpu.memory_space<vmem>>, vector<1x32x32xf32>
    %188 = vector.shape_cast %187 : vector<1x32x32xf32> to vector<32x32xf32>
    %cst_117 = arith.constant dense<0.000000e+00> : vector<1x32xf32>
    %189 = tpu.matmul %166, %188, %cst_117 {dimension_numbers = #tpu.dot_dimension_numbers<[1], [0], [0], [1], [0, 0, 1, 1], [], []>} : vector<1x32xf32>, vector<32x32xf32>, vector<1x32xf32> -> vector<1x32xf32>
    %c0_118 = arith.constant 0 : index
    %c0_119 = arith.constant 0 : index
    %c0_120 = arith.constant 0 : index
    %190 = vector.load %arg13[%c0_118, %c0_119, %c0_120] : memref<3x1x32xf32, #tpu.memory_space<vmem>>, vector<1x1x32xf32>
    %191 = vector.shape_cast %190 : vector<1x1x32xf32> to vector<1x32xf32>
    %192 = arith.addf %189, %191 : vector<1x32xf32>
    %c1_121 = arith.constant 1 : index
    %c0_122 = arith.constant 0 : index
    %c0_123 = arith.constant 0 : index
    %193 = vector.load %arg12[%c1_121, %c0_122, %c0_123] : memref<3x32x32xf32, #tpu.memory_space<vmem>>, vector<1x32x32xf32>
    %194 = vector.shape_cast %193 : vector<1x32x32xf32> to vector<32x32xf32>
    %cst_124 = arith.constant dense<0.000000e+00> : vector<1x32xf32>
    %195 = tpu.matmul %166, %194, %cst_124 {dimension_numbers = #tpu.dot_dimension_numbers<[1], [0], [0], [1], [0, 0, 1, 1], [], []>} : vector<1x32xf32>, vector<32x32xf32>, vector<1x32xf32> -> vector<1x32xf32>
    %c1_125 = arith.constant 1 : index
    %c0_126 = arith.constant 0 : index
    %c0_127 = arith.constant 0 : index
    %196 = vector.load %arg13[%c1_125, %c0_126, %c0_127] : memref<3x1x32xf32, #tpu.memory_space<vmem>>, vector<1x1x32xf32>
    %197 = vector.shape_cast %196 : vector<1x1x32xf32> to vector<1x32xf32>
    %198 = arith.addf %195, %197 : vector<1x32xf32>
    %c2_128 = arith.constant 2 : index
    %c0_129 = arith.constant 0 : index
    %c0_130 = arith.constant 0 : index
    %199 = vector.load %arg12[%c2_128, %c0_129, %c0_130] : memref<3x32x32xf32, #tpu.memory_space<vmem>>, vector<1x32x32xf32>
    %200 = vector.shape_cast %199 : vector<1x32x32xf32> to vector<32x32xf32>
    %cst_131 = arith.constant dense<0.000000e+00> : vector<1x32xf32>
    %201 = tpu.matmul %166, %200, %cst_131 {dimension_numbers = #tpu.dot_dimension_numbers<[1], [0], [0], [1], [0, 0, 1, 1], [], []>} : vector<1x32xf32>, vector<32x32xf32>, vector<1x32xf32> -> vector<1x32xf32>
    %c2_132 = arith.constant 2 : index
    %c0_133 = arith.constant 0 : index
    %c0_134 = arith.constant 0 : index
    %202 = vector.load %arg13[%c2_132, %c0_133, %c0_134] : memref<3x1x32xf32, #tpu.memory_space<vmem>>, vector<1x1x32xf32>
    %203 = vector.shape_cast %202 : vector<1x1x32xf32> to vector<1x32xf32>
    %204 = arith.addf %201, %203 : vector<1x32xf32>
    %205 = vector.extract_strided_slice %42 {offsets = [0, 2, 0], sizes = [1, 1, 32], strides = [1, 1, 1]} : vector<1x8x32xf32> to vector<1x1x32xf32>
    %206 = vector.shape_cast %205 : vector<1x1x32xf32> to vector<1x32xf32>
    %207 = arith.addf %206, %192 : vector<1x32xf32>
    %208 = arith.negf %207 : vector<1x32xf32>
    %209 = math.exp %208 : vector<1x32xf32>
    %cst_135 = arith.constant 1.000000e+00 : f32
    %210 = vector.broadcast %cst_135 : f32 to vector<1x32xf32>
    %211 = arith.addf %210, %209 : vector<1x32xf32>
    %212 = arith.divf %210, %211 : vector<1x32xf32>
    %213 = vector.extract_strided_slice %50 {offsets = [0, 2, 0], sizes = [1, 1, 32], strides = [1, 1, 1]} : vector<1x8x32xf32> to vector<1x1x32xf32>
    %214 = vector.shape_cast %213 : vector<1x1x32xf32> to vector<1x32xf32>
    %215 = arith.addf %214, %198 : vector<1x32xf32>
    %216 = arith.negf %215 : vector<1x32xf32>
    %217 = math.exp %216 : vector<1x32xf32>
    %cst_136 = arith.constant 1.000000e+00 : f32
    %218 = vector.broadcast %cst_136 : f32 to vector<1x32xf32>
    %219 = arith.addf %218, %217 : vector<1x32xf32>
    %220 = arith.divf %218, %219 : vector<1x32xf32>
    %221 = vector.extract_strided_slice %58 {offsets = [0, 2, 0], sizes = [1, 1, 32], strides = [1, 1, 1]} : vector<1x8x32xf32> to vector<1x1x32xf32>
    %222 = vector.shape_cast %221 : vector<1x1x32xf32> to vector<1x32xf32>
    %223 = arith.mulf %212, %204 : vector<1x32xf32>
    %224 = arith.addf %222, %223 : vector<1x32xf32>
    %225 = math.tanh %224 : vector<1x32xf32>
    %cst_137 = arith.constant 1.000000e+00 : f32
    %226 = vector.broadcast %cst_137 : f32 to vector<1x32xf32>
    %227 = arith.subf %226, %220 : vector<1x32xf32>
    %228 = arith.mulf %227, %225 : vector<1x32xf32>
    %229 = arith.mulf %220, %166 : vector<1x32xf32>
    %230 = arith.addf %228, %229 : vector<1x32xf32>
    %231 = vector.shape_cast %230 : vector<1x32xf32> to vector<1x1x32xf32>
    "tpu.trace_start"() <{level = 10 : i32, message = "bqh,bsh->bqs"}> : () -> ()
    %cst_138 = arith.constant dense<0.000000e+00> : vector<1x1x8xf32>
    %232 = tpu.matmul %231, %24, %cst_138 {dimension_numbers = #tpu.dot_dimension_numbers<[2], [2], [1], [1], [0, 0, 0, 1, 1, 1], [0], [0]>} : vector<1x1x32xf32>, vector<1x8x32xf32>, vector<1x1x8xf32> -> vector<1x1x8xf32>
    "tpu.trace_stop"() : () -> ()
    %233 = vector.shape_cast %232 : vector<1x1x8xf32> to vector<1x8xf32>
    %cst_139 = arith.constant dense<0xFF800000> : vector<1xf32>
    %234 = vector.multi_reduction <maximumf>, %233, %cst_139 [1] : vector<1x8xf32> to vector<1xf32>
    %235 = vector.shape_cast %234 : vector<1xf32> to vector<1x1xf32>
    %236 = vector.broadcast %235 : vector<1x1xf32> to vector<1x8xf32>
    %237 = arith.subf %233, %236 : vector<1x8xf32>
    %238 = math.exp %237 : vector<1x8xf32>
    %cst_140 = arith.constant dense<0.000000e+00> : vector<1xf32>
    %239 = vector.multi_reduction <add>, %238, %cst_140 [1] : vector<1x8xf32> to vector<1xf32>
    %240 = vector.shape_cast %239 : vector<1xf32> to vector<1x1xf32>
    %241 = tpu.reciprocal %240 {approx = true} : vector<1x1xf32> -> vector<1x1xf32>
    %242 = vector.broadcast %241 : vector<1x1xf32> to vector<1x8xf32>
    %243 = arith.mulf %238, %242 : vector<1x8xf32>
    %244 = vector.shape_cast %243 : vector<1x8xf32> to vector<1x1x8xf32>
    "tpu.trace_start"() <{level = 10 : i32, message = "bqs,bsh->bqh"}> : () -> ()
    %cst_141 = arith.constant dense<0.000000e+00> : vector<1x1x32xf32>
    %245 = tpu.matmul %244, %24, %cst_141 {dimension_numbers = #tpu.dot_dimension_numbers<[2], [1], [1], [2], [0, 0, 0, 1, 1, 2], [0], [0]>} : vector<1x1x8xf32>, vector<1x8x32xf32>, vector<1x1x32xf32> -> vector<1x1x32xf32>
    "tpu.trace_stop"() : () -> ()
    %246 = vector.shape_cast %245 : vector<1x1x32xf32> to vector<1x32xf32>
    %247 = vector.shape_cast %230 : vector<1x32xf32> to vector<1x1x32xf32>
    %c0_142 = arith.constant 0 : index
    %c2_143 = arith.constant 2 : index
    %c0_144 = arith.constant 0 : index
    %248 = vector.load %arg18[%c0_142, %c2_143, %c0_144] : memref<1x8x32xf32, #tpu.memory_space<vmem>>, vector<1x1x32xf32>
    tpu.vector_store %arg18[%c0_142, %c2_143, %c0_144], %247 {strides = array<i32>} : memref<1x8x32xf32, #tpu.memory_space<vmem>>, vector<1x1x32xf32>,
    %249 = vector.shape_cast %246 : vector<1x32xf32> to vector<1x1x32xf32>
    %c0_145 = arith.constant 0 : index
    %c2_146 = arith.constant 2 : index
    %c0_147 = arith.constant 0 : index
    %250 = vector.load %arg19[%c0_145, %c2_146, %c0_147] : memref<1x8x32xf32, #tpu.memory_space<vmem>>, vector<1x1x32xf32>
    tpu.vector_store %arg19[%c0_145, %c2_146, %c0_147], %249 {strides = array<i32>} : memref<1x8x32xf32, #tpu.memory_space<vmem>>, vector<1x1x32xf32>,
    %c0_148 = arith.constant 0 : index
    %c0_149 = arith.constant 0 : index
    %c0_150 = arith.constant 0 : index
    %251 = vector.load %arg12[%c0_148, %c0_149, %c0_150] : memref<3x32x32xf32, #tpu.memory_space<vmem>>, vector<1x32x32xf32>
    %252 = vector.shape_cast %251 : vector<1x32x32xf32> to vector<32x32xf32>
    %cst_151 = arith.constant dense<0.000000e+00> : vector<1x32xf32>
    %253 = tpu.matmul %230, %252, %cst_151 {dimension_numbers = #tpu.dot_dimension_numbers<[1], [0], [0], [1], [0, 0, 1, 1], [], []>} : vector<1x32xf32>, vector<32x32xf32>, vector<1x32xf32> -> vector<1x32xf32>
    %c0_152 = arith.constant 0 : index
    %c0_153 = arith.constant 0 : index
    %c0_154 = arith.constant 0 : index
    %254 = vector.load %arg13[%c0_152, %c0_153, %c0_154] : memref<3x1x32xf32, #tpu.memory_space<vmem>>, vector<1x1x32xf32>
    %255 = vector.shape_cast %254 : vector<1x1x32xf32> to vector<1x32xf32>
    %256 = arith.addf %253, %255 : vector<1x32xf32>
    %c1_155 = arith.constant 1 : index
    %c0_156 = arith.constant 0 : index
    %c0_157 = arith.constant 0 : index
    %257 = vector.load %arg12[%c1_155, %c0_156, %c0_157] : memref<3x32x32xf32, #tpu.memory_space<vmem>>, vector<1x32x32xf32>
    %258 = vector.shape_cast %257 : vector<1x32x32xf32> to vector<32x32xf32>
    %cst_158 = arith.constant dense<0.000000e+00> : vector<1x32xf32>
    %259 = tpu.matmul %230, %258, %cst_158 {dimension_numbers = #tpu.dot_dimension_numbers<[1], [0], [0], [1], [0, 0, 1, 1], [], []>} : vector<1x32xf32>, vector<32x32xf32>, vector<1x32xf32> -> vector<1x32xf32>
    %c1_159 = arith.constant 1 : index
    %c0_160 = arith.constant 0 : index
    %c0_161 = arith.constant 0 : index
    %260 = vector.load %arg13[%c1_159, %c0_160, %c0_161] : memref<3x1x32xf32, #tpu.memory_space<vmem>>, vector<1x1x32xf32>
    %261 = vector.shape_cast %260 : vector<1x1x32xf32> to vector<1x32xf32>
    %262 = arith.addf %259, %261 : vector<1x32xf32>
    %c2_162 = arith.constant 2 : index
    %c0_163 = arith.constant 0 : index
    %c0_164 = arith.constant 0 : index
    %263 = vector.load %arg12[%c2_162, %c0_163, %c0_164] : memref<3x32x32xf32, #tpu.memory_space<vmem>>, vector<1x32x32xf32>
    %264 = vector.shape_cast %263 : vector<1x32x32xf32> to vector<32x32xf32>
    %cst_165 = arith.constant dense<0.000000e+00> : vector<1x32xf32>
    %265 = tpu.matmul %230, %264, %cst_165 {dimension_numbers = #tpu.dot_dimension_numbers<[1], [0], [0], [1], [0, 0, 1, 1], [], []>} : vector<1x32xf32>, vector<32x32xf32>, vector<1x32xf32> -> vector<1x32xf32>
    %c2_166 = arith.constant 2 : index
    %c0_167 = arith.constant 0 : index
    %c0_168 = arith.constant 0 : index
    %266 = vector.load %arg13[%c2_166, %c0_167, %c0_168] : memref<3x1x32xf32, #tpu.memory_space<vmem>>, vector<1x1x32xf32>
    %267 = vector.shape_cast %266 : vector<1x1x32xf32> to vector<1x32xf32>
    %268 = arith.addf %265, %267 : vector<1x32xf32>
    %269 = vector.extract_strided_slice %42 {offsets = [0, 3, 0], sizes = [1, 1, 32], strides = [1, 1, 1]} : vector<1x8x32xf32> to vector<1x1x32xf32>
    %270 = vector.shape_cast %269 : vector<1x1x32xf32> to vector<1x32xf32>
    %271 = arith.addf %270, %256 : vector<1x32xf32>
    %272 = arith.negf %271 : vector<1x32xf32>
    %273 = math.exp %272 : vector<1x32xf32>
    %cst_169 = arith.constant 1.000000e+00 : f32
    %274 = vector.broadcast %cst_169 : f32 to vector<1x32xf32>
    %275 = arith.addf %274, %273 : vector<1x32xf32>
    %276 = arith.divf %274, %275 : vector<1x32xf32>
    %277 = vector.extract_strided_slice %50 {offsets = [0, 3, 0], sizes = [1, 1, 32], strides = [1, 1, 1]} : vector<1x8x32xf32> to vector<1x1x32xf32>
    %278 = vector.shape_cast %277 : vector<1x1x32xf32> to vector<1x32xf32>
    %279 = arith.addf %278, %262 : vector<1x32xf32>
    %280 = arith.negf %279 : vector<1x32xf32>
    %281 = math.exp %280 : vector<1x32xf32>
    %cst_170 = arith.constant 1.000000e+00 : f32
    %282 = vector.broadcast %cst_170 : f32 to vector<1x32xf32>
    %283 = arith.addf %282, %281 : vector<1x32xf32>
    %284 = arith.divf %282, %283 : vector<1x32xf32>
    %285 = vector.extract_strided_slice %58 {offsets = [0, 3, 0], sizes = [1, 1, 32], strides = [1, 1, 1]} : vector<1x8x32xf32> to vector<1x1x32xf32>
    %286 = vector.shape_cast %285 : vector<1x1x32xf32> to vector<1x32xf32>
    %287 = arith.mulf %276, %268 : vector<1x32xf32>
    %288 = arith.addf %286, %287 : vector<1x32xf32>
    %289 = math.tanh %288 : vector<1x32xf32>
    %cst_171 = arith.constant 1.000000e+00 : f32
    %290 = vector.broadcast %cst_171 : f32 to vector<1x32xf32>
    %291 = arith.subf %290, %284 : vector<1x32xf32>
    %292 = arith.mulf %291, %289 : vector<1x32xf32>
    %293 = arith.mulf %284, %230 : vector<1x32xf32>
    %294 = arith.addf %292, %293 : vector<1x32xf32>
    %295 = vector.shape_cast %294 : vector<1x32xf32> to vector<1x1x32xf32>
    "tpu.trace_start"() <{level = 10 : i32, message = "bqh,bsh->bqs"}> : () -> ()
    %cst_172 = arith.constant dense<0.000000e+00> : vector<1x1x8xf32>
    %296 = tpu.matmul %295, %24, %cst_172 {dimension_numbers = #tpu.dot_dimension_numbers<[2], [2], [1], [1], [0, 0, 0, 1, 1, 1], [0], [0]>} : vector<1x1x32xf32>, vector<1x8x32xf32>, vector<1x1x8xf32> -> vector<1x1x8xf32>
    "tpu.trace_stop"() : () -> ()
    %297 = vector.shape_cast %296 : vector<1x1x8xf32> to vector<1x8xf32>
    %cst_173 = arith.constant dense<0xFF800000> : vector<1xf32>
    %298 = vector.multi_reduction <maximumf>, %297, %cst_173 [1] : vector<1x8xf32> to vector<1xf32>
    %299 = vector.shape_cast %298 : vector<1xf32> to vector<1x1xf32>
    %300 = vector.broadcast %299 : vector<1x1xf32> to vector<1x8xf32>
    %301 = arith.subf %297, %300 : vector<1x8xf32>
    %302 = math.exp %301 : vector<1x8xf32>
    %cst_174 = arith.constant dense<0.000000e+00> : vector<1xf32>
    %303 = vector.multi_reduction <add>, %302, %cst_174 [1] : vector<1x8xf32> to vector<1xf32>
    %304 = vector.shape_cast %303 : vector<1xf32> to vector<1x1xf32>
    %305 = tpu.reciprocal %304 {approx = true} : vector<1x1xf32> -> vector<1x1xf32>
    %306 = vector.broadcast %305 : vector<1x1xf32> to vector<1x8xf32>
    %307 = arith.mulf %302, %306 : vector<1x8xf32>
    %308 = vector.shape_cast %307 : vector<1x8xf32> to vector<1x1x8xf32>
    "tpu.trace_start"() <{level = 10 : i32, message = "bqs,bsh->bqh"}> : () -> ()
    %cst_175 = arith.constant dense<0.000000e+00> : vector<1x1x32xf32>
    %309 = tpu.matmul %308, %24, %cst_175 {dimension_numbers = #tpu.dot_dimension_numbers<[2], [1], [1], [2], [0, 0, 0, 1, 1, 2], [0], [0]>} : vector<1x1x8xf32>, vector<1x8x32xf32>, vector<1x1x32xf32> -> vector<1x1x32xf32>
    "tpu.trace_stop"() : () -> ()
    %310 = vector.shape_cast %309 : vector<1x1x32xf32> to vector<1x32xf32>
    %311 = vector.shape_cast %294 : vector<1x32xf32> to vector<1x1x32xf32>
    %c0_176 = arith.constant 0 : index
    %c3 = arith.constant 3 : index
    %c0_177 = arith.constant 0 : index
    %312 = vector.load %arg18[%c0_176, %c3, %c0_177] : memref<1x8x32xf32, #tpu.memory_space<vmem>>, vector<1x1x32xf32>
    tpu.vector_store %arg18[%c0_176, %c3, %c0_177], %311 {strides = array<i32>} : memref<1x8x32xf32, #tpu.memory_space<vmem>>, vector<1x1x32xf32>,
    %313 = vector.shape_cast %310 : vector<1x32xf32> to vector<1x1x32xf32>
    %c0_178 = arith.constant 0 : index
    %c3_179 = arith.constant 3 : index
    %c0_180 = arith.constant 0 : index
    %314 = vector.load %arg19[%c0_178, %c3_179, %c0_180] : memref<1x8x32xf32, #tpu.memory_space<vmem>>, vector<1x1x32xf32>
    tpu.vector_store %arg19[%c0_178, %c3_179, %c0_180], %313 {strides = array<i32>} : memref<1x8x32xf32, #tpu.memory_space<vmem>>, vector<1x1x32xf32>,
    %c0_181 = arith.constant 0 : index
    %c0_182 = arith.constant 0 : index
    %c0_183 = arith.constant 0 : index
    %315 = vector.load %arg12[%c0_181, %c0_182, %c0_183] : memref<3x32x32xf32, #tpu.memory_space<vmem>>, vector<1x32x32xf32>
    %316 = vector.shape_cast %315 : vector<1x32x32xf32> to vector<32x32xf32>
    %cst_184 = arith.constant dense<0.000000e+00> : vector<1x32xf32>
    %317 = tpu.matmul %294, %316, %cst_184 {dimension_numbers = #tpu.dot_dimension_numbers<[1], [0], [0], [1], [0, 0, 1, 1], [], []>} : vector<1x32xf32>, vector<32x32xf32>, vector<1x32xf32> -> vector<1x32xf32>
    %c0_185 = arith.constant 0 : index
    %c0_186 = arith.constant 0 : index
    %c0_187 = arith.constant 0 : index
    %318 = vector.load %arg13[%c0_185, %c0_186, %c0_187] : memref<3x1x32xf32, #tpu.memory_space<vmem>>, vector<1x1x32xf32>
    %319 = vector.shape_cast %318 : vector<1x1x32xf32> to vector<1x32xf32>
    %320 = arith.addf %317, %319 : vector<1x32xf32>
    %c1_188 = arith.constant 1 : index
    %c0_189 = arith.constant 0 : index
    %c0_190 = arith.constant 0 : index
    %321 = vector.load %arg12[%c1_188, %c0_189, %c0_190] : memref<3x32x32xf32, #tpu.memory_space<vmem>>, vector<1x32x32xf32>
    %322 = vector.shape_cast %321 : vector<1x32x32xf32> to vector<32x32xf32>
    %cst_191 = arith.constant dense<0.000000e+00> : vector<1x32xf32>
    %323 = tpu.matmul %294, %322, %cst_191 {dimension_numbers = #tpu.dot_dimension_numbers<[1], [0], [0], [1], [0, 0, 1, 1], [], []>} : vector<1x32xf32>, vector<32x32xf32>, vector<1x32xf32> -> vector<1x32xf32>
    %c1_192 = arith.constant 1 : index
    %c0_193 = arith.constant 0 : index
    %c0_194 = arith.constant 0 : index
    %324 = vector.load %arg13[%c1_192, %c0_193, %c0_194] : memref<3x1x32xf32, #tpu.memory_space<vmem>>, vector<1x1x32xf32>
    %325 = vector.shape_cast %324 : vector<1x1x32xf32> to vector<1x32xf32>
    %326 = arith.addf %323, %325 : vector<1x32xf32>
    %c2_195 = arith.constant 2 : index
    %c0_196 = arith.constant 0 : index
    %c0_197 = arith.constant 0 : index
    %327 = vector.load %arg12[%c2_195, %c0_196, %c0_197] : memref<3x32x32xf32, #tpu.memory_space<vmem>>, vector<1x32x32xf32>
    %328 = vector.shape_cast %327 : vector<1x32x32xf32> to vector<32x32xf32>
    %cst_198 = arith.constant dense<0.000000e+00> : vector<1x32xf32>
    %329 = tpu.matmul %294, %328, %cst_198 {dimension_numbers = #tpu.dot_dimension_numbers<[1], [0], [0], [1], [0, 0, 1, 1], [], []>} : vector<1x32xf32>, vector<32x32xf32>, vector<1x32xf32> -> vector<1x32xf32>
    %c2_199 = arith.constant 2 : index
    %c0_200 = arith.constant 0 : index
    %c0_201 = arith.constant 0 : index
    %330 = vector.load %arg13[%c2_199, %c0_200, %c0_201] : memref<3x1x32xf32, #tpu.memory_space<vmem>>, vector<1x1x32xf32>
    %331 = vector.shape_cast %330 : vector<1x1x32xf32> to vector<1x32xf32>
    %332 = arith.addf %329, %331 : vector<1x32xf32>
    %333 = vector.extract_strided_slice %42 {offsets = [0, 4, 0], sizes = [1, 1, 32], strides = [1, 1, 1]} : vector<1x8x32xf32> to vector<1x1x32xf32>
    %334 = vector.shape_cast %333 : vector<1x1x32xf32> to vector<1x32xf32>
    %335 = arith.addf %334, %320 : vector<1x32xf32>
    %336 = arith.negf %335 : vector<1x32xf32>
    %337 = math.exp %336 : vector<1x32xf32>
    %cst_202 = arith.constant 1.000000e+00 : f32
    %338 = vector.broadcast %cst_202 : f32 to vector<1x32xf32>
    %339 = arith.addf %338, %337 : vector<1x32xf32>
    %340 = arith.divf %338, %339 : vector<1x32xf32>
    %341 = vector.extract_strided_slice %50 {offsets = [0, 4, 0], sizes = [1, 1, 32], strides = [1, 1, 1]} : vector<1x8x32xf32> to vector<1x1x32xf32>
    %342 = vector.shape_cast %341 : vector<1x1x32xf32> to vector<1x32xf32>
    %343 = arith.addf %342, %326 : vector<1x32xf32>
    %344 = arith.negf %343 : vector<1x32xf32>
    %345 = math.exp %344 : vector<1x32xf32>
    %cst_203 = arith.constant 1.000000e+00 : f32
    %346 = vector.broadcast %cst_203 : f32 to vector<1x32xf32>
    %347 = arith.addf %346, %345 : vector<1x32xf32>
    %348 = arith.divf %346, %347 : vector<1x32xf32>
    %349 = vector.extract_strided_slice %58 {offsets = [0, 4, 0], sizes = [1, 1, 32], strides = [1, 1, 1]} : vector<1x8x32xf32> to vector<1x1x32xf32>
    %350 = vector.shape_cast %349 : vector<1x1x32xf32> to vector<1x32xf32>
    %351 = arith.mulf %340, %332 : vector<1x32xf32>
    %352 = arith.addf %350, %351 : vector<1x32xf32>
    %353 = math.tanh %352 : vector<1x32xf32>
    %cst_204 = arith.constant 1.000000e+00 : f32
    %354 = vector.broadcast %cst_204 : f32 to vector<1x32xf32>
    %355 = arith.subf %354, %348 : vector<1x32xf32>
    %356 = arith.mulf %355, %353 : vector<1x32xf32>
    %357 = arith.mulf %348, %294 : vector<1x32xf32>
    %358 = arith.addf %356, %357 : vector<1x32xf32>
    %359 = vector.shape_cast %358 : vector<1x32xf32> to vector<1x1x32xf32>
    "tpu.trace_start"() <{level = 10 : i32, message = "bqh,bsh->bqs"}> : () -> ()
    %cst_205 = arith.constant dense<0.000000e+00> : vector<1x1x8xf32>
    %360 = tpu.matmul %359, %24, %cst_205 {dimension_numbers = #tpu.dot_dimension_numbers<[2], [2], [1], [1], [0, 0, 0, 1, 1, 1], [0], [0]>} : vector<1x1x32xf32>, vector<1x8x32xf32>, vector<1x1x8xf32> -> vector<1x1x8xf32>
    "tpu.trace_stop"() : () -> ()
    %361 = vector.shape_cast %360 : vector<1x1x8xf32> to vector<1x8xf32>
    %cst_206 = arith.constant dense<0xFF800000> : vector<1xf32>
    %362 = vector.multi_reduction <maximumf>, %361, %cst_206 [1] : vector<1x8xf32> to vector<1xf32>
    %363 = vector.shape_cast %362 : vector<1xf32> to vector<1x1xf32>
    %364 = vector.broadcast %363 : vector<1x1xf32> to vector<1x8xf32>
    %365 = arith.subf %361, %364 : vector<1x8xf32>
    %366 = math.exp %365 : vector<1x8xf32>
    %cst_207 = arith.constant dense<0.000000e+00> : vector<1xf32>
    %367 = vector.multi_reduction <add>, %366, %cst_207 [1] : vector<1x8xf32> to vector<1xf32>
    %368 = vector.shape_cast %367 : vector<1xf32> to vector<1x1xf32>
    %369 = tpu.reciprocal %368 {approx = true} : vector<1x1xf32> -> vector<1x1xf32>
    %370 = vector.broadcast %369 : vector<1x1xf32> to vector<1x8xf32>
    %371 = arith.mulf %366, %370 : vector<1x8xf32>
    %372 = vector.shape_cast %371 : vector<1x8xf32> to vector<1x1x8xf32>
    "tpu.trace_start"() <{level = 10 : i32, message = "bqs,bsh->bqh"}> : () -> ()
    %cst_208 = arith.constant dense<0.000000e+00> : vector<1x1x32xf32>
    %373 = tpu.matmul %372, %24, %cst_208 {dimension_numbers = #tpu.dot_dimension_numbers<[2], [1], [1], [2], [0, 0, 0, 1, 1, 2], [0], [0]>} : vector<1x1x8xf32>, vector<1x8x32xf32>, vector<1x1x32xf32> -> vector<1x1x32xf32>
    "tpu.trace_stop"() : () -> ()
    %374 = vector.shape_cast %373 : vector<1x1x32xf32> to vector<1x32xf32>
    %375 = vector.shape_cast %358 : vector<1x32xf32> to vector<1x1x32xf32>
    %c0_209 = arith.constant 0 : index
    %c4 = arith.constant 4 : index
    %c0_210 = arith.constant 0 : index
    %376 = vector.load %arg18[%c0_209, %c4, %c0_210] : memref<1x8x32xf32, #tpu.memory_space<vmem>>, vector<1x1x32xf32>
    tpu.vector_store %arg18[%c0_209, %c4, %c0_210], %375 {strides = array<i32>} : memref<1x8x32xf32, #tpu.memory_space<vmem>>, vector<1x1x32xf32>,
    %377 = vector.shape_cast %374 : vector<1x32xf32> to vector<1x1x32xf32>
    %c0_211 = arith.constant 0 : index
    %c4_212 = arith.constant 4 : index
    %c0_213 = arith.constant 0 : index
    %378 = vector.load %arg19[%c0_211, %c4_212, %c0_213] : memref<1x8x32xf32, #tpu.memory_space<vmem>>, vector<1x1x32xf32>
    tpu.vector_store %arg19[%c0_211, %c4_212, %c0_213], %377 {strides = array<i32>} : memref<1x8x32xf32, #tpu.memory_space<vmem>>, vector<1x1x32xf32>,
    %c0_214 = arith.constant 0 : index
    %c0_215 = arith.constant 0 : index
    %c0_216 = arith.constant 0 : index
    %379 = vector.load %arg12[%c0_214, %c0_215, %c0_216] : memref<3x32x32xf32, #tpu.memory_space<vmem>>, vector<1x32x32xf32>
    %380 = vector.shape_cast %379 : vector<1x32x32xf32> to vector<32x32xf32>
    %cst_217 = arith.constant dense<0.000000e+00> : vector<1x32xf32>
    %381 = tpu.matmul %358, %380, %cst_217 {dimension_numbers = #tpu.dot_dimension_numbers<[1], [0], [0], [1], [0, 0, 1, 1], [], []>} : vector<1x32xf32>, vector<32x32xf32>, vector<1x32xf32> -> vector<1x32xf32>
    %c0_218 = arith.constant 0 : index
    %c0_219 = arith.constant 0 : index
    %c0_220 = arith.constant 0 : index
    %382 = vector.load %arg13[%c0_218, %c0_219, %c0_220] : memref<3x1x32xf32, #tpu.memory_space<vmem>>, vector<1x1x32xf32>
    %383 = vector.shape_cast %382 : vector<1x1x32xf32> to vector<1x32xf32>
    %384 = arith.addf %381, %383 : vector<1x32xf32>
    %c1_221 = arith.constant 1 : index
    %c0_222 = arith.constant 0 : index
    %c0_223 = arith.constant 0 : index
    %385 = vector.load %arg12[%c1_221, %c0_222, %c0_223] : memref<3x32x32xf32, #tpu.memory_space<vmem>>, vector<1x32x32xf32>
    %386 = vector.shape_cast %385 : vector<1x32x32xf32> to vector<32x32xf32>
    %cst_224 = arith.constant dense<0.000000e+00> : vector<1x32xf32>
    %387 = tpu.matmul %358, %386, %cst_224 {dimension_numbers = #tpu.dot_dimension_numbers<[1], [0], [0], [1], [0, 0, 1, 1], [], []>} : vector<1x32xf32>, vector<32x32xf32>, vector<1x32xf32> -> vector<1x32xf32>
    %c1_225 = arith.constant 1 : index
    %c0_226 = arith.constant 0 : index
    %c0_227 = arith.constant 0 : index
    %388 = vector.load %arg13[%c1_225, %c0_226, %c0_227] : memref<3x1x32xf32, #tpu.memory_space<vmem>>, vector<1x1x32xf32>
    %389 = vector.shape_cast %388 : vector<1x1x32xf32> to vector<1x32xf32>
    %390 = arith.addf %387, %389 : vector<1x32xf32>
    %c2_228 = arith.constant 2 : index
    %c0_229 = arith.constant 0 : index
    %c0_230 = arith.constant 0 : index
    %391 = vector.load %arg12[%c2_228, %c0_229, %c0_230] : memref<3x32x32xf32, #tpu.memory_space<vmem>>, vector<1x32x32xf32>
    %392 = vector.shape_cast %391 : vector<1x32x32xf32> to vector<32x32xf32>
    %cst_231 = arith.constant dense<0.000000e+00> : vector<1x32xf32>
    %393 = tpu.matmul %358, %392, %cst_231 {dimension_numbers = #tpu.dot_dimension_numbers<[1], [0], [0], [1], [0, 0, 1, 1], [], []>} : vector<1x32xf32>, vector<32x32xf32>, vector<1x32xf32> -> vector<1x32xf32>
    %c2_232 = arith.constant 2 : index
    %c0_233 = arith.constant 0 : index
    %c0_234 = arith.constant 0 : index
    %394 = vector.load %arg13[%c2_232, %c0_233, %c0_234] : memref<3x1x32xf32, #tpu.memory_space<vmem>>, vector<1x1x32xf32>
    %395 = vector.shape_cast %394 : vector<1x1x32xf32> to vector<1x32xf32>
    %396 = arith.addf %393, %395 : vector<1x32xf32>
    %397 = vector.extract_strided_slice %42 {offsets = [0, 5, 0], sizes = [1, 1, 32], strides = [1, 1, 1]} : vector<1x8x32xf32> to vector<1x1x32xf32>
    %398 = vector.shape_cast %397 : vector<1x1x32xf32> to vector<1x32xf32>
    %399 = arith.addf %398, %384 : vector<1x32xf32>
    %400 = arith.negf %399 : vector<1x32xf32>
    %401 = math.exp %400 : vector<1x32xf32>
    %cst_235 = arith.constant 1.000000e+00 : f32
    %402 = vector.broadcast %cst_235 : f32 to vector<1x32xf32>
    %403 = arith.addf %402, %401 : vector<1x32xf32>
    %404 = arith.divf %402, %403 : vector<1x32xf32>
    %405 = vector.extract_strided_slice %50 {offsets = [0, 5, 0], sizes = [1, 1, 32], strides = [1, 1, 1]} : vector<1x8x32xf32> to vector<1x1x32xf32>
    %406 = vector.shape_cast %405 : vector<1x1x32xf32> to vector<1x32xf32>
    %407 = arith.addf %406, %390 : vector<1x32xf32>
    %408 = arith.negf %407 : vector<1x32xf32>
    %409 = math.exp %408 : vector<1x32xf32>
    %cst_236 = arith.constant 1.000000e+00 : f32
    %410 = vector.broadcast %cst_236 : f32 to vector<1x32xf32>
    %411 = arith.addf %410, %409 : vector<1x32xf32>
    %412 = arith.divf %410, %411 : vector<1x32xf32>
    %413 = vector.extract_strided_slice %58 {offsets = [0, 5, 0], sizes = [1, 1, 32], strides = [1, 1, 1]} : vector<1x8x32xf32> to vector<1x1x32xf32>
    %414 = vector.shape_cast %413 : vector<1x1x32xf32> to vector<1x32xf32>
    %415 = arith.mulf %404, %396 : vector<1x32xf32>
    %416 = arith.addf %414, %415 : vector<1x32xf32>
    %417 = math.tanh %416 : vector<1x32xf32>
    %cst_237 = arith.constant 1.000000e+00 : f32
    %418 = vector.broadcast %cst_237 : f32 to vector<1x32xf32>
    %419 = arith.subf %418, %412 : vector<1x32xf32>
    %420 = arith.mulf %419, %417 : vector<1x32xf32>
    %421 = arith.mulf %412, %358 : vector<1x32xf32>
    %422 = arith.addf %420, %421 : vector<1x32xf32>
    %423 = vector.shape_cast %422 : vector<1x32xf32> to vector<1x1x32xf32>
    "tpu.trace_start"() <{level = 10 : i32, message = "bqh,bsh->bqs"}> : () -> ()
    %cst_238 = arith.constant dense<0.000000e+00> : vector<1x1x8xf32>
    %424 = tpu.matmul %423, %24, %cst_238 {dimension_numbers = #tpu.dot_dimension_numbers<[2], [2], [1], [1], [0, 0, 0, 1, 1, 1], [0], [0]>} : vector<1x1x32xf32>, vector<1x8x32xf32>, vector<1x1x8xf32> -> vector<1x1x8xf32>
    "tpu.trace_stop"() : () -> ()
    %425 = vector.shape_cast %424 : vector<1x1x8xf32> to vector<1x8xf32>
    %cst_239 = arith.constant dense<0xFF800000> : vector<1xf32>
    %426 = vector.multi_reduction <maximumf>, %425, %cst_239 [1] : vector<1x8xf32> to vector<1xf32>
    %427 = vector.shape_cast %426 : vector<1xf32> to vector<1x1xf32>
    %428 = vector.broadcast %427 : vector<1x1xf32> to vector<1x8xf32>
    %429 = arith.subf %425, %428 : vector<1x8xf32>
    %430 = math.exp %429 : vector<1x8xf32>
    %cst_240 = arith.constant dense<0.000000e+00> : vector<1xf32>
    %431 = vector.multi_reduction <add>, %430, %cst_240 [1] : vector<1x8xf32> to vector<1xf32>
    %432 = vector.shape_cast %431 : vector<1xf32> to vector<1x1xf32>
    %433 = tpu.reciprocal %432 {approx = true} : vector<1x1xf32> -> vector<1x1xf32>
    %434 = vector.broadcast %433 : vector<1x1xf32> to vector<1x8xf32>
    %435 = arith.mulf %430, %434 : vector<1x8xf32>
    %436 = vector.shape_cast %435 : vector<1x8xf32> to vector<1x1x8xf32>
    "tpu.trace_start"() <{level = 10 : i32, message = "bqs,bsh->bqh"}> : () -> ()
    %cst_241 = arith.constant dense<0.000000e+00> : vector<1x1x32xf32>
    %437 = tpu.matmul %436, %24, %cst_241 {dimension_numbers = #tpu.dot_dimension_numbers<[2], [1], [1], [2], [0, 0, 0, 1, 1, 2], [0], [0]>} : vector<1x1x8xf32>, vector<1x8x32xf32>, vector<1x1x32xf32> -> vector<1x1x32xf32>
    "tpu.trace_stop"() : () -> ()
    %438 = vector.shape_cast %437 : vector<1x1x32xf32> to vector<1x32xf32>
    %439 = vector.shape_cast %422 : vector<1x32xf32> to vector<1x1x32xf32>
    %c0_242 = arith.constant 0 : index
    %c5 = arith.constant 5 : index
    %c0_243 = arith.constant 0 : index
    %440 = vector.load %arg18[%c0_242, %c5, %c0_243] : memref<1x8x32xf32, #tpu.memory_space<vmem>>, vector<1x1x32xf32>
    tpu.vector_store %arg18[%c0_242, %c5, %c0_243], %439 {strides = array<i32>} : memref<1x8x32xf32, #tpu.memory_space<vmem>>, vector<1x1x32xf32>,
    %441 = vector.shape_cast %438 : vector<1x32xf32> to vector<1x1x32xf32>
    %c0_244 = arith.constant 0 : index
    %c5_245 = arith.constant 5 : index
    %c0_246 = arith.constant 0 : index
    %442 = vector.load %arg19[%c0_244, %c5_245, %c0_246] : memref<1x8x32xf32, #tpu.memory_space<vmem>>, vector<1x1x32xf32>
    tpu.vector_store %arg19[%c0_244, %c5_245, %c0_246], %441 {strides = array<i32>} : memref<1x8x32xf32, #tpu.memory_space<vmem>>, vector<1x1x32xf32>,
    %c0_247 = arith.constant 0 : index
    %c0_248 = arith.constant 0 : index
    %c0_249 = arith.constant 0 : index
    %443 = vector.load %arg12[%c0_247, %c0_248, %c0_249] : memref<3x32x32xf32, #tpu.memory_space<vmem>>, vector<1x32x32xf32>
    %444 = vector.shape_cast %443 : vector<1x32x32xf32> to vector<32x32xf32>
    %cst_250 = arith.constant dense<0.000000e+00> : vector<1x32xf32>
    %445 = tpu.matmul %422, %444, %cst_250 {dimension_numbers = #tpu.dot_dimension_numbers<[1], [0], [0], [1], [0, 0, 1, 1], [], []>} : vector<1x32xf32>, vector<32x32xf32>, vector<1x32xf32> -> vector<1x32xf32>
    %c0_251 = arith.constant 0 : index
    %c0_252 = arith.constant 0 : index
    %c0_253 = arith.constant 0 : index
    %446 = vector.load %arg13[%c0_251, %c0_252, %c0_253] : memref<3x1x32xf32, #tpu.memory_space<vmem>>, vector<1x1x32xf32>
    %447 = vector.shape_cast %446 : vector<1x1x32xf32> to vector<1x32xf32>
    %448 = arith.addf %445, %447 : vector<1x32xf32>
    %c1_254 = arith.constant 1 : index
    %c0_255 = arith.constant 0 : index
    %c0_256 = arith.constant 0 : index
    %449 = vector.load %arg12[%c1_254, %c0_255, %c0_256] : memref<3x32x32xf32, #tpu.memory_space<vmem>>, vector<1x32x32xf32>
    %450 = vector.shape_cast %449 : vector<1x32x32xf32> to vector<32x32xf32>
    %cst_257 = arith.constant dense<0.000000e+00> : vector<1x32xf32>
    %451 = tpu.matmul %422, %450, %cst_257 {dimension_numbers = #tpu.dot_dimension_numbers<[1], [0], [0], [1], [0, 0, 1, 1], [], []>} : vector<1x32xf32>, vector<32x32xf32>, vector<1x32xf32> -> vector<1x32xf32>
    %c1_258 = arith.constant 1 : index
    %c0_259 = arith.constant 0 : index
    %c0_260 = arith.constant 0 : index
    %452 = vector.load %arg13[%c1_258, %c0_259, %c0_260] : memref<3x1x32xf32, #tpu.memory_space<vmem>>, vector<1x1x32xf32>
    %453 = vector.shape_cast %452 : vector<1x1x32xf32> to vector<1x32xf32>
    %454 = arith.addf %451, %453 : vector<1x32xf32>
    %c2_261 = arith.constant 2 : index
    %c0_262 = arith.constant 0 : index
    %c0_263 = arith.constant 0 : index
    %455 = vector.load %arg12[%c2_261, %c0_262, %c0_263] : memref<3x32x32xf32, #tpu.memory_space<vmem>>, vector<1x32x32xf32>
    %456 = vector.shape_cast %455 : vector<1x32x32xf32> to vector<32x32xf32>
    %cst_264 = arith.constant dense<0.000000e+00> : vector<1x32xf32>
    %457 = tpu.matmul %422, %456, %cst_264 {dimension_numbers = #tpu.dot_dimension_numbers<[1], [0], [0], [1], [0, 0, 1, 1], [], []>} : vector<1x32xf32>, vector<32x32xf32>, vector<1x32xf32> -> vector<1x32xf32>
    %c2_265 = arith.constant 2 : index
    %c0_266 = arith.constant 0 : index
    %c0_267 = arith.constant 0 : index
    %458 = vector.load %arg13[%c2_265, %c0_266, %c0_267] : memref<3x1x32xf32, #tpu.memory_space<vmem>>, vector<1x1x32xf32>
    %459 = vector.shape_cast %458 : vector<1x1x32xf32> to vector<1x32xf32>
    %460 = arith.addf %457, %459 : vector<1x32xf32>
    %461 = vector.extract_strided_slice %42 {offsets = [0, 6, 0], sizes = [1, 1, 32], strides = [1, 1, 1]} : vector<1x8x32xf32> to vector<1x1x32xf32>
    %462 = vector.shape_cast %461 : vector<1x1x32xf32> to vector<1x32xf32>
    %463 = arith.addf %462, %448 : vector<1x32xf32>
    %464 = arith.negf %463 : vector<1x32xf32>
    %465 = math.exp %464 : vector<1x32xf32>
    %cst_268 = arith.constant 1.000000e+00 : f32
    %466 = vector.broadcast %cst_268 : f32 to vector<1x32xf32>
    %467 = arith.addf %466, %465 : vector<1x32xf32>
    %468 = arith.divf %466, %467 : vector<1x32xf32>
    %469 = vector.extract_strided_slice %50 {offsets = [0, 6, 0], sizes = [1, 1, 32], strides = [1, 1, 1]} : vector<1x8x32xf32> to vector<1x1x32xf32>
    %470 = vector.shape_cast %469 : vector<1x1x32xf32> to vector<1x32xf32>
    %471 = arith.addf %470, %454 : vector<1x32xf32>
    %472 = arith.negf %471 : vector<1x32xf32>
    %473 = math.exp %472 : vector<1x32xf32>
    %cst_269 = arith.constant 1.000000e+00 : f32
    %474 = vector.broadcast %cst_269 : f32 to vector<1x32xf32>
    %475 = arith.addf %474, %473 : vector<1x32xf32>
    %476 = arith.divf %474, %475 : vector<1x32xf32>
    %477 = vector.extract_strided_slice %58 {offsets = [0, 6, 0], sizes = [1, 1, 32], strides = [1, 1, 1]} : vector<1x8x32xf32> to vector<1x1x32xf32>
    %478 = vector.shape_cast %477 : vector<1x1x32xf32> to vector<1x32xf32>
    %479 = arith.mulf %468, %460 : vector<1x32xf32>
    %480 = arith.addf %478, %479 : vector<1x32xf32>
    %481 = math.tanh %480 : vector<1x32xf32>
    %cst_270 = arith.constant 1.000000e+00 : f32
    %482 = vector.broadcast %cst_270 : f32 to vector<1x32xf32>
    %483 = arith.subf %482, %476 : vector<1x32xf32>
    %484 = arith.mulf %483, %481 : vector<1x32xf32>
    %485 = arith.mulf %476, %422 : vector<1x32xf32>
    %486 = arith.addf %484, %485 : vector<1x32xf32>
    %487 = vector.shape_cast %486 : vector<1x32xf32> to vector<1x1x32xf32>
    "tpu.trace_start"() <{level = 10 : i32, message = "bqh,bsh->bqs"}> : () -> ()
    %cst_271 = arith.constant dense<0.000000e+00> : vector<1x1x8xf32>
    %488 = tpu.matmul %487, %24, %cst_271 {dimension_numbers = #tpu.dot_dimension_numbers<[2], [2], [1], [1], [0, 0, 0, 1, 1, 1], [0], [0]>} : vector<1x1x32xf32>, vector<1x8x32xf32>, vector<1x1x8xf32> -> vector<1x1x8xf32>
    "tpu.trace_stop"() : () -> ()
    %489 = vector.shape_cast %488 : vector<1x1x8xf32> to vector<1x8xf32>
    %cst_272 = arith.constant dense<0xFF800000> : vector<1xf32>
    %490 = vector.multi_reduction <maximumf>, %489, %cst_272 [1] : vector<1x8xf32> to vector<1xf32>
    %491 = vector.shape_cast %490 : vector<1xf32> to vector<1x1xf32>
    %492 = vector.broadcast %491 : vector<1x1xf32> to vector<1x8xf32>
    %493 = arith.subf %489, %492 : vector<1x8xf32>
    %494 = math.exp %493 : vector<1x8xf32>
    %cst_273 = arith.constant dense<0.000000e+00> : vector<1xf32>
    %495 = vector.multi_reduction <add>, %494, %cst_273 [1] : vector<1x8xf32> to vector<1xf32>
    %496 = vector.shape_cast %495 : vector<1xf32> to vector<1x1xf32>
    %497 = tpu.reciprocal %496 {approx = true} : vector<1x1xf32> -> vector<1x1xf32>
    %498 = vector.broadcast %497 : vector<1x1xf32> to vector<1x8xf32>
    %499 = arith.mulf %494, %498 : vector<1x8xf32>
    %500 = vector.shape_cast %499 : vector<1x8xf32> to vector<1x1x8xf32>
    "tpu.trace_start"() <{level = 10 : i32, message = "bqs,bsh->bqh"}> : () -> ()
    %cst_274 = arith.constant dense<0.000000e+00> : vector<1x1x32xf32>
    %501 = tpu.matmul %500, %24, %cst_274 {dimension_numbers = #tpu.dot_dimension_numbers<[2], [1], [1], [2], [0, 0, 0, 1, 1, 2], [0], [0]>} : vector<1x1x8xf32>, vector<1x8x32xf32>, vector<1x1x32xf32> -> vector<1x1x32xf32>
    "tpu.trace_stop"() : () -> ()
    %502 = vector.shape_cast %501 : vector<1x1x32xf32> to vector<1x32xf32>
    %503 = vector.shape_cast %486 : vector<1x32xf32> to vector<1x1x32xf32>
    %c0_275 = arith.constant 0 : index
    %c6 = arith.constant 6 : index
    %c0_276 = arith.constant 0 : index
    %504 = vector.load %arg18[%c0_275, %c6, %c0_276] : memref<1x8x32xf32, #tpu.memory_space<vmem>>, vector<1x1x32xf32>
    tpu.vector_store %arg18[%c0_275, %c6, %c0_276], %503 {strides = array<i32>} : memref<1x8x32xf32, #tpu.memory_space<vmem>>, vector<1x1x32xf32>,
    %505 = vector.shape_cast %502 : vector<1x32xf32> to vector<1x1x32xf32>
    %c0_277 = arith.constant 0 : index
    %c6_278 = arith.constant 6 : index
    %c0_279 = arith.constant 0 : index
    %506 = vector.load %arg19[%c0_277, %c6_278, %c0_279] : memref<1x8x32xf32, #tpu.memory_space<vmem>>, vector<1x1x32xf32>
    tpu.vector_store %arg19[%c0_277, %c6_278, %c0_279], %505 {strides = array<i32>} : memref<1x8x32xf32, #tpu.memory_space<vmem>>, vector<1x1x32xf32>,
    %c0_280 = arith.constant 0 : index
    %c0_281 = arith.constant 0 : index
    %c0_282 = arith.constant 0 : index
    %507 = vector.load %arg12[%c0_280, %c0_281, %c0_282] : memref<3x32x32xf32, #tpu.memory_space<vmem>>, vector<1x32x32xf32>
    %508 = vector.shape_cast %507 : vector<1x32x32xf32> to vector<32x32xf32>
    %cst_283 = arith.constant dense<0.000000e+00> : vector<1x32xf32>
    %509 = tpu.matmul %486, %508, %cst_283 {dimension_numbers = #tpu.dot_dimension_numbers<[1], [0], [0], [1], [0, 0, 1, 1], [], []>} : vector<1x32xf32>, vector<32x32xf32>, vector<1x32xf32> -> vector<1x32xf32>
    %c0_284 = arith.constant 0 : index
    %c0_285 = arith.constant 0 : index
    %c0_286 = arith.constant 0 : index
    %510 = vector.load %arg13[%c0_284, %c0_285, %c0_286] : memref<3x1x32xf32, #tpu.memory_space<vmem>>, vector<1x1x32xf32>
    %511 = vector.shape_cast %510 : vector<1x1x32xf32> to vector<1x32xf32>
    %512 = arith.addf %509, %511 : vector<1x32xf32>
    %c1_287 = arith.constant 1 : index
    %c0_288 = arith.constant 0 : index
    %c0_289 = arith.constant 0 : index
    %513 = vector.load %arg12[%c1_287, %c0_288, %c0_289] : memref<3x32x32xf32, #tpu.memory_space<vmem>>, vector<1x32x32xf32>
    %514 = vector.shape_cast %513 : vector<1x32x32xf32> to vector<32x32xf32>
    %cst_290 = arith.constant dense<0.000000e+00> : vector<1x32xf32>
    %515 = tpu.matmul %486, %514, %cst_290 {dimension_numbers = #tpu.dot_dimension_numbers<[1], [0], [0], [1], [0, 0, 1, 1], [], []>} : vector<1x32xf32>, vector<32x32xf32>, vector<1x32xf32> -> vector<1x32xf32>
    %c1_291 = arith.constant 1 : index
    %c0_292 = arith.constant 0 : index
    %c0_293 = arith.constant 0 : index
    %516 = vector.load %arg13[%c1_291, %c0_292, %c0_293] : memref<3x1x32xf32, #tpu.memory_space<vmem>>, vector<1x1x32xf32>
    %517 = vector.shape_cast %516 : vector<1x1x32xf32> to vector<1x32xf32>
    %518 = arith.addf %515, %517 : vector<1x32xf32>
    %c2_294 = arith.constant 2 : index
    %c0_295 = arith.constant 0 : index
    %c0_296 = arith.constant 0 : index
    %519 = vector.load %arg12[%c2_294, %c0_295, %c0_296] : memref<3x32x32xf32, #tpu.memory_space<vmem>>, vector<1x32x32xf32>
    %520 = vector.shape_cast %519 : vector<1x32x32xf32> to vector<32x32xf32>
    %cst_297 = arith.constant dense<0.000000e+00> : vector<1x32xf32>
    %521 = tpu.matmul %486, %520, %cst_297 {dimension_numbers = #tpu.dot_dimension_numbers<[1], [0], [0], [1], [0, 0, 1, 1], [], []>} : vector<1x32xf32>, vector<32x32xf32>, vector<1x32xf32> -> vector<1x32xf32>
    %c2_298 = arith.constant 2 : index
    %c0_299 = arith.constant 0 : index
    %c0_300 = arith.constant 0 : index
    %522 = vector.load %arg13[%c2_298, %c0_299, %c0_300] : memref<3x1x32xf32, #tpu.memory_space<vmem>>, vector<1x1x32xf32>
    %523 = vector.shape_cast %522 : vector<1x1x32xf32> to vector<1x32xf32>
    %524 = arith.addf %521, %523 : vector<1x32xf32>
    %525 = vector.extract_strided_slice %42 {offsets = [0, 7, 0], sizes = [1, 1, 32], strides = [1, 1, 1]} : vector<1x8x32xf32> to vector<1x1x32xf32>
    %526 = vector.shape_cast %525 : vector<1x1x32xf32> to vector<1x32xf32>
    %527 = arith.addf %526, %512 : vector<1x32xf32>
    %528 = arith.negf %527 : vector<1x32xf32>
    %529 = math.exp %528 : vector<1x32xf32>
    %cst_301 = arith.constant 1.000000e+00 : f32
    %530 = vector.broadcast %cst_301 : f32 to vector<1x32xf32>
    %531 = arith.addf %530, %529 : vector<1x32xf32>
    %532 = arith.divf %530, %531 : vector<1x32xf32>
    %533 = vector.extract_strided_slice %50 {offsets = [0, 7, 0], sizes = [1, 1, 32], strides = [1, 1, 1]} : vector<1x8x32xf32> to vector<1x1x32xf32>
    %534 = vector.shape_cast %533 : vector<1x1x32xf32> to vector<1x32xf32>
    %535 = arith.addf %534, %518 : vector<1x32xf32>
    %536 = arith.negf %535 : vector<1x32xf32>
    %537 = math.exp %536 : vector<1x32xf32>
    %cst_302 = arith.constant 1.000000e+00 : f32
    %538 = vector.broadcast %cst_302 : f32 to vector<1x32xf32>
    %539 = arith.addf %538, %537 : vector<1x32xf32>
    %540 = arith.divf %538, %539 : vector<1x32xf32>
    %541 = vector.extract_strided_slice %58 {offsets = [0, 7, 0], sizes = [1, 1, 32], strides = [1, 1, 1]} : vector<1x8x32xf32> to vector<1x1x32xf32>
    %542 = vector.shape_cast %541 : vector<1x1x32xf32> to vector<1x32xf32>
    %543 = arith.mulf %532, %524 : vector<1x32xf32>
    %544 = arith.addf %542, %543 : vector<1x32xf32>
    %545 = math.tanh %544 : vector<1x32xf32>
    %cst_303 = arith.constant 1.000000e+00 : f32
    %546 = vector.broadcast %cst_303 : f32 to vector<1x32xf32>
    %547 = arith.subf %546, %540 : vector<1x32xf32>
    %548 = arith.mulf %547, %545 : vector<1x32xf32>
    %549 = arith.mulf %540, %486 : vector<1x32xf32>
    %550 = arith.addf %548, %549 : vector<1x32xf32>
    %551 = vector.shape_cast %550 : vector<1x32xf32> to vector<1x1x32xf32>
    "tpu.trace_start"() <{level = 10 : i32, message = "bqh,bsh->bqs"}> : () -> ()
    %cst_304 = arith.constant dense<0.000000e+00> : vector<1x1x8xf32>
    %552 = tpu.matmul %551, %24, %cst_304 {dimension_numbers = #tpu.dot_dimension_numbers<[2], [2], [1], [1], [0, 0, 0, 1, 1, 1], [0], [0]>} : vector<1x1x32xf32>, vector<1x8x32xf32>, vector<1x1x8xf32> -> vector<1x1x8xf32>
    "tpu.trace_stop"() : () -> ()
    %553 = vector.shape_cast %552 : vector<1x1x8xf32> to vector<1x8xf32>
    %cst_305 = arith.constant dense<0xFF800000> : vector<1xf32>
    %554 = vector.multi_reduction <maximumf>, %553, %cst_305 [1] : vector<1x8xf32> to vector<1xf32>
    %555 = vector.shape_cast %554 : vector<1xf32> to vector<1x1xf32>
    %556 = vector.broadcast %555 : vector<1x1xf32> to vector<1x8xf32>
    %557 = arith.subf %553, %556 : vector<1x8xf32>
    %558 = math.exp %557 : vector<1x8xf32>
    %cst_306 = arith.constant dense<0.000000e+00> : vector<1xf32>
    %559 = vector.multi_reduction <add>, %558, %cst_306 [1] : vector<1x8xf32> to vector<1xf32>
    %560 = vector.shape_cast %559 : vector<1xf32> to vector<1x1xf32>
    %561 = tpu.reciprocal %560 {approx = true} : vector<1x1xf32> -> vector<1x1xf32>
    %562 = vector.broadcast %561 : vector<1x1xf32> to vector<1x8xf32>
    %563 = arith.mulf %558, %562 : vector<1x8xf32>
    %564 = vector.shape_cast %563 : vector<1x8xf32> to vector<1x1x8xf32>
    "tpu.trace_start"() <{level = 10 : i32, message = "bqs,bsh->bqh"}> : () -> ()
    %cst_307 = arith.constant dense<0.000000e+00> : vector<1x1x32xf32>
    %565 = tpu.matmul %564, %24, %cst_307 {dimension_numbers = #tpu.dot_dimension_numbers<[2], [1], [1], [2], [0, 0, 0, 1, 1, 2], [0], [0]>} : vector<1x1x8xf32>, vector<1x8x32xf32>, vector<1x1x32xf32> -> vector<1x1x32xf32>
    "tpu.trace_stop"() : () -> ()
    %566 = vector.shape_cast %565 : vector<1x1x32xf32> to vector<1x32xf32>
    %567 = vector.shape_cast %550 : vector<1x32xf32> to vector<1x1x32xf32>
    %c0_308 = arith.constant 0 : index
    %c7 = arith.constant 7 : index
    %c0_309 = arith.constant 0 : index
    %568 = vector.load %arg18[%c0_308, %c7, %c0_309] : memref<1x8x32xf32, #tpu.memory_space<vmem>>, vector<1x1x32xf32>
    tpu.vector_store %arg18[%c0_308, %c7, %c0_309], %567 {strides = array<i32>} : memref<1x8x32xf32, #tpu.memory_space<vmem>>, vector<1x1x32xf32>,
    %569 = vector.shape_cast %566 : vector<1x32xf32> to vector<1x1x32xf32>
    %c0_310 = arith.constant 0 : index
    %c7_311 = arith.constant 7 : index
    %c0_312 = arith.constant 0 : index
    %570 = vector.load %arg19[%c0_310, %c7_311, %c0_312] : memref<1x8x32xf32, #tpu.memory_space<vmem>>, vector<1x1x32xf32>
    tpu.vector_store %arg19[%c0_310, %c7_311, %c0_312], %569 {strides = array<i32>} : memref<1x8x32xf32, #tpu.memory_space<vmem>>, vector<1x1x32xf32>,
    %c0_313 = arith.constant 0 : index
    %c0_314 = arith.constant 0 : index
    %c0_315 = arith.constant 0 : index
    %571 = vector.load %arg18[%c0_313, %c0_314, %c0_315] : memref<1x8x32xf32, #tpu.memory_space<vmem>>, vector<1x8x32xf32>
    %572 = vector.shape_cast %571 : vector<1x8x32xf32> to vector<8x32xf32>
    %c0_316 = arith.constant 0 : index
    %c0_317 = arith.constant 0 : index
    %c0_318 = arith.constant 0 : index
    %573 = vector.load %arg19[%c0_316, %c0_317, %c0_318] : memref<1x8x32xf32, #tpu.memory_space<vmem>>, vector<1x8x32xf32>
    %574 = vector.shape_cast %573 : vector<1x8x32xf32> to vector<8x32xf32>
    %c0_319 = arith.constant 0 : index
    %c0_320 = arith.constant 0 : index
    %575 = vector.load %arg14[%c0_319, %c0_320] : memref<32x128xf32, #tpu.memory_space<vmem>>, vector<32x128xf32>
    %cst_321 = arith.constant dense<0.000000e+00> : vector<8x128xf32>
    %576 = tpu.matmul %572, %575, %cst_321 {dimension_numbers = #tpu.dot_dimension_numbers<[1], [0], [0], [1], [0, 0, 1, 1], [], []>} : vector<8x32xf32>, vector<32x128xf32>, vector<8x128xf32> -> vector<8x128xf32>
    %c0_322 = arith.constant 0 : index
    %c0_323 = arith.constant 0 : index
    %577 = vector.load %arg15[%c0_322, %c0_323] : memref<32x128xf32, #tpu.memory_space<vmem>>, vector<32x128xf32>
    %cst_324 = arith.constant dense<0.000000e+00> : vector<8x128xf32>
    %578 = tpu.matmul %574, %577, %cst_324 {dimension_numbers = #tpu.dot_dimension_numbers<[1], [0], [0], [1], [0, 0, 1, 1], [], []>} : vector<8x32xf32>, vector<32x128xf32>, vector<8x128xf32> -> vector<8x128xf32>
    %579 = arith.addf %576, %578 : vector<8x128xf32>
    %c0_325 = arith.constant 0 : index
    %c0_326 = arith.constant 0 : index
    %580 = vector.load %arg16[%c0_325, %c0_326] : memref<1x128xf32, #tpu.memory_space<vmem>>, vector<1x128xf32>
    %581 = vector.broadcast %580 : vector<1x128xf32> to vector<8x128xf32>
    %582 = arith.addf %579, %581 : vector<8x128xf32>
    %583 = tpu.iota {dimensions = array<i32: 1>} : vector<8x128xi32>
    %c20_i32 = arith.constant 20 : i32
    %584 = vector.broadcast %c20_i32 : i32 to vector<8x128xi32>
    %585 = arith.cmpi slt, %583, %584 : vector<8x128xi32>
    %cst_327 = arith.constant -1.000000e+30 : f32
    %586 = vector.broadcast %cst_327 : f32 to vector<8x128xf32>
    %587 = arith.select %585, %582, %586 : vector<8x128xi1>, vector<8x128xf32>
    %cst_328 = arith.constant dense<0xFF800000> : vector<8xf32>
    %588 = vector.multi_reduction <maximumf>, %587, %cst_328 [1] : vector<8x128xf32> to vector<8xf32>
    %589 = vector.shape_cast %588 : vector<8xf32> to vector<8x1xf32>
    %590 = vector.broadcast %589 : vector<8x1xf32> to vector<8x128xf32>
    %591 = arith.subf %587, %590 : vector<8x128xf32>
    %592 = math.exp %591 : vector<8x128xf32>
    %cst_329 = arith.constant dense<0.000000e+00> : vector<8xf32>
    %593 = vector.multi_reduction <add>, %592, %cst_329 [1] : vector<8x128xf32> to vector<8xf32>
    %594 = vector.shape_cast %593 : vector<8xf32> to vector<8x1xf32>
    %595 = math.log %594 : vector<8x1xf32>
    %596 = vector.broadcast %595 : vector<8x1xf32> to vector<8x128xf32>
    %597 = arith.subf %591, %596 : vector<8x128xf32>
    %c0_330 = arith.constant 0 : index
    %c0_331 = arith.constant 0 : index
    %598 = vector.load %arg17[%c0_330, %c0_331] : memref<8x128xf32, #tpu.memory_space<vmem>>, vector<8x128xf32>
    tpu.vector_store %arg17[%c0_330, %c0_331], %597 {strides = array<i32>} : memref<8x128xf32, #tpu.memory_space<vmem>>, vector<8x128xf32>,
    return
  }
  func.func @transform_0(%arg0: i32) -> (i32, i32, i32) {
    %c0_i32 = arith.constant 0 : i32
    %c0_i32_0 = arith.constant 0 : i32
    %c0_i32_1 = arith.constant 0 : i32
    return %arg0, %c0_i32, %c0_i32_0 : i32, i32, i32
  }
  func.func @transform_1(%arg0: i32) -> (i32, i32) {
    %c0_i32 = arith.constant 0 : i32
    %c0_i32_0 = arith.constant 0 : i32
    %c0_i32_1 = arith.constant 0 : i32
    return %c0_i32, %c0_i32_0 : i32, i32
  }
  func.func @transform_2(%arg0: i32) -> (i32, i32) {
    %c0_i32 = arith.constant 0 : i32
    %c0_i32_0 = arith.constant 0 : i32
    %c0_i32_1 = arith.constant 0 : i32
    return %c0_i32, %c0_i32_0 : i32, i32
  }
  func.func @transform_3(%arg0: i32) -> (i32, i32) {
    %c0_i32 = arith.constant 0 : i32
    %c0_i32_0 = arith.constant 0 : i32
    %c0_i32_1 = arith.constant 0 : i32
    return %c0_i32, %c0_i32_0 : i32, i32
  }
  func.func @transform_4(%arg0: i32) -> (i32, i32) {
    %c0_i32 = arith.constant 0 : i32
    %c0_i32_0 = arith.constant 0 : i32
    %c0_i32_1 = arith.constant 0 : i32
    return %c0_i32, %c0_i32_0 : i32, i32
  }
  func.func @transform_5(%arg0: i32) -> (i32, i32) {
    %c0_i32 = arith.constant 0 : i32
    %c0_i32_0 = arith.constant 0 : i32
    %c0_i32_1 = arith.constant 0 : i32
    return %c0_i32, %c0_i32_0 : i32, i32
  }
  func.func @transform_6(%arg0: i32) -> (i32, i32) {
    %c0_i32 = arith.constant 0 : i32
    %c0_i32_0 = arith.constant 0 : i32
    %c0_i32_1 = arith.constant 0 : i32
    return %c0_i32, %c0_i32_0 : i32, i32
  }
  func.func @transform_7(%arg0: i32) -> (i32, i32) {
    %c0_i32 = arith.constant 0 : i32
    %c0_i32_0 = arith.constant 0 : i32
    %c0_i32_1 = arith.constant 0 : i32
    return %c0_i32, %c0_i32_0 : i32, i32
  }
  func.func @transform_8(%arg0: i32) -> (i32, i32, i32) {
    %c0_i32 = arith.constant 0 : i32
    %c0_i32_0 = arith.constant 0 : i32
    %c0_i32_1 = arith.constant 0 : i32
    return %arg0, %c0_i32, %c0_i32_0 : i32, i32, i32
  }
  func.func @transform_9(%arg0: i32) -> (i32, i32, i32) {
    %c0_i32 = arith.constant 0 : i32
    %c0_i32_0 = arith.constant 0 : i32
    %c0_i32_1 = arith.constant 0 : i32
    %c0_i32_2 = arith.constant 0 : i32
    return %c0_i32, %c0_i32_0, %c0_i32_1 : i32, i32, i32
  }
  func.func @transform_10(%arg0: i32) -> (i32, i32, i32) {
    %c0_i32 = arith.constant 0 : i32
    %c0_i32_0 = arith.constant 0 : i32
    %c0_i32_1 = arith.constant 0 : i32
    %c0_i32_2 = arith.constant 0 : i32
    return %c0_i32, %c0_i32_0, %c0_i32_1 : i32, i32, i32
  }
  func.func @transform_11(%arg0: i32) -> (i32, i32, i32) {
    %c0_i32 = arith.constant 0 : i32
    %c0_i32_0 = arith.constant 0 : i32
    %c0_i32_1 = arith.constant 0 : i32
    %c0_i32_2 = arith.constant 0 : i32
    return %c0_i32, %c0_i32_0, %c0_i32_1 : i32, i32, i32
  }
  func.func @transform_12(%arg0: i32) -> (i32, i32, i32) {
    %c0_i32 = arith.constant 0 : i32
    %c0_i32_0 = arith.constant 0 : i32
    %c0_i32_1 = arith.constant 0 : i32
    %c0_i32_2 = arith.constant 0 : i32
    return %c0_i32, %c0_i32_0, %c0_i32_1 : i32, i32, i32
  }
  func.func @transform_13(%arg0: i32) -> (i32, i32) {
    %c0_i32 = arith.constant 0 : i32
    %c0_i32_0 = arith.constant 0 : i32
    %c0_i32_1 = arith.constant 0 : i32
    return %c0_i32, %c0_i32_0 : i32, i32
  }
  func.func @transform_14(%arg0: i32) -> (i32, i32) {
    %c0_i32 = arith.constant 0 : i32
    %c0_i32_0 = arith.constant 0 : i32
    %c0_i32_1 = arith.constant 0 : i32
    return %c0_i32, %c0_i32_0 : i32, i32
  }
  func.func @transform_15(%arg0: i32) -> (i32, i32) {
    %c0_i32 = arith.constant 0 : i32
    %c0_i32_0 = arith.constant 0 : i32
    %c0_i32_1 = arith.constant 0 : i32
    return %c0_i32, %c0_i32_0 : i32, i32
  }
  func.func @transform_16(%arg0: i32) -> (i32, i32) {
    %c0_i32 = arith.constant 0 : i32
    %c0_i32_0 = arith.constant 0 : i32
    return %arg0, %c0_i32 : i32, i32
  }
}

</mosaic_0001>

<bundles_post_ra>
// kernel: gcn2seq_forward.1
= control target key start
LH: loop header
LB: loop body
LE: loop exit
PB: predicated region body
PF: predicated region fallthrough
CT: control target
= control target key end

     0   :  { %s3635_s0 = inlined_call_operand.vmem [shape: f32[2,8,16], index: 0, kind: input, shape index: {}]   ;;  %s3636_s1 = inlined_call_operand.vmem [shape: f32[8,8], index: 1, kind: input, shape index: {}]   ;;  %s3637_s2 = inlined_call_operand.vmem [shape: f32[16,32], index: 2, kind: input, shape index: {}]   ;;  %s3638_s3 = inlined_call_operand.vmem [shape: f32[1,32], index: 3, kind: input, shape index: {}]   ;;  %s3639_s4 = inlined_call_operand.vmem [shape: f32[32,32], index: 4, kind: input, shape index: {}]   ;;  %s3640_s5 = inlined_call_operand.vmem [shape: f32[1,32], index: 5, kind: input, shape index: {}]   ;;  %s3641_s6 = inlined_call_operand.vmem [shape: f32[32,32], index: 6, kind: input, shape index: {}]   ;;  %s3642_s7 = inlined_call_operand.vmem [shape: f32[1,32], index: 7, kind: input, shape index: {}]   ;;  %s3643_s8 = inlined_call_operand.vmem [shape: f32[2,8,16], index: 8, kind: input, shape index: {}]   ;;  %s3644_s9 = inlined_call_operand.vmem [shape: f32[3,16,32], index: 9, kind: input, shape index: {}]   ;;  %s3645_s10 = inlined_call_operand.vmem [shape: f32[3,1,32], index: 10, kind: input, shape index: {}]   ;;  %s3646_s11 = inlined_call_operand.vmem [shape: f32[3,32,32], index: 11, kind: input, shape index: {}]   ;;  %s3647_s12 = inlined_call_operand.vmem [shape: f32[3,1,32], index: 12, kind: input, shape index: {}]   ;;  %s3648_s13 = inlined_call_operand.vmem [shape: f32[32,128], index: 13, kind: input, shape index: {}]   ;;  %s3649_s14 = inlined_call_operand.vmem [shape: f32[32,128], index: 14, kind: input, shape index: {}]   ;;  %s3650_s15 = inlined_call_operand.vmem [shape: f32[1,128], index: 15, kind: input, shape index: {}]   ;;  %s3651_s16 = inlined_call_operand.hbm [shape: f32[16,128], index: 16, kind: output, shape index: {}]  }
   0x1   :  { %3657 = sst [smem:[#allocation11_spill]] %s3635_s0 }
   0x2   :  { %3658 = sst [smem:[#allocation12_spill]] %s3636_s1 }
   0x3   :  { %3659 = sst [smem:[#allocation13_spill]] %s3637_s2 }
   0x4   :  { %21 = vsyncpa [#allocation5], 0 }
   0x5   :  { %23 = vsyncpa [#allocation5 + $0x1], 0  ;;  %s2975_s21 = smov 0   ;;  %s2977_s22 = smov 0  }
   0x6   :  { %s2979_s23 = smov 0   ;;  %s2981_s24 = smov 0  }
   0x7 LB: > { %3660 = sst [smem:[#allocation7_spill]] %s2883_s23  ;;  %s2996_s25 = sadd.s32 4294967295, %s2887_s24   ;;  %s2887_s24 = sphi %s2981_s24, %s3671_s24   ;;  %s2883_s23 = sphi %s2979_s23, %s3673_s23   ;;  %s2879_s22 = sphi %s2977_s22, %s3675_s22   ;;  %s2875_s21 = sphi %s2975_s21, %s3674_s21  }
   0x8   : > { %s2488_s26 = sadd.s32 4294967294, %s2887_s24   ;;  %s3000_s27 = sadd.s32 1, %s2887_s24  }
   0x9   : > { %3661 = sst [smem:[#allocation8_spill]] %s3000_s27  ;;  %s382_s28 = sadd.s32 1, %s2883_s23 }
   0xa   : > { %s379_s29 = ssub.s32 %s2887_s24, %s3000_s27  ;;  %p392_p0 = scmp.ne.s32.totalorder %s2883_s23, %s2879_s22 }
   0xb   : > { %p380_p1 = scmp.eq.s32.totalorder %s379_s29, 0  ;;  %p393_p2 = scmp.eq.s32.totalorder %s2996_s25, 1 }
   0xc   : > { %p398_p3 = scmp.ne.s32.totalorder %s2879_s22, %s2875_s21  ;;  %p399_p4 = scmp.eq.s32.totalorder %s2488_s26, 1 }
   0xd   : > { %s3011_s30 = scalar_select %p380_p1, %s2883_s23, %s382_s28  }
   0xe   : > { %p3013_p5 = por %p393_p2, %p392_p0  ;;  %p3017_p6 = por %p399_p4, %p398_p3 }
   0xf   : > { %3662 = sst [smem:[#allocation9_spill]] %s3011_s30  ;;  %p2491_p7 = scmp.ge.s32.totalorder %s2887_s24, 1 }
  0x10   : > { %s3664_s17 = scalar_select %p3017_p6, 1, 0 }
  0x11   : > { %p473_p8 = scmp.lt.s32.totalorder %s2887_s24, 3 }
  0x12   : > { %3665 = sst [smem:[#allocation10_spill]] %s3664_s17 }
  0x13   : > { %p474_p9 = pnand %p2491_p7, %p473_p8 }
  0x14   : > { %s3666_s2 = sld [smem:[#allocation13_spill]] (!%p474_p9)  ;;  %p526_p10 = scmp.lt.s32.totalorder (!%p474_p9), %s2996_s25, 1 }
  0x15   : > { %477 = sbr.rel (%p474_p9) target bundleno = 4528 (0x11b0), region = 84  ;;  %s3667_s18 = sld [smem:[#allocation11_spill]] (!%p474_p9) }
  0x16   : > { %s3668_s1 = sld [smem:[#allocation12_spill]] (!%p474_p9)  ;;  %s2656_s17 = sshll.u32 (!%p474_p9), %s2996_s25, 3 }
  0x1a   : > { %v537_v0 = vld [vmem:[%s3666_s2 + $0x8] sm:$0xff]  ;;  %v536_v1 = vld [vmem:[%s3666_s2] sm:$0xff]  ;;  %s3031_s28 = scalar_select %p526_p10, %s2996_s25, 1  ;;  %vm538_vm0 = vcmask 130048   ;;  %v594_v3 = vld [vmem:[%s3639_s4 + $0x18] sm:$0xff]  ;;  %vm566_vm1 = vcmask 64512  }
  0x1b   : > { %556 = vmatpush.msra.mxu0 %v537_v0  ;;  %611 = vmatpush.msra.mxu2 %v594_v3  ;;  %v593_v6 = vld [vmem:[%s3639_s4 + $0x10] sm:$0xff]  ;;  %v592_v7 = vld [vmem:[%s3639_s4 + $0x8] sm:$0xff]  ;;  %v591_v8 = vld [vmem:[%s3639_s4] sm:$0xff]  ;;  %vm595_vm2 = vcmask 261120   ;;  %v2889_v26 = vmov 8.0   ;;  %vm964_vm12 = vcmask 253952  }
  0x1c   : > { %s3656_s29 = sshll.u32 %s3031_s28, 3  ;;  %v534_v4 = vld [vmem:[%s3668_s1] sm:$0xff]  ;;  %v2506_v14 = vld [vmem:[%s3644_s9 + $0x28] sm:$0xff]  ;;  %v662_v16 = vld [vmem:[%s3641_s6 + $0x18] sm:$0xff]  ;;  %2705 = vrcp.f32 %v2889_v26  ;;  %s3669_s23 = sshll.u32 %s3031_s28, 3  ;;  %vm929_vm13 = vcmask 57344  }
  0x1d   : > { %557 = vmatpush.msra.mxu0 %v536_v1  ;;  %s529_s19 = scalar_lea.vmem %s3667_s18, %s3656_s29  ;;  %612 = vmatpush.msra.mxu2 %v593_v6  ;;  %v2699_v9 = vld [vmem:[%s3638_s3] ss:$0 sm:$0xff]  ;;  %v661_v17 = vld [vmem:[%s3641_s6 + $0x10] sm:$0xff]  ;;  %v660_v18 = vld [vmem:[%s3641_s6 + $0x8] sm:$0xff]  ;;  %s533_s27 = scalar_lea.vmem %s3643_s8, %s3669_s23 }
  0x1e   : > { %v535_v2 = vld [vmem:[%s529_s19] sm:$0xff]  ;;  %v3082_v20 = vld [vmem:[%s3646_s11 + $0x18] sm:$0xff]  ;;  %v3087_v21 = vld [vmem:[%s3646_s11 + $0x10] sm:$0xff]  ;;  %s523_s2 = sand.u32 1, %s2879_s22   ;;  %s2412_s23 = scalar_lea.hbm %s3651_s16, %s2656_s17 }
  0x1f   : > { %2495 = vmatmul.msk.f32.vlgmr.msra.gmra.mxu0 %vm538_vm0, %v535_v2  ;;  %613 = vmatpush.msra.mxu2 %v592_v7  ;;  %v2505_v15 = vld [vmem:[%s3644_s9 + $0x20] sm:$0xff]  ;;  %v3093_v22 = vld [vmem:[%s3646_s11 + $0x8] sm:$0xff]  ;;  %v3112_v27 = vld [vmem:[%s3646_s11 + $0x38] sm:$0xff]  ;;  %s2492_s20 = sshll.u32 %s523_s2, 3  ;;  %s2402_s29 = scalar_lea.sflag [#allocation5], %s523_s2 }
  0x20   : > { %v659_v19 = vld [vmem:[%s3641_s6] sm:$0xff]  ;;  %v690_v24 = vld [vmem:[%s3644_s9 + $0x8] sm:$0xff]  ;;  %v2502_v28 = vld [vmem:[%s3644_s9 + $0x18] sm:$0xff]  ;;  %s525_s30 = scalar_lea.vmem [#allocation4], %s2492_s20  ;;  %s2845_s17 = scalar_lea.hbm %s3651_s16, 16 }
  0x21   : > { %614 = vmatpush.msra.mxu2 %v591_v8  ;;  %v3099_v23 = vld [vmem:[%s3646_s11] sm:$0xff]  ;;  %740 = vmatpush.msrb.mxu0 %v2502_v28  ;;  %v3120_v29 = vld [vmem:[%s3646_s11 + $0x30] sm:$0xff]  ;;  %v3143_v48 = vld [vmem:[%s3646_s11 + $0x28] sm:$0xff]  ;;  %s2414_s18 = sshll.u32 %s525_s30, 4  ;;  %s2415_s18 = int_to_ptr.vmem [resolvable:$true] %s2414_s18 }
  0x22   : > { %v689_v25 = vld [vmem:[%s3644_s9] sm:$0xff]  ;;  %v2706_v30 = vpop.eup %2705  ;;  %v2501_v49 = vld [vmem:[%s3644_s9 + $0x10] sm:$0xff]  ;;  %v3159_v52 = vld [vmem:[%s3646_s11 + $0x58] sm:$0xff] }
  0x23   : > { %768 = vmatpush.msrb.mxu2 %v2506_v14  ;;  %v2700_v31 = vld [vmem:[%s3640_s5] ss:$0 sm:$0xff]  ;;  %v652_v32 = vmul.f32 8.0, %v2706_v30  ;;  %vm656_vm3 = vweird.f32 %v2706_v30  ;;  %741 = vmatpush.msrb.mxu0 %v2501_v49  ;;  %v3164_v53 = vld [vmem:[%s3646_s11 + $0x50] sm:$0xff]  ;;  %v3172_v54 = vld [vmem:[%s3646_s11 + $0x48] sm:$0xff] }
  0x24   : > { %v688_v50 = vld [vmem:[%s533_s27] sm:$0xff]  ;;  %s2416_s27 = sshll.u32 %s2412_s23, 4  ;;  %s2417_s27 = int_to_ptr.hbm [resolvable:$true] %s2416_s27 }
  0x25   : > { %769 = vmatpush.msrb.mxu2 %v2505_v15  ;;  %v653_v36 = vsub.f32 1.0, %v652_v32  ;;  %v3152_v51 = vld [vmem:[%s3646_s11 + $0x20] sm:$0xff]  ;;  %848 = vmatpush.msra.mxu0 %v3159_v52  ;;  %s2839_s19 = sshra.s32 %s2417_s27, 4  ;;  %s2840_s19 = int_to_ptr.hbm [resolvable:$true] %s2839_s19 }
  0x26   : > { %v3181_v55 = vld [vmem:[%s3646_s11 + $0x40] sm:$0xff]  ;;  %s2841_s1 = scalar_lea.hbm %s2840_s19, 8  ;;  %p2846_p0 = scmp.lt.s32.totalorder %s2840_s19, %s3651_s16 }
  0x27   : > { %v654_v39 = vmul.f32 %v2706_v30, %v653_v36  ;;  %2504 = vmatmul.msk.f32.vlgmr.msrb.gmra.mxu0 %vm538_vm0, %v688_v50  ;;  %v663_v56 = vld [vmem:[%s3642_s7] sm:$0x1]  ;;  %v2701_v1 = vld [vmem:[%s3645_s10 + $0x1] ss:$0 sm:$0xff]  ;;  %p2842_p11 = scmp.ne.s32.totalorder %s2840_s19, %s2841_s1  ;;  %p2847_p1 = scmp.lt.s32.totalorder %s2845_s17, %s2841_s1 }
  0x28   : > { %849 = vmatpush.msra.mxu0 %v3164_v53  ;;  %v2702_v60 = vld [vmem:[%s3645_s10] ss:$0 sm:$0xff] }
  0x29   : > { %v655_v42 = vadd.f32 %v2706_v30, %v654_v39  ;;  %v778_v62 = vld [vmem:[%s3647_s12] sm:$0x1]  ;;  %p2843_p12 = pnand %p2842_p11, %p3013_p5  ;;  %p2848_p2 = por %p2847_p1, %p2846_p0 }
  0x2a   : > { %850 = vmatpush.msra.mxu0 %v3172_v54 }
  0x2b   : > { %v657_v45 = vsel %vm656_vm3, %v2706_v30, %v655_v42  ;;  %v2703_v30 = vld [vmem:[%s3645_s10 + $0x2] ss:$0 sm:$0xff]  ;;  %p2844_p13 = pneg %p2843_p12 }
  0x2c   : > { %851 = vmatpush.msra.mxu0 %v3181_v55 }
  0x2d   : > { %p2849_p3 = pnand %p2848_p2, %p2844_p13 }
  0x2e   : > { %1009 = vmatpush.msrb.mxu0 %v3112_v27 }
  0x30   : > { %1010 = vmatpush.msrb.mxu0 %v3120_v29 }
  0x32   : > { %1011 = vmatpush.msrb.mxu0 %v3143_v48 }
  0x34   : > { %1012 = vmatpush.msrb.mxu0 %v3152_v51 }
  0x9c   : > { %v559_v5 = vpop.f32.mrf.mxu0 }
  0x9d   : > { %585 = vmatpush.msra.mxu1 %v559_v5  ;;  %v2514_v5 = vld [vmem:[%s3647_s12 + $0x1] sm:$0x1] }
  0x9e   : > { %2496 = vmatmul.msk.f32.vlgmr.msra.gmra.mxu1 %vm566_vm1, %v534_v4 }
  0x9f   : > { %679 = vmatpush.msrb.mxu1 %v662_v16 }
  0xa1   : > { %680 = vmatpush.msrb.mxu1 %v661_v17 }
  0xa3   : > { %681 = vmatpush.msrb.mxu1 %v660_v18 }
  0xa5   : > { %682 = vmatpush.msrb.mxu1 %v659_v19 }
  0xa7   : > { %794 = vmatpush.msra.mxu1 %v3082_v20 }
  0xa9   : > { %795 = vmatpush.msra.mxu1 %v3087_v21 }
  0xab   : > { %796 = vmatpush.msra.mxu1 %v3093_v22 }
  0xad   : > { %797 = vmatpush.msra.mxu1 %v3099_v23 }
 0x11b   : > { %v587_v10 = vpop.f32.mrf.mxu1 }
 0x11c   : > { %v588_v11 = vadd.f32 %v2699_v9, %v587_v10 }
 0x11e   : > { %v590_v12 = vmax.f32 %v588_v11, 0.0 }
 0x120   : > { %2497 = vmatmul.msk.f32.vlgmr.msra.gmra.mxu2 %vm595_vm2, %v590_v12 }
 0x128   : > { %2508 = vmatmul.msk.f32.vlgmr.msrb.gmra.mxu2 %vm538_vm0, %v688_v50 }
 0x1a3   : > { %v616_v13 = vpop.f32.mrf.mxu2 }
 0x1a4   : > { %638 = vmatpush.msra.mxu3 %v616_v13 }
 0x1a5   : > { %2498 = vmatmul.msk.f32.vlgmr.msra.gmra.mxu3 %vm566_vm1, %v534_v4  ;;  %v743_v4 = vpop.f32.mrf.mxu0 }
 0x1a6   : > { %712 = vmatpush.msrb.mxu3 %v690_v24  ;;  %v3227_v6 = vadd.f32 %v2701_v1, %v743_v4  ;;  %v2520_v24 = vld [vmem:[%s3647_s12 + $0x2] sm:$0x1] }
 0x1a8   : > { %713 = vmatpush.msrb.mxu3 %v689_v25 }
 0x1aa   : > { %821 = vmatpush.msra.mxu3 %v3112_v27 }
 0x1ab   : > { %v771_v32 = vpop.f32.mrf.mxu2 }
 0x1ac   : > { %822 = vmatpush.msra.mxu3 %v3120_v29 }
 0x1ad   : > { %2500 = vmatmul.msk.f32.vlgmr.msrb.gmra.mxu3 %vm538_vm0, %v688_v50 }
 0x1ae   : > { %823 = vmatpush.msra.mxu3 %v3143_v48 }
 0x1b0   : > { %824 = vmatpush.msra.mxu3 %v3152_v51 }
 0x1b2   : > { %984 = vmatpush.msrb.mxu3 %v3082_v20 }
 0x1b4   : > { %985 = vmatpush.msrb.mxu3 %v3087_v21 }
 0x1b6   : > { %986 = vmatpush.msrb.mxu3 %v3093_v22 }
 0x1b8   : > { %987 = vmatpush.msrb.mxu3 %v3099_v23 }
 0x228   : > { %v640_v33 = vpop.f32.mrf.mxu3 }
 0x229   : > { %v641_v34 = vadd.f32 %v2700_v31, %v640_v33 }
 0x22b   : > { %v3127_v35 = vmax.f32 %v641_v34, 0.0 }
 0x22d   : > { %2524 = vmatpush.xpose.msk.msra.mxu2 %vm595_vm2, %v3127_v35  ;;  %v644_v37 = vsel %vm595_vm2, %v3127_v35, 0.0 }
 0x22e   : > { %v645_v38 = vrot.slane %v644_v37, 4 }
 0x230   : > { %v646_v40 = vadd.f32 %v645_v38, %v644_v37  ;;  %v715_v61 = vpop.f32.mrf.mxu3 }
 0x231   : > { %1034 = vmatpush.msrb.mxu2 %v3159_v52  ;;  %v3218_v63 = vadd.f32 %v2702_v60, %v715_v61 }
 0x232   : > { %v647_v41 = vrot.slane %v646_v40, 2 }
 0x233   : > { %1035 = vmatpush.msrb.mxu2 %v3164_v53 }
 0x234   : > { %v648_v43 = vadd.f32 %v647_v41, %v646_v40  ;;  %v3236_v40 = vadd.f32 %v2703_v30, %v771_v32 }
 0x235   : > { %1036 = vmatpush.msrb.mxu2 %v3172_v54 }
 0x236   : > { %v649_v44 = vrot.slane %v648_v43, 1 }
 0x237   : > { %1037 = vmatpush.msrb.mxu2 %v3181_v55 }
 0x238   : > { %v650_v46 = vadd.f32 %v649_v44, %v648_v43 }
 0x23a   : > { %v658_v47 = vmul.f32 %v657_v45, %v650_v46 }
 0x23c   : > { %2499 = vmatmul.msk.f32.vlgmr.msrb.gmra.mxu1 %vm595_vm2, %v658_v47 }
 0x23d   : > { %959 = vmatpush.msrb.mxu1 %v3127_v35 }
 0x2b9   : > { %v684_v57 = vpop.f32.mrf.mxu1 }
 0x2ba   : > { %v685_v58 = vadd.f32 %v684_v57, %v663_v56 }
 0x2bc   : > { %2707 = vtanh.f32 %v685_v58 }
 0x2c2   : > { %v3197_v59 = vpop.eup %2707 }
 0x2c3   : > { %2509 = vmatmul.msk.f32.vlgmr.msra.gmra.mxu1 %vm595_vm2, %v3197_v59  ;;  %2515 = vmatmul.msk.f32.vlgmr.msra.gmra.mxu3 %vm595_vm2, %v3197_v59 }
 0x2c4   : > { %2521 = vmatmul.msk.f32.vlgmr.msra.gmra.mxu0 %vm595_vm2, %v3197_v59  ;;  %2542 = vmatpush.xpose.msk.msra.mxu1 %vm595_vm2, %v3127_v35 }
 0x2c5   : > { %1153 = vmatpush.msra.mxu3 %v3127_v35  ;;  %1178 = vmatpush.msra.mxu0 %v3082_v20 }
 0x2c7   : > { %1179 = vmatpush.msra.mxu0 %v3087_v21 }
 0x2c9   : > { %1180 = vmatpush.msra.mxu0 %v3093_v22 }
 0x2cb   : > { %1181 = vmatpush.msra.mxu0 %v3099_v23 }
 0x340   : > { %v799_v0 = vpop.f32.mrf.mxu1 }
 0x341   : > { %v800_v2 = vadd.f32 %v799_v0, %v778_v62  ;;  %v853_v25 = vpop.f32.mrf.mxu0 }
 0x342   : > { %v854_v36 = vadd.f32 %v2520_v24, %v853_v25 }
 0x343   : > { %v856_v3 = vadd.f32 %v800_v2, %v3218_v63 }
 0x345   : > { %v2522_v7 = vmul.f32 -1.442695, %v856_v3  ;;  %v971_v3 = vld [vmem:[%s3647_s12] sm:$0x1] }
 0x346   : > { %v826_v8 = vpop.f32.mrf.mxu3 }
 0x347   : > { %2709 = vpow2.f32 %v2522_v7  ;;  %v827_v9 = vadd.f32 %v2514_v5, %v826_v8 }
 0x349   : > { %v876_v10 = vadd.f32 %v827_v9, %v3227_v6 }
 0x34b   : > { %v2523_v11 = vmul.f32 -1.442695, %v876_v10 }
 0x34d   : > { %v2710_v12 = vpop.eup %2709  ;;  %2711 = vpow2.f32 %v2523_v11 }
 0x34e   : > { %v860_v13 = vadd.f32 1.0, %v2710_v12 }
 0x350   : > { %2713 = vrcp.f32 %v860_v13  ;;  %v872_v19 = vand.u32 2147483648, %v860_v13  ;;  %v870_v28 = vand.u32 2147483647, %v860_v13  ;;  %vm866_vm5 = vweird.f32 %v860_v13 }
 0x352   : > { %v873_v37 = vor.u32 1.1754944e-38, %v872_v19  ;;  %vm871_vm7 = vcmp.eq.f32.partialorder %v870_v28, 8.507059e+37  ;;  %v2538_v28 = vld [vmem:[%s3647_s12 + $0x2] sm:$0x1] }
 0x353   : > { %v2712_v14 = vpop.eup %2711 }
 0x354   : > { %v880_v15 = vadd.f32 1.0, %v2712_v14 }
 0x356   : > { %v2714_v16 = vpop.eup %2713  ;;  %2715 = vrcp.f32 %v880_v15  ;;  %v892_v44 = vand.u32 2147483648, %v880_v15  ;;  %v890_v45 = vand.u32 2147483647, %v880_v15  ;;  %vm886_vm9 = vweird.f32 %v880_v15 }
 0x357   : > { %v862_v17 = vmul.f32 %v2714_v16, %v860_v13  ;;  %vm867_vm4 = vweird.f32 %v2714_v16 }
 0x358   : > { %vm868_vm6 = vmor %vm866_vm5, %vm867_vm4  ;;  %v893_v50 = vor.u32 1.1754944e-38, %v892_v44  ;;  %vm891_vm11 = vcmp.eq.f32.partialorder %v890_v45, 8.507059e+37 }
 0x359   : > { %v863_v18 = vsub.f32 1.0, %v862_v17 }
 0x35b   : > { %v864_v26 = vmul.f32 %v2714_v16, %v863_v18 }
 0x35c   : > { %v2716_v31 = vpop.eup %2715 }
 0x35d   : > { %v865_v33 = vadd.f32 %v2714_v16, %v864_v26  ;;  %v882_v34 = vmul.f32 %v2716_v31, %v880_v15  ;;  %vm887_vm8 = vweird.f32 %v2716_v31 }
 0x35e   : > { %vm888_vm10 = vmor %vm886_vm9, %vm887_vm8  ;;  %vm1158_vm8 = vcmask 254977  }
 0x35f   : > { %v869_v38 = vsel %vm868_vm6, %v2714_v16, %v865_v33  ;;  %v883_v39 = vsub.f32 1.0, %v882_v34 }
 0x360   : > { %v874_v41 = vsel %vm871_vm7, %v873_v37, %v869_v38 }
 0x361   : > { %v896_v42 = vmul.f32 %v874_v41, %v854_v36  ;;  %v884_v43 = vmul.f32 %v2716_v31, %v883_v39 }
 0x363   : > { %v885_v46 = vadd.f32 %v2716_v31, %v884_v43  ;;  %v897_v47 = vadd.f32 %v896_v42, %v3236_v40 }
 0x365   : > { %v889_v49 = vsel %vm888_vm10, %v2716_v31, %v885_v46  ;;  %2717 = vtanh.f32 %v897_v47 }
 0x366   : > { %v894_v56 = vsel %vm891_vm11, %v893_v50, %v889_v49 }
 0x367   : > { %v899_v57 = vsub.f32 1.0, %v894_v56  ;;  %v901_v61 = vmul.f32 %v3197_v59, %v894_v56  ;;  %v2532_v59 = vld [vmem:[%s3647_s12 + $0x1] sm:$0x1] }
 0x36b   : > { %v2718_v58 = vpop.eup %2717 }
 0x36c   : > { %v900_v60 = vmul.f32 %v2718_v58, %v899_v57 }
 0x36e   : > { %v3240_v62 = vadd.f32 %v901_v61, %v900_v60 }
 0x370   : > { %2525 = vmatmul.msk.f32.vlgmr.msra.gmra.mxu2 %vm595_vm2, %v3240_v62  ;;  %2527 = vmatmul.msk.f32.vlgmr.msrb.gmra.mxu3 %vm595_vm2, %v3240_v62  ;;  %965 = vst.msk [vmem:[#allocation2] sm:$0x1] %vm964_vm12, %v3240_v62  ;;  %v1096_v60 = vrot.slane %v3240_v62, 7 }
 0x371   : > { %2533 = vmatmul.msk.f32.vlgmr.msrb.gmra.mxu0 %vm595_vm2, %v3240_v62  ;;  %2560 = vmatpush.xpose.msk.msrb.mxu3 %vm595_vm2, %v3127_v35 }
 0x372   : > { %1347 = vmatpush.msrb.mxu0 %v3127_v35  ;;  %1203 = vmatpush.msra.mxu2 %v3112_v27 }
 0x374   : > { %1204 = vmatpush.msra.mxu2 %v3120_v29 }
 0x376   : > { %1205 = vmatpush.msra.mxu2 %v3143_v48 }
 0x378   : > { %2539 = vmatmul.msk.f32.vlgmr.msrb.gmra.mxu2 %vm595_vm2, %v3240_v62 }
 0x379   : > { %1206 = vmatpush.msra.mxu2 %v3152_v51 }
 0x37b   : > { %1372 = vmatpush.msrb.mxu2 %v3082_v20 }
 0x37d   : > { %1373 = vmatpush.msrb.mxu2 %v3087_v21 }
 0x37f   : > { %1374 = vmatpush.msrb.mxu2 %v3093_v22 }
 0x381   : > { %1375 = vmatpush.msrb.mxu2 %v3099_v23 }
 0x3ee   : > { %v1014_v0 = vpop.f32.mrf.mxu0 }
 0x3ef   : > { %v1015_v1 = vadd.f32 %v2532_v59, %v1014_v0 }
 0x3f1   : > { %v1066_v2 = vrot.slane %v1015_v1, 7 }
 0x3f3   : > { %v1068_v4 = vadd.f32 %v1066_v2, %v3227_v6  ;;  %v3270_v5 = vpop.f32.mrf.mxu2  ;;  %v989_v7 = vpop.f32.mrf.mxu3 }
 0x3f4   : > { %v990_v8 = vadd.f32 %v989_v7, %v971_v3  ;;  %v930_v9 = vsel %vm929_vm13, %v3270_v5, -inf }
 0x3f5   : > { %v2541_v10 = vmul.f32 -1.442695, %v1068_v4  ;;  %931 = vmax.xlane.f32.xlu0 %v930_v9 }
 0x3f6   : > { %v1043_v11 = vrot.slane %v990_v8, 7 }
 0x3f7   : > { %2719 = vpow2.f32 %v2541_v10 }
 0x3f8   : > { %v1045_v12 = vadd.f32 %v1043_v11, %v3218_v63 }
 0x3fa   : > { %v2540_v13 = vmul.f32 -1.442695, %v1045_v12 }
 0x3fb   : > { %v1039_v30 = vpop.f32.mrf.mxu2 }
 0x3fc   : > { %2721 = vpow2.f32 %v2540_v13  ;;  %v1040_v33 = vadd.f32 %v2538_v28, %v1039_v30 }
 0x3fd   : > { %v2720_v14 = vpop.eup %2719 }
 0x3fe   : > { %v1072_v15 = vadd.f32 1.0, %v2720_v14  ;;  %v1089_v42 = vrot.slane %v1040_v33, 7 }
 0x400   : > { %2723 = vrcp.f32 %v1072_v15  ;;  %v1084_v45 = vand.u32 2147483648, %v1072_v15  ;;  %vm1078_vm5 = vweird.f32 %v1072_v15  ;;  %v1082_v47 = vand.u32 2147483647, %v1072_v15 }
 0x402   : > { %v2722_v16 = vpop.eup %2721  ;;  %v1085_v56 = vor.u32 1.1754944e-38, %v1084_v45  ;;  %vm1083_vm7 = vcmp.eq.f32.partialorder %v1082_v47, 8.507059e+37 }
 0x403   : > { %v1049_v17 = vadd.f32 1.0, %v2722_v16 }
 0x405   : > { %2725 = vrcp.f32 %v1049_v17  ;;  %v1061_v32 = vand.u32 2147483648, %v1049_v17  ;;  %v1059_v36 = vand.u32 2147483647, %v1049_v17  ;;  %vm1055_vm15 = vweird.f32 %v1049_v17 }
 0x406   : > { %v2724_v18 = vpop.eup %2723 }
 0x407   : > { %v1074_v19 = vmul.f32 %v2724_v18, %v1072_v15  ;;  %v1062_v39 = vor.u32 1.1754944e-38, %v1061_v32  ;;  %vm1060_vm3 = vcmp.eq.f32.partialorder %v1059_v36, 8.507059e+37  ;;  %vm1079_vm4 = vweird.f32 %v2724_v18  ;;  %v2550_v15 = vld [vmem:[%s3647_s12 + $0x1] sm:$0x1] }
 0x408   : > { %vm1080_vm6 = vmor %vm1078_vm5, %vm1079_vm4  ;;  %vm1352_vm5 = vcmask 256002  }
 0x409   : > { %v1075_v26 = vsub.f32 1.0, %v1074_v19 }
 0x40b   : > { %v2726_v24 = vpop.eup %2725  ;;  %v1076_v37 = vmul.f32 %v2724_v18, %v1075_v26 }
 0x40c   : > { %v1051_v25 = vmul.f32 %v2726_v24, %v1049_v17  ;;  %vm1056_vm14 = vweird.f32 %v2726_v24 }
 0x40d   : > { %vm1057_vm0 = vmor %vm1055_vm15, %vm1056_vm14  ;;  %v1077_v44 = vadd.f32 %v2724_v18, %v1076_v37 }
 0x40e   : > { %v1052_v31 = vsub.f32 1.0, %v1051_v25 }
 0x40f   : > { %v1081_v50 = vsel %vm1080_vm6, %v2724_v18, %v1077_v44 }
 0x410   : > { %v1053_v34 = vmul.f32 %v2726_v24, %v1052_v31  ;;  %v1086_v57 = vsel %vm1083_vm7, %v1085_v56, %v1081_v50 }
 0x411   : > { %v1094_v58 = vsub.f32 1.0, %v1086_v57  ;;  %v1098_v0 = vmul.f32 %v1096_v60, %v1086_v57 }
 0x412   : > { %v1054_v38 = vadd.f32 %v2726_v24, %v1053_v34 }
 0x414   : > { %v1058_v41 = vsel %vm1057_vm0, %v2726_v24, %v1054_v38 }
 0x415   : > { %v1063_v43 = vsel %vm1060_vm3, %v1062_v39, %v1058_v41 }
 0x416   : > { %v1091_v46 = vmul.f32 %v1089_v42, %v1063_v43 }
 0x418   : > { %v1092_v49 = vadd.f32 %v1091_v46, %v3236_v40  ;;  %v2556_v46 = vld [vmem:[%s3647_s12 + $0x2] sm:$0x1] }
 0x41a   : > { %2727 = vtanh.f32 %v1092_v49 }
 0x420   : > { %v2728_v61 = vpop.eup %2727 }
 0x421   : > { %v1095_v59 = vmul.f32 %v2728_v61, %v1094_v58 }
 0x423   : > { %v3280_v1 = vadd.f32 %v1098_v0, %v1095_v59 }
 0x425   : > { %1159 = vst.msk [vmem:[#allocation2] sm:$0x2] %vm1158_vm8, %v3280_v1  ;;  %v1101_v2 = vrot.slane %v3280_v1, 1 }
 0x427   : > { %2545 = vmatmul.msk.f32.vlgmr.msra.gmra.mxu0 %vm595_vm2, %v1101_v2  ;;  %2551 = vmatmul.msk.f32.vlgmr.msra.gmra.mxu2 %vm595_vm2, %v1101_v2 }
 0x428   : > { %2578 = vmatpush.xpose.msk.msra.mxu0 %vm595_vm2, %v3127_v35  ;;  %1541 = vmatpush.msra.mxu2 %v3127_v35 }
 0x468   : > { %v932_v62 = vpop.xlane.xlu0 %931 }
 0x469   : > { %v933_v3 = vsub.f32 %v3270_v5, %v932_v62  ;;  %v1165_v5 = vld [vmem:[%s3647_s12] sm:$0x1] }
 0x46b   : > { %v934_v4 = vmul.f32 1.442695, %v933_v3 }
 0x46d   : > { %2729 = vpow2.f32 %v934_v4 }
 0x473   : > { %v2730_v7 = vpop.eup %2729 }
 0x474   : > { %v936_v8 = vsel %vm929_vm13, %v2730_v7, 0.0 }
 0x475   : > { %937 = vadd.xlane.f32.xlu0 %v936_v8 }
 0x4a4   : > { %v1183_v12 = vpop.f32.mrf.mxu0 }
 0x4a5   : > { %v1184_v13 = vadd.f32 %v1183_v12, %v1165_v5 }
 0x4a7   : > { %v1237_v14 = vrot.slane %v1184_v13, 6 }
 0x4a9   : > { %v1239_v18 = vadd.f32 %v1237_v14, %v3218_v63 }
 0x4aa   : > { %v1208_v16 = vpop.f32.mrf.mxu2 }
 0x4ab   : > { %v1209_v17 = vadd.f32 %v2550_v15, %v1208_v16  ;;  %v2558_v24 = vmul.f32 -1.442695, %v1239_v18 }
 0x4ad   : > { %v1260_v19 = vrot.slane %v1209_v17, 6 }
 0x4af   : > { %v1262_v25 = vadd.f32 %v1260_v19, %v3227_v6 }
 0x4b1   : > { %v2559_v26 = vmul.f32 -1.442695, %v1262_v25 }
 0x4e8   : > { %v938_v9 = vpop.xlane.xlu0 %937 }
 0x4e9   : > { %2731 = vrcp.f32 %v938_v9 }
 0x4ea   : > { %2733 = vpow2.f32 %v2558_v24 }
 0x4eb   : > { %2735 = vpow2.f32 %v2559_v26 }
 0x4ef   : > { %v2732_v10 = vpop.eup %2731 }
 0x4f0   : > { %v940_v11 = vmul.f32 %v2732_v10, %v2730_v7  ;;  %v2734_v28 = vpop.eup %2733 }
 0x4f1   : > { %v1243_v30 = vadd.f32 1.0, %v2734_v28  ;;  %v2736_v31 = vpop.eup %2735  ;;  %v1359_v28 = vld [vmem:[%s3647_s12] sm:$0x1] }
 0x4f2   : > { %2526 = vmatmul.msk.f32.vlgmr.msrb.gmra.mxu1 %vm566_vm1, %v940_v11  ;;  %v1266_v32 = vadd.f32 1.0, %v2736_v31  ;;  %v1290_v11 = vrot.slane %v3280_v1, 7 }
 0x4f3   : > { %1228 = vmatpush.msrb.mxu1 %v3159_v52  ;;  %2737 = vrcp.f32 %v1243_v30  ;;  %v1255_v47 = vand.u32 2147483648, %v1243_v30  ;;  %vm1249_vm10 = vweird.f32 %v1243_v30  ;;  %v1253_v49 = vand.u32 2147483647, %v1243_v30 }
 0x4f4   : > { %2739 = vrcp.f32 %v1266_v32  ;;  %vm1272_vm0 = vweird.f32 %v1266_v32  ;;  %v1276_v3 = vand.u32 2147483647, %v1266_v32 }
 0x4f5   : > { %1229 = vmatpush.msrb.mxu1 %v3164_v53  ;;  %v1256_v60 = vor.u32 1.1754944e-38, %v1255_v47  ;;  %vm1254_vm14 = vcmp.eq.f32.partialorder %v1253_v49, 8.507059e+37 }
 0x4f6   : > { %vm1277_vm4 = vcmp.eq.f32.partialorder %v1276_v3, 8.507059e+37 }
 0x4f7   : > { %1230 = vmatpush.msrb.mxu1 %v3172_v54 }
 0x4f9   : > { %1231 = vmatpush.msrb.mxu1 %v3181_v55  ;;  %v2738_v33 = vpop.eup %2737 }
 0x4fa   : > { %2543 = vmatmul.msk.f32.vlgmr.msra.gmra.mxu1 %vm595_vm2, %v1101_v2  ;;  %v1245_v36 = vmul.f32 %v2738_v33, %v1243_v30  ;;  %v2740_v37 = vpop.eup %2739  ;;  %vm1250_vm9 = vweird.f32 %v2738_v33 }
 0x4fb   : > { %1397 = vmatpush.msra.mxu1 %v3112_v27  ;;  %v1268_v39 = vmul.f32 %v2740_v37, %v1266_v32  ;;  %vm1251_vm11 = vmor %vm1249_vm10, %vm1250_vm9  ;;  %vm1273_vm15 = vweird.f32 %v2740_v37 }
 0x4fc   : > { %v1246_v38 = vsub.f32 1.0, %v1245_v36  ;;  %vm1274_vm3 = vmor %vm1272_vm0, %vm1273_vm15  ;;  %vm1546_vm0 = vcmask 257027  }
 0x4fd   : > { %1398 = vmatpush.msra.mxu1 %v3120_v29  ;;  %v1269_v44 = vsub.f32 1.0, %v1268_v39 }
 0x4fe   : > { %v1247_v43 = vmul.f32 %v2738_v33, %v1246_v38 }
 0x4ff   : > { %1399 = vmatpush.msra.mxu1 %v3143_v48  ;;  %v1270_v50 = vmul.f32 %v2740_v37, %v1269_v44 }
 0x500   : > { %v1248_v45 = vadd.f32 %v2738_v33, %v1247_v43 }
 0x501   : > { %1400 = vmatpush.msra.mxu1 %v3152_v51  ;;  %v1271_v0 = vadd.f32 %v2740_v37, %v1270_v50 }
 0x502   : > { %2557 = vmatmul.msk.f32.vlgmr.msrb.gmra.mxu1 %vm595_vm2, %v1101_v2  ;;  %v1252_v58 = vsel %vm1251_vm11, %v2738_v33, %v1248_v45  ;;  %v1278_v2 = vand.u32 2147483648, %v1266_v32  ;;  %v2568_v32 = vld [vmem:[%s3647_s12 + $0x1] sm:$0x1] }
 0x503   : > { %1566 = vmatpush.msrb.mxu1 %v3082_v20  ;;  %v1257_v59 = vsel %vm1254_vm14, %v1256_v60, %v1252_v58  ;;  %v1275_v7 = vsel %vm1274_vm3, %v2740_v37, %v1271_v0 }
 0x504   : > { %v1279_v8 = vor.u32 1.1754944e-38, %v1278_v2 }
 0x505   : > { %1567 = vmatpush.msrb.mxu1 %v3087_v21 }
 0x506   : > { %v1280_v9 = vsel %vm1277_vm4, %v1279_v8, %v1275_v7 }
 0x507   : > { %1568 = vmatpush.msrb.mxu1 %v3093_v22  ;;  %v1288_v10 = vsub.f32 1.0, %v1280_v9  ;;  %v1292_v13 = vmul.f32 %v1290_v11, %v1280_v9 }
 0x509   : > { %1569 = vmatpush.msrb.mxu1 %v3099_v23 }
 0x56f   : > { %v961_v34 = vpop.f32.mrf.mxu1 }
 0x570   : > { %966 = vst.msk [vmem:[#allocation3] sm:$0x1] %vm964_vm12, %v961_v34 }
 0x577   : > { %v1121_v41 = vpop.f32.mrf.mxu1 }
 0x578   : > { %v1124_v42 = vsel %vm929_vm13, %v1121_v41, -inf }
 0x579   : > { %1125 = vmax.xlane.f32.xlu1 %v1124_v42 }
 0x57f   : > { %v1233_v56 = vpop.f32.mrf.mxu1 }
 0x580   : > { %v1234_v57 = vadd.f32 %v2556_v46, %v1233_v56 }
 0x582   : > { %v1283_v61 = vrot.slane %v1234_v57, 6 }
 0x584   : > { %v1285_v62 = vmul.f32 %v1283_v61, %v1257_v59  ;;  %v2574_v61 = vld [vmem:[%s3647_s12 + $0x2] sm:$0x1] }
 0x586   : > { %v1286_v4 = vadd.f32 %v1285_v62, %v3236_v40 }
 0x588   : > { %2741 = vtanh.f32 %v1286_v4 }
 0x58e   : > { %v2742_v5 = vpop.eup %2741 }
 0x58f   : > { %v1289_v12 = vmul.f32 %v2742_v5, %v1288_v10 }
 0x591   : > { %v3321_v14 = vadd.f32 %v1292_v13, %v1289_v12 }
 0x593   : > { %1353 = vst.msk [vmem:[#allocation2] sm:$0x4] %vm1352_vm5, %v3321_v14  ;;  %v1295_v15 = vrot.slane %v3321_v14, 2 }
 0x595   : > { %2563 = vmatmul.msk.f32.vlgmr.msrb.gmra.mxu2 %vm595_vm2, %v1295_v15  ;;  %2569 = vmatmul.msk.f32.vlgmr.msra.gmra.mxu1 %vm595_vm2, %v1295_v15 }
 0x596   : > { %2596 = vmatpush.xpose.msk.msrb.mxu2 %vm595_vm2, %v3127_v35  ;;  %1735 = vmatpush.msra.mxu1 %v3127_v35 }
 0x5ec   : > { %v1126_v1 = vpop.xlane.xlu1 %1125 }
 0x5ed   : > { %v1127_v16 = vsub.f32 %v1121_v41, %v1126_v1 }
 0x5ef   : > { %v1128_v17 = vmul.f32 1.442695, %v1127_v16 }
 0x5f1   : > { %2743 = vpow2.f32 %v1128_v17 }
 0x5f7   : > { %v2744_v18 = vpop.eup %2743 }
 0x5f8   : > { %v1130_v19 = vsel %vm929_vm13, %v2744_v18, 0.0 }
 0x5f9   : > { %1131 = vadd.xlane.f32.xlu1 %v1130_v19 }
 0x612   : > { %v1402_v33 = vpop.f32.mrf.mxu1 }
 0x613   : > { %v1403_v36 = vadd.f32 %v2568_v32, %v1402_v33 }
 0x618   : > { %v1377_v30 = vpop.f32.mrf.mxu2 }
 0x619   : > { %v1378_v31 = vadd.f32 %v1377_v30, %v1359_v28 }
 0x61b   : > { %v1431_v34 = vrot.slane %v1378_v31, 5 }
 0x66c   : > { %v1132_v24 = vpop.xlane.xlu1 %1131 }
 0x66d   : > { %2745 = vrcp.f32 %v1132_v24 }
 0x673   : > { %v2746_v25 = vpop.eup %2745 }
 0x674   : > { %v1134_v26 = vmul.f32 %v2746_v25, %v2744_v18  ;;  %v1484_v18 = vrot.slane %v3321_v14, 7 }
 0x676   : > { %2544 = vmatmul.msk.f32.vlgmr.msra.gmra.mxu3 %vm566_vm1, %v1134_v26 }
 0x677   : > { %1422 = vmatpush.msra.mxu3 %v3159_v52 }
 0x679   : > { %1423 = vmatpush.msra.mxu3 %v3164_v53 }
 0x67b   : > { %1424 = vmatpush.msra.mxu3 %v3172_v54 }
 0x67d   : > { %1425 = vmatpush.msra.mxu3 %v3181_v55 }
 0x67e   : > { %2561 = vmatmul.msk.f32.vlgmr.msrb.gmra.mxu3 %vm595_vm2, %v1295_v15 }
 0x67f   : > { %1591 = vmatpush.msrb.mxu3 %v3112_v27 }
 0x681   : > { %1592 = vmatpush.msrb.mxu3 %v3120_v29 }
 0x683   : > { %1593 = vmatpush.msrb.mxu3 %v3143_v48 }
 0x685   : > { %1594 = vmatpush.msrb.mxu3 %v3152_v51 }
 0x686   : > { %2575 = vmatmul.msk.f32.vlgmr.msra.gmra.mxu3 %vm595_vm2, %v1295_v15 }
 0x687   : > { %1760 = vmatpush.msra.mxu3 %v3082_v20  ;;  %v1433_v20 = vadd.f32 %v1431_v34, %v3218_v63 }
 0x689   : > { %1761 = vmatpush.msra.mxu3 %v3087_v21  ;;  %v1454_v21 = vrot.slane %v1403_v36, 5  ;;  %v2576_v37 = vmul.f32 -1.442695, %v1433_v20 }
 0x68b   : > { %1762 = vmatpush.msra.mxu3 %v3093_v22  ;;  %v1456_v22 = vadd.f32 %v1454_v21, %v3227_v6  ;;  %2747 = vpow2.f32 %v2576_v37 }
 0x68d   : > { %1763 = vmatpush.msra.mxu3 %v3099_v23  ;;  %v2577_v23 = vmul.f32 -1.442695, %v1456_v22 }
 0x68f   : > { %2749 = vpow2.f32 %v2577_v23 }
 0x691   : > { %v2748_v38 = vpop.eup %2747 }
 0x692   : > { %v1437_v39 = vadd.f32 1.0, %v2748_v38 }
 0x694   : > { %2751 = vrcp.f32 %v1437_v39  ;;  %v1449_v59 = vand.u32 2147483648, %v1437_v39  ;;  %vm1443_vm7 = vweird.f32 %v1437_v39  ;;  %v1447_v0 = vand.u32 2147483647, %v1437_v39 }
 0x695   : > { %v2750_v41 = vpop.eup %2749 }
 0x696   : > { %v1460_v42 = vadd.f32 1.0, %v2750_v41  ;;  %v1450_v7 = vor.u32 1.1754944e-38, %v1449_v59  ;;  %vm1448_vm9 = vcmp.eq.f32.partialorder %v1447_v0, 8.507059e+37 }
 0x698   : > { %2753 = vrcp.f32 %v1460_v42  ;;  %v1472_v11 = vand.u32 2147483648, %v1460_v42  ;;  %vm1466_vm11 = vweird.f32 %v1460_v42  ;;  %v1470_v12 = vand.u32 2147483647, %v1460_v42 }
 0x69a   : > { %v2752_v43 = vpop.eup %2751  ;;  %v1473_v1 = vor.u32 1.1754944e-38, %v1472_v11  ;;  %vm1471_vm15 = vcmp.eq.f32.partialorder %v1470_v12, 8.507059e+37 }
 0x69b   : > { %v1439_v45 = vmul.f32 %v2752_v43, %v1437_v39  ;;  %vm1444_vm6 = vweird.f32 %v2752_v43 }
 0x69c   : > { %vm1445_vm8 = vmor %vm1443_vm7, %vm1444_vm6 }
 0x69d   : > { %v1440_v47 = vsub.f32 1.0, %v1439_v45  ;;  %v3393_v45 = vld [vmem:[%s3646_s11 + $0x18] sm:$0xff] }
 0x69e   : > { %v2754_v46 = vpop.eup %2753 }
 0x69f   : > { %v1462_v49 = vmul.f32 %v2754_v46, %v1460_v42  ;;  %v1441_v57 = vmul.f32 %v2752_v43, %v1440_v47  ;;  %vm1467_vm10 = vweird.f32 %v2754_v46  ;;  %v3400_v47 = vld [vmem:[%s3646_s11 + $0x10] sm:$0xff] }
 0x6a0   : > { %vm1468_vm14 = vmor %vm1466_vm11, %vm1467_vm10  ;;  %vm1740_vm11 = vcmask 258052  }
 0x6a1   : > { %v1463_v58 = vsub.f32 1.0, %v1462_v49  ;;  %v1442_v60 = vadd.f32 %v2752_v43, %v1441_v57  ;;  %v3406_v49 = vld [vmem:[%s3646_s11 + $0x8] sm:$0xff] }
 0x6a3   : > { %v1464_v2 = vmul.f32 %v2754_v46, %v1463_v58  ;;  %v1446_v4 = vsel %vm1445_vm8, %v2752_v43, %v1442_v60 }
 0x6a4   : > { %v1451_v9 = vsel %vm1448_vm9, %v1450_v7, %v1446_v4 }
 0x6a5   : > { %v1465_v10 = vadd.f32 %v2754_v46, %v1464_v2 }
 0x6a7   : > { %v1469_v15 = vsel %vm1468_vm14, %v2754_v46, %v1465_v10 }
 0x6a8   : > { %v1474_v16 = vsel %vm1471_vm15, %v1473_v1, %v1469_v15 }
 0x6a9   : > { %v1482_v17 = vsub.f32 1.0, %v1474_v16  ;;  %v1486_v25 = vmul.f32 %v1484_v18, %v1474_v16 }
 0x6f9   : > { %v1155_v44 = vpop.f32.mrf.mxu3 }
 0x6fa   : > { %1160 = vst.msk [vmem:[#allocation3 + $0x1] sm:$0x1] %vm964_vm12, %v1155_v44 }
 0x701   : > { %v1315_v50 = vpop.f32.mrf.mxu3 }
 0x702   : > { %v1318_v56 = vsel %vm929_vm13, %v1315_v50, -inf }
 0x703   : > { %1319 = vmax.xlane.f32.xlu2 %v1318_v56 }
 0x709   : > { %v1427_v62 = vpop.f32.mrf.mxu3 }
 0x70a   : > { %v1428_v3 = vadd.f32 %v2574_v61, %v1427_v62  ;;  %v2592_v62 = vld [vmem:[%s3647_s12 + $0x2] sm:$0x1] }
 0x70c   : > { %v1477_v8 = vrot.slane %v1428_v3, 5 }
 0x70e   : > { %v1479_v5 = vmul.f32 %v1477_v8, %v1451_v9 }
 0x710   : > { %v1480_v13 = vadd.f32 %v1479_v5, %v3236_v40 }
 0x712   : > { %2755 = vtanh.f32 %v1480_v13 }
 0x718   : > { %v2756_v19 = vpop.eup %2755 }
 0x719   : > { %v1483_v24 = vmul.f32 %v2756_v19, %v1482_v17 }
 0x71b   : > { %v3361_v26 = vadd.f32 %v1486_v25, %v1483_v24 }
 0x71d   : > { %1547 = vst.msk [vmem:[#allocation2] sm:$0x8] %vm1546_vm0, %v3361_v26  ;;  %v1489_v28 = vrot.slane %v3361_v26, 3 }
 0x71f   : > { %2581 = vmatmul.msk.f32.vlgmr.msrb.gmra.mxu1 %vm595_vm2, %v1489_v28  ;;  %2587 = vmatmul.msk.f32.vlgmr.msrb.gmra.mxu3 %vm595_vm2, %v1489_v28 }
 0x720   : > { %2614 = vmatpush.xpose.msk.msrb.mxu1 %vm595_vm2, %v3127_v35  ;;  %1929 = vmatpush.msrb.mxu3 %v3127_v35 }
 0x776   : > { %v1320_v14 = vpop.xlane.xlu2 %1319 }
 0x777   : > { %v1321_v30 = vsub.f32 %v1315_v50, %v1320_v14  ;;  %v3411_v50 = vld [vmem:[%s3646_s11] sm:$0xff] }
 0x779   : > { %v1322_v31 = vmul.f32 1.442695, %v1321_v30 }
 0x77b   : > { %2757 = vpow2.f32 %v1322_v31 }
 0x781   : > { %v2758_v32 = vpop.eup %2757 }
 0x782   : > { %v1324_v33 = vsel %vm929_vm13, %v2758_v32, 0.0 }
 0x783   : > { %1325 = vadd.xlane.f32.xlu2 %v1324_v33 }
 0x7f6   : > { %v1326_v34 = vpop.xlane.xlu2 %1325 }
 0x7f7   : > { %2759 = vrcp.f32 %v1326_v34 }
 0x7fd   : > { %v2760_v36 = vpop.eup %2759 }
 0x7fe   : > { %v1328_v20 = vmul.f32 %v2760_v36, %v2758_v32 }
 0x800   : > { %2562 = vmatmul.msk.f32.vlgmr.msrb.gmra.mxu0 %vm566_vm1, %v1328_v20 }
 0x801   : > { %1616 = vmatpush.msrb.mxu0 %v3159_v52  ;;  %v1553_v52 = vld [vmem:[%s3647_s12] sm:$0x1] }
 0x803   : > { %1617 = vmatpush.msrb.mxu0 %v3164_v53  ;;  %v1571_v53 = vpop.f32.mrf.mxu1 }
 0x805   : > { %1618 = vmatpush.msrb.mxu0 %v3172_v54  ;;  %v1572_v54 = vadd.f32 %v1571_v53, %v1553_v52 }
 0x807   : > { %1619 = vmatpush.msrb.mxu0 %v3181_v55  ;;  %v1625_v21 = vrot.slane %v1572_v54, 4  ;;  %v2586_v55 = vld [vmem:[%s3647_s12 + $0x1] sm:$0x1] }
 0x808   : > { %2579 = vmatmul.msk.f32.vlgmr.msra.gmra.mxu0 %vm595_vm2, %v1489_v28 }
 0x809   : > { %1785 = vmatpush.msra.mxu0 %v3112_v27  ;;  %v1596_v27 = vpop.f32.mrf.mxu3 }
 0x80a   : > { %v1597_v37 = vadd.f32 %v2586_v55, %v1596_v27  ;;  %v3434_v55 = vld [vmem:[%s3646_s11 + $0x58] sm:$0xff]  ;;  %v3440_v27 = vld [vmem:[%s3646_s11 + $0x50] sm:$0xff] }
 0x80b   : > { %1786 = vmatpush.msra.mxu0 %v3120_v29  ;;  %v1627_v29 = vadd.f32 %v1625_v21, %v3218_v63 }
 0x80d   : > { %1787 = vmatpush.msra.mxu0 %v3143_v48  ;;  %v1648_v48 = vrot.slane %v1597_v37, 4  ;;  %v2594_v22 = vmul.f32 -1.442695, %v1627_v29  ;;  %v3446_v37 = vld [vmem:[%s3646_s11 + $0x48] sm:$0xff]  ;;  %v3452_v29 = vld [vmem:[%s3646_s11 + $0x40] sm:$0xff] }
 0x80f   : > { %1788 = vmatpush.msra.mxu0 %v3152_v51  ;;  %v1650_v51 = vadd.f32 %v1648_v48, %v3227_v6  ;;  %2761 = vpow2.f32 %v2594_v22  ;;  %v1747_v48 = vld [vmem:[%s3647_s12] sm:$0x1] }
 0x810   : > { %2593 = vmatmul.msk.f32.vlgmr.msrb.gmra.mxu0 %vm595_vm2, %v1489_v28  ;;  %v1678_v28 = vrot.slane %v3361_v26, 7 }
 0x811   : > { %v2595_v23 = vmul.f32 -1.442695, %v1650_v51  ;;  %1954 = vmatpush.msrb.mxu0 %v3393_v45 }
 0x813   : > { %2763 = vpow2.f32 %v2595_v23  ;;  %1955 = vmatpush.msrb.mxu0 %v3400_v47  ;;  %v2604_v23 = vld [vmem:[%s3647_s12 + $0x1] sm:$0x1] }
 0x815   : > { %v2762_v38 = vpop.eup %2761  ;;  %1956 = vmatpush.msrb.mxu0 %v3406_v49 }
 0x816   : > { %v1631_v39 = vadd.f32 1.0, %v2762_v38 }
 0x817   : > { %1957 = vmatpush.msrb.mxu0 %v3411_v50 }
 0x818   : > { %2765 = vrcp.f32 %v1631_v39  ;;  %v1643_v3 = vand.u32 2147483648, %v1631_v39  ;;  %vm1637_vm4 = vweird.f32 %v1631_v39  ;;  %v1641_v4 = vand.u32 2147483647, %v1631_v39 }
 0x819   : > { %v2764_v41 = vpop.eup %2763 }
 0x81a   : > { %v1654_v42 = vadd.f32 1.0, %v2764_v41  ;;  %v1644_v11 = vor.u32 1.1754944e-38, %v1643_v3  ;;  %vm1642_vm6 = vcmp.eq.f32.partialorder %v1641_v4, 8.507059e+37  ;;  %v3487_v3 = vld [vmem:[%s3646_s11 + $0x20] sm:$0xff] }
 0x81c   : > { %2767 = vrcp.f32 %v1654_v42  ;;  %v1666_v15 = vand.u32 2147483648, %v1654_v42  ;;  %vm1660_vm8 = vweird.f32 %v1654_v42  ;;  %v1664_v16 = vand.u32 2147483647, %v1654_v42 }
 0x81e   : > { %v2766_v43 = vpop.eup %2765  ;;  %v1667_v19 = vor.u32 1.1754944e-38, %v1666_v15  ;;  %vm1665_vm10 = vcmp.eq.f32.partialorder %v1664_v16, 8.507059e+37 }
 0x81f   : > { %v1633_v46 = vmul.f32 %v2766_v43, %v1631_v39  ;;  %vm1638_vm3 = vweird.f32 %v2766_v43 }
 0x820   : > { %vm1639_vm5 = vmor %vm1637_vm4, %vm1638_vm3 }
 0x821   : > { %v1634_v57 = vsub.f32 1.0, %v1633_v46 }
 0x822   : > { %v2768_v56 = vpop.eup %2767 }
 0x823   : > { %v1656_v58 = vmul.f32 %v2768_v56, %v1654_v42  ;;  %v1635_v59 = vmul.f32 %v2766_v43, %v1634_v57  ;;  %vm1661_vm7 = vweird.f32 %v2768_v56 }
 0x824   : > { %vm1662_vm9 = vmor %vm1660_vm8, %vm1661_vm7  ;;  %vm1934_vm8 = vcmask 259077  }
 0x825   : > { %v1657_v0 = vsub.f32 1.0, %v1656_v58  ;;  %v1636_v2 = vadd.f32 %v2766_v43, %v1635_v59 }
 0x827   : > { %v1658_v7 = vmul.f32 %v2768_v56, %v1657_v0  ;;  %v1640_v10 = vsel %vm1639_vm5, %v2766_v43, %v1636_v2  ;;  %v3475_v0 = vld [vmem:[%s3646_s11 + $0x30] sm:$0xff]  ;;  %v3481_v2 = vld [vmem:[%s3646_s11 + $0x28] sm:$0xff] }
 0x828   : > { %v1645_v12 = vsel %vm1642_vm6, %v1644_v11, %v1640_v10 }
 0x829   : > { %v1659_v13 = vadd.f32 %v2768_v56, %v1658_v7 }
 0x82b   : > { %v1663_v18 = vsel %vm1662_vm9, %v2768_v56, %v1659_v13 }
 0x82c   : > { %v1668_v24 = vsel %vm1665_vm10, %v1667_v19, %v1663_v18 }
 0x82d   : > { %v1676_v25 = vsub.f32 1.0, %v1668_v24  ;;  %v1680_v31 = vmul.f32 %v1678_v28, %v1668_v24 }
 0x87d   : > { %v1349_v44 = vpop.f32.mrf.mxu0 }
 0x87e   : > { %1354 = vst.msk [vmem:[#allocation3 + $0x2] sm:$0x1] %vm964_vm12, %v1349_v44 }
 0x885   : > { %v1509_v60 = vpop.f32.mrf.mxu0 }
 0x886   : > { %v1512_v61 = vsel %vm929_vm13, %v1509_v60, -inf }
 0x887   : > { %1513 = vmax.xlane.f32.xlu0 %v1512_v61  ;;  %v3469_v61 = vld [vmem:[%s3646_s11 + $0x38] sm:$0xff] }
 0x88d   : > { %v1621_v8 = vpop.f32.mrf.mxu0 }
 0x88e   : > { %v1622_v9 = vadd.f32 %v2592_v62, %v1621_v8 }
 0x890   : > { %v1671_v5 = vrot.slane %v1622_v9, 4 }
 0x892   : > { %v1673_v1 = vmul.f32 %v1671_v5, %v1645_v12 }
 0x894   : > { %v1674_v17 = vadd.f32 %v1673_v1, %v3236_v40 }
 0x896   : > { %2769 = vtanh.f32 %v1674_v17 }
 0x89c   : > { %v2770_v14 = vpop.eup %2769 }
 0x89d   : > { %v1677_v30 = vmul.f32 %v2770_v14, %v1676_v25 }
 0x89f   : > { %v3421_v32 = vadd.f32 %v1680_v31, %v1677_v30 }
 0x8a1   : > { %1741 = vst.msk [vmem:[#allocation2] sm:$0x10] %vm1740_vm11, %v3421_v32  ;;  %v1683_v33 = vrot.slane %v3421_v32, 4 }
 0x8a3   : > { %2599 = vmatmul.msk.f32.vlgmr.msra.gmra.mxu3 %vm595_vm2, %v1683_v33  ;;  %2605 = vmatmul.msk.f32.vlgmr.msra.gmra.mxu0 %vm595_vm2, %v1683_v33 }
 0x8a4   : > { %2632 = vmatpush.xpose.msk.msra.mxu3 %vm595_vm2, %v3127_v35  ;;  %2123 = vmatpush.msra.mxu0 %v3127_v35 }
 0x8fa   : > { %v1514_v26 = vpop.xlane.xlu0 %1513 }
 0x8fb   : > { %v1515_v34 = vsub.f32 %v1509_v60, %v1514_v26 }
 0x8fd   : > { %v1516_v36 = vmul.f32 1.442695, %v1515_v34 }
 0x8ff   : > { %2771 = vpow2.f32 %v1516_v36 }
 0x905   : > { %v2772_v20 = vpop.eup %2771 }
 0x906   : > { %v1518_v52 = vsel %vm929_vm13, %v2772_v20, 0.0 }
 0x907   : > { %1519 = vadd.xlane.f32.xlu1 %v1518_v52 }
 0x920   : > { %v1790_v38 = vpop.f32.mrf.mxu0 }
 0x921   : > { %v1791_v41 = vadd.f32 %v2604_v23, %v1790_v38 }
 0x923   : > { %v1842_v43 = vrot.slane %v1791_v41, 3 }
 0x925   : > { %v1844_v46 = vadd.f32 %v1842_v43, %v3227_v6 }
 0x926   : > { %v1765_v22 = vpop.f32.mrf.mxu3 }
 0x927   : > { %v1766_v51 = vadd.f32 %v1765_v22, %v1747_v48  ;;  %v2613_v56 = vmul.f32 -1.442695, %v1844_v46 }
 0x929   : > { %v1819_v39 = vrot.slane %v1766_v51, 3 }
 0x92b   : > { %v1821_v42 = vadd.f32 %v1819_v39, %v3218_v63 }
 0x92d   : > { %v2612_v44 = vmul.f32 -1.442695, %v1821_v42 }
 0x97a   : > { %v1520_v53 = vpop.xlane.xlu1 %1519 }
 0x97b   : > { %2773 = vrcp.f32 %v1520_v53 }
 0x97c   : > { %2775 = vpow2.f32 %v2612_v44 }
 0x97d   : > { %2777 = vpow2.f32 %v2613_v56  ;;  %v2622_v56 = vld [vmem:[%s3647_s12 + $0x1] sm:$0x1] }
 0x981   : > { %v2774_v54 = vpop.eup %2773 }
 0x982   : > { %v1522_v21 = vmul.f32 %v2774_v54, %v2772_v20  ;;  %v2776_v57 = vpop.eup %2775  ;;  %v1872_v20 = vrot.slane %v3421_v32, 7 }
 0x983   : > { %v1825_v58 = vadd.f32 1.0, %v2776_v57  ;;  %v2778_v60 = vpop.eup %2777 }
 0x984   : > { %2580 = vmatmul.msk.f32.vlgmr.msra.gmra.mxu2 %vm566_vm1, %v1522_v21  ;;  %v1848_v59 = vadd.f32 1.0, %v2778_v60 }
 0x985   : > { %1810 = vmatpush.msra.mxu2 %v3434_v55  ;;  %2779 = vrcp.f32 %v1825_v58  ;;  %vm1831_vm15 = vweird.f32 %v1825_v58  ;;  %v1835_v1 = vand.u32 2147483647, %v1825_v58 }
 0x986   : > { %2781 = vrcp.f32 %v1848_v59  ;;  %v1860_v28 = vand.u32 2147483648, %v1848_v59  ;;  %vm1854_vm5 = vweird.f32 %v1848_v59  ;;  %v1858_v30 = vand.u32 2147483647, %v1848_v59 }
 0x987   : > { %1811 = vmatpush.msra.mxu2 %v3440_v27  ;;  %vm1836_vm3 = vcmp.eq.f32.partialorder %v1835_v1, 8.507059e+37 }
 0x988   : > { %v1861_v26 = vor.u32 1.1754944e-38, %v1860_v28  ;;  %vm1859_vm7 = vcmp.eq.f32.partialorder %v1858_v30, 8.507059e+37 }
 0x989   : > { %1812 = vmatpush.msra.mxu2 %v3446_v37 }
 0x98b   : > { %1813 = vmatpush.msra.mxu2 %v3452_v29  ;;  %v2780_v62 = vpop.eup %2779 }
 0x98c   : > { %2597 = vmatmul.msk.f32.vlgmr.msrb.gmra.mxu2 %vm595_vm2, %v1683_v33  ;;  %v1827_v7 = vmul.f32 %v2780_v62, %v1825_v58  ;;  %v2782_v8 = vpop.eup %2781  ;;  %vm1832_vm14 = vweird.f32 %v2780_v62 }
 0x98d   : > { %1979 = vmatpush.msrb.mxu2 %v3469_v61  ;;  %v1850_v10 = vmul.f32 %v2782_v8, %v1848_v59  ;;  %vm1833_vm0 = vmor %vm1831_vm15, %vm1832_vm14  ;;  %vm1855_vm4 = vweird.f32 %v2782_v8 }
 0x98e   : > { %v1828_v9 = vsub.f32 1.0, %v1827_v7  ;;  %vm1856_vm6 = vmor %vm1854_vm5, %vm1855_vm4  ;;  %vm2128_vm5 = vcmask 260102  }
 0x98f   : > { %1980 = vmatpush.msrb.mxu2 %v3475_v0  ;;  %v1851_v13 = vsub.f32 1.0, %v1850_v10 }
 0x990   : > { %v1829_v12 = vmul.f32 %v2780_v62, %v1828_v9 }
 0x991   : > { %1981 = vmatpush.msrb.mxu2 %v3481_v2  ;;  %v1852_v16 = vmul.f32 %v2782_v8, %v1851_v13 }
 0x992   : > { %v1830_v15 = vadd.f32 %v2780_v62, %v1829_v12 }
 0x993   : > { %1982 = vmatpush.msrb.mxu2 %v3487_v3  ;;  %v1853_v25 = vadd.f32 %v2782_v8, %v1852_v16  ;;  %v2628_v16 = vld [vmem:[%s3647_s12 + $0x2] sm:$0x1] }
 0x994   : > { %2611 = vmatmul.msk.f32.vlgmr.msra.gmra.mxu2 %vm595_vm2, %v1683_v33  ;;  %v1834_v17 = vsel %vm1833_vm0, %v2780_v62, %v1830_v15 }
 0x995   : > { %2148 = vmatpush.msra.mxu2 %v3393_v45  ;;  %v2610_v45 = vld [vmem:[%s3647_s12 + $0x2] sm:$0x1]  ;;  %v1857_v33 = vsel %vm1856_vm6, %v2782_v8, %v1853_v25 }
 0x996   : > { %v1862_v34 = vsel %vm1859_vm7, %v1861_v26, %v1857_v33 }
 0x997   : > { %2149 = vmatpush.msra.mxu2 %v3400_v47  ;;  %v1837_v47 = vand.u32 2147483648, %v1825_v58  ;;  %v1870_v36 = vsub.f32 1.0, %v1862_v34  ;;  %v1874_v54 = vmul.f32 %v1872_v20, %v1862_v34 }
 0x999   : > { %2150 = vmatpush.msra.mxu2 %v3406_v49  ;;  %v1838_v18 = vor.u32 1.1754944e-38, %v1837_v47 }
 0x99b   : > { %2151 = vmatpush.msra.mxu2 %v3411_v50  ;;  %v1839_v24 = vsel %vm1836_vm3, %v1838_v18, %v1834_v17 }
 0xa07   : > { %v1543_v4 = vpop.f32.mrf.mxu2 }
 0xa08   : > { %1548 = vst.msk [vmem:[#allocation3 + $0x3] sm:$0x1] %vm964_vm12, %v1543_v4 }
 0xa0f   : > { %v1703_v11 = vpop.f32.mrf.mxu2 }
 0xa10   : > { %v1706_v5 = vsel %vm929_vm13, %v1703_v11, -inf }
 0xa11   : > { %1707 = vmax.xlane.f32.xlu2 %v1706_v5 }
 0xa17   : > { %v1815_v49 = vpop.f32.mrf.mxu2 }
 0xa18   : > { %v1816_v50 = vadd.f32 %v2610_v45, %v1815_v49 }
 0xa1a   : > { %v1865_v19 = vrot.slane %v1816_v50, 3 }
 0xa1c   : > { %v1867_v14 = vmul.f32 %v1865_v19, %v1839_v24 }
 0xa1e   : > { %v1868_v31 = vadd.f32 %v1867_v14, %v3236_v40 }
 0xa20   : > { %2783 = vtanh.f32 %v1868_v31 }
 0xa26   : > { %v2784_v52 = vpop.eup %2783 }
 0xa27   : > { %v1871_v53 = vmul.f32 %v2784_v52, %v1870_v36 }
 0xa29   : > { %v3501_v21 = vadd.f32 %v1874_v54, %v1871_v53 }
 0xa2b   : > { %1935 = vst.msk [vmem:[#allocation2] sm:$0x20] %vm1934_vm8, %v3501_v21  ;;  %v1877_v48 = vrot.slane %v3501_v21, 5  ;;  %v2066_v54 = vrot.slane %v3501_v21, 7 }
 0xa2d   : > { %2617 = vmatmul.msk.f32.vlgmr.msrb.gmra.mxu0 %vm595_vm2, %v1877_v48  ;;  %2623 = vmatmul.msk.f32.vlgmr.msrb.gmra.mxu2 %vm595_vm2, %v1877_v48 }
 0xa2e   : > { %2650 = vmatpush.xpose.msk.msrb.mxu0 %vm595_vm2, %v3127_v35  ;;  %2317 = vmatpush.msrb.mxu2 %v3127_v35  ;;  %v1941_v35 = vld [vmem:[%s3647_s12] sm:$0x1] }
 0xa84   : > { %v1708_v32 = vpop.xlane.xlu2 %1707 }
 0xa85   : > { %v1709_v22 = vsub.f32 %v1703_v11, %v1708_v32 }
 0xa87   : > { %v1710_v51 = vmul.f32 1.442695, %v1709_v22 }
 0xa89   : > { %2785 = vpow2.f32 %v1710_v51 }
 0xa8f   : > { %v2786_v23 = vpop.eup %2785 }
 0xa90   : > { %v1712_v38 = vsel %vm929_vm13, %v2786_v23, 0.0 }
 0xa91   : > { %1713 = vadd.xlane.f32.xlu0 %v1712_v38 }
 0xaaa   : > { %v1959_v43 = vpop.f32.mrf.mxu0 }
 0xaab   : > { %v1960_v44 = vadd.f32 %v1959_v43, %v1941_v35 }
 0xaad   : > { %v2013_v46 = vrot.slane %v1960_v44, 2 }
 0xaaf   : > { %v2015_v60 = vadd.f32 %v2013_v46, %v3218_v63  ;;  %v2135_v46 = vld [vmem:[%s3647_s12] sm:$0x1] }
 0xab0   : > { %v1984_v57 = vpop.f32.mrf.mxu2 }
 0xab1   : > { %v1985_v58 = vadd.f32 %v2622_v56, %v1984_v57  ;;  %v2630_v59 = vmul.f32 -1.442695, %v2015_v60 }
 0xb04   : > { %v1714_v39 = vpop.xlane.xlu0 %1713 }
 0xb05   : > { %2787 = vrcp.f32 %v1714_v39 }
 0xb06   : > { %2789 = vpow2.f32 %v2630_v59 }
 0xb0b   : > { %v2788_v41 = vpop.eup %2787 }
 0xb0c   : > { %v1716_v42 = vmul.f32 %v2788_v41, %v2786_v23  ;;  %v2790_v62 = vpop.eup %2789 }
 0xb0e   : > { %2598 = vmatmul.msk.f32.vlgmr.msra.gmra.mxu1 %vm566_vm1, %v1716_v42 }
 0xb0f   : > { %2004 = vmatpush.msra.mxu1 %v3434_v55 }
 0xb11   : > { %2005 = vmatpush.msra.mxu1 %v3440_v27 }
 0xb13   : > { %2006 = vmatpush.msra.mxu1 %v3446_v37 }
 0xb15   : > { %2007 = vmatpush.msra.mxu1 %v3452_v29 }
 0xb16   : > { %2615 = vmatmul.msk.f32.vlgmr.msrb.gmra.mxu1 %vm595_vm2, %v1877_v48 }
 0xb17   : > { %2173 = vmatpush.msrb.mxu1 %v3469_v61  ;;  %v2036_v61 = vrot.slane %v1985_v58, 2 }
 0xb19   : > { %2174 = vmatpush.msrb.mxu1 %v3475_v0  ;;  %v2038_v0 = vadd.f32 %v2036_v61, %v3227_v6 }
 0xb1b   : > { %2175 = vmatpush.msrb.mxu1 %v3481_v2  ;;  %v2631_v2 = vmul.f32 -1.442695, %v2038_v0 }
 0xb1d   : > { %2176 = vmatpush.msrb.mxu1 %v3487_v3  ;;  %2791 = vpow2.f32 %v2631_v2  ;;  %v2019_v3 = vadd.f32 1.0, %v2790_v62 }
 0xb1e   : > { %2629 = vmatmul.msk.f32.vlgmr.msra.gmra.mxu1 %vm595_vm2, %v1877_v48 }
 0xb1f   : > { %2793 = vrcp.f32 %v2019_v3  ;;  %v2031_v49 = vand.u32 2147483648, %v2019_v3  ;;  %vm2025_vm10 = vweird.f32 %v2019_v3  ;;  %v2029_v50 = vand.u32 2147483647, %v2019_v3 }
 0xb21   : > { %v2032_v25 = vor.u32 1.1754944e-38, %v2031_v49  ;;  %vm2030_vm14 = vcmp.eq.f32.partialorder %v2029_v50, 8.507059e+37  ;;  %v2646_v49 = vld [vmem:[%s3647_s12 + $0x2] sm:$0x1] }
 0xb23   : > { %v2792_v4 = vpop.eup %2791 }
 0xb24   : > { %v2042_v7 = vadd.f32 1.0, %v2792_v4 }
 0xb25   : > { %v2794_v8 = vpop.eup %2793 }
 0xb26   : > { %2795 = vrcp.f32 %v2042_v7  ;;  %v2021_v10 = vmul.f32 %v2794_v8, %v2019_v3  ;;  %vm2026_vm9 = vweird.f32 %v2794_v8  ;;  %v2054_v31 = vand.u32 2147483648, %v2042_v7 }
 0xb27   : > { %vm2027_vm11 = vmor %vm2025_vm10, %vm2026_vm9  ;;  %vm2048_vm0 = vweird.f32 %v2042_v7  ;;  %v2052_v26 = vand.u32 2147483647, %v2042_v7 }
 0xb28   : > { %v2022_v5 = vsub.f32 1.0, %v2021_v10  ;;  %v2055_v20 = vor.u32 1.1754944e-38, %v2054_v31 }
 0xb29   : > { %vm2053_vm4 = vcmp.eq.f32.partialorder %v2052_v26, 8.507059e+37 }
 0xb2a   : > { %v2023_v45 = vmul.f32 %v2794_v8, %v2022_v5  ;;  %v2328_v5 = vld [vmem:[%s3648_s13 + $0x8] sm:$0xff] }
 0xb2c   : > { %v2796_v11 = vpop.eup %2795  ;;  %v2024_v1 = vadd.f32 %v2794_v8, %v2023_v45 }
 0xb2d   : > { %v2044_v12 = vmul.f32 %v2796_v11, %v2042_v7  ;;  %vm2049_vm15 = vweird.f32 %v2796_v11 }
 0xb2e   : > { %v2028_v24 = vsel %vm2027_vm11, %v2794_v8, %v2024_v1  ;;  %vm2050_vm3 = vmor %vm2048_vm0, %vm2049_vm15  ;;  %vm2322_vm0 = vcmask 261127  }
 0xb2f   : > { %v2045_v47 = vsub.f32 1.0, %v2044_v12  ;;  %v2033_v14 = vsel %vm2030_vm14, %v2032_v25, %v2028_v24 }
 0xb31   : > { %v2046_v17 = vmul.f32 %v2796_v11, %v2045_v47 }
 0xb33   : > { %v2047_v30 = vadd.f32 %v2796_v11, %v2046_v17 }
 0xb35   : > { %v2051_v36 = vsel %vm2050_vm3, %v2796_v11, %v2047_v30 }
 0xb36   : > { %v2056_v52 = vsel %vm2053_vm4, %v2055_v20, %v2051_v36 }
 0xb37   : > { %v2064_v53 = vsub.f32 1.0, %v2056_v52  ;;  %v2068_v22 = vmul.f32 %v2066_v54, %v2056_v52 }
 0xb8b   : > { %v1737_v9 = vpop.f32.mrf.mxu1 }
 0xb8c   : > { %1742 = vst.msk [vmem:[#allocation3 + $0x4] sm:$0x1] %vm964_vm12, %v1737_v9 }
 0xb93   : > { %v1897_v13 = vpop.f32.mrf.mxu1 }
 0xb94   : > { %v1900_v15 = vsel %vm929_vm13, %v1897_v13, -inf }
 0xb95   : > { %1901 = vmax.xlane.f32.xlu1 %v1900_v15  ;;  %v2327_v15 = vld [vmem:[%s3648_s13] sm:$0xff] }
 0xb9b   : > { %v2009_v18 = vpop.f32.mrf.mxu1 }
 0xb9c   : > { %v2010_v19 = vadd.f32 %v2628_v16, %v2009_v18 }
 0xb9e   : > { %v2059_v28 = vrot.slane %v2010_v19, 2 }
 0xba0   : > { %v2061_v33 = vmul.f32 %v2059_v28, %v2033_v14 }
 0xba2   : > { %v2062_v34 = vadd.f32 %v2061_v33, %v3236_v40 }
 0xba4   : > { %2797 = vtanh.f32 %v2062_v34 }
 0xbaa   : > { %v2798_v48 = vpop.eup %2797 }
 0xbab   : > { %v2065_v32 = vmul.f32 %v2798_v48, %v2064_v53 }
 0xbad   : > { %v3537_v51 = vadd.f32 %v2068_v22, %v2065_v32 }
 0xbaf   : > { %2129 = vst.msk [vmem:[#allocation2] sm:$0x40] %vm2128_vm5, %v3537_v51  ;;  %v2071_v23 = vrot.slane %v3537_v51, 6  ;;  %v2260_v48 = vrot.slane %v3537_v51, 7 }
 0xbb1   : > { %2635 = vmatmul.msk.f32.vlgmr.msra.gmra.mxu2 %vm595_vm2, %v2071_v23  ;;  %2641 = vmatmul.msk.f32.vlgmr.msrb.gmra.mxu1 %vm595_vm2, %v2071_v23 }
 0xc08   : > { %v1902_v38 = vpop.xlane.xlu1 %1901 }
 0xc09   : > { %v1903_v39 = vsub.f32 %v1897_v13, %v1902_v38 }
 0xc0b   : > { %v1904_v41 = vmul.f32 1.442695, %v1903_v39 }
 0xc0d   : > { %2799 = vpow2.f32 %v1904_v41 }
 0xc13   : > { %v2800_v42 = vpop.eup %2799 }
 0xc14   : > { %v1906_v21 = vsel %vm929_vm13, %v2800_v42, 0.0 }
 0xc15   : > { %1907 = vadd.xlane.f32.xlu2 %v1906_v21 }
 0xc2e   : > { %v2178_v58 = vpop.f32.mrf.mxu1 }
 0xc34   : > { %v2153_v56 = vpop.f32.mrf.mxu2 }
 0xc35   : > { %v2154_v57 = vadd.f32 %v2153_v56, %v2135_v46 }
 0xc88   : > { %v1908_v35 = vpop.xlane.xlu2 %1907 }
 0xc89   : > { %2801 = vrcp.f32 %v1908_v35 }
 0xc8f   : > { %v2802_v43 = vpop.eup %2801 }
 0xc90   : > { %v1910_v44 = vmul.f32 %v2802_v43, %v2800_v42 }
 0xc92   : > { %2616 = vmatmul.msk.f32.vlgmr.msrb.gmra.mxu3 %vm566_vm1, %v1910_v44 }
 0xc93   : > { %2198 = vmatpush.msrb.mxu3 %v3434_v55  ;;  %v2640_v55 = vld [vmem:[%s3647_s12 + $0x1] sm:$0x1] }
 0xc94   : > { %v2179_v60 = vadd.f32 %v2640_v55, %v2178_v58 }
 0xc95   : > { %2199 = vmatpush.msrb.mxu3 %v3440_v27  ;;  %v2207_v27 = vrot.slane %v2154_v57, 1 }
 0xc97   : > { %2200 = vmatpush.msrb.mxu3 %v3446_v37  ;;  %v2209_v37 = vadd.f32 %v2207_v27, %v3218_v63  ;;  %v2330_v63 = vld [vmem:[%s3648_s13 + $0x18] sm:$0xff] }
 0xc99   : > { %2201 = vmatpush.msrb.mxu3 %v3452_v29  ;;  %v2230_v29 = vrot.slane %v2179_v60, 1  ;;  %v2648_v61 = vmul.f32 -1.442695, %v2209_v37 }
 0xc9a   : > { %2633 = vmatmul.msk.f32.vlgmr.msra.gmra.mxu3 %vm595_vm2, %v2071_v23 }
 0xc9b   : > { %v2232_v59 = vadd.f32 %v2230_v29, %v3227_v6  ;;  %2803 = vpow2.f32 %v2648_v61  ;;  %v2329_v6 = vld [vmem:[%s3648_s13 + $0x10] sm:$0xff]  ;;  %2373 = vmatpush.msra.mxu3 %v2330_v63 }
 0xc9d   : > { %v2649_v0 = vmul.f32 -1.442695, %v2232_v59  ;;  %2374 = vmatpush.msra.mxu3 %v2329_v6  ;;  %v2704_v6 = vld [vmem:[%s3650_s15] ss:$0 sm:$0xff] }
 0xc9f   : > { %2805 = vpow2.f32 %v2649_v0  ;;  %2375 = vmatpush.msra.mxu3 %v2328_v5 }
 0xca1   : > { %v2804_v2 = vpop.eup %2803  ;;  %2376 = vmatpush.msra.mxu3 %v2327_v15 }
 0xca2   : > { %2647 = vmatmul.msk.f32.vlgmr.msrb.gmra.mxu3 %vm595_vm2, %v2071_v23  ;;  %v2213_v62 = vadd.f32 1.0, %v2804_v2  ;;  %v2334_v2 = vld [vmem:[%s3649_s14 + $0x18] sm:$0xff] }
 0xca3   : > { %2350 = vmatpush.msra.mxu1 %v2334_v2 }
 0xca4   : > { %2807 = vrcp.f32 %v2213_v62  ;;  %v2225_v50 = vand.u32 2147483648, %v2213_v62  ;;  %vm2219_vm7 = vweird.f32 %v2213_v62  ;;  %v2223_v17 = vand.u32 2147483647, %v2213_v62 }
 0xca5   : > { %v2806_v3 = vpop.eup %2805 }
 0xca6   : > { %v2236_v4 = vadd.f32 1.0, %v2806_v3  ;;  %v2226_v28 = vor.u32 1.1754944e-38, %v2225_v50  ;;  %vm2224_vm9 = vcmp.eq.f32.partialorder %v2223_v17, 8.507059e+37  ;;  %v2332_v3 = vld [vmem:[%s3649_s14 + $0x8] sm:$0xff] }
 0xca8   : > { %2809 = vrcp.f32 %v2236_v4  ;;  %v2248_v33 = vand.u32 2147483648, %v2236_v4  ;;  %vm2242_vm11 = vweird.f32 %v2236_v4  ;;  %v2246_v34 = vand.u32 2147483647, %v2236_v4 }
 0xcaa   : > { %v2808_v7 = vpop.eup %2807  ;;  %v2249_v52 = vor.u32 1.1754944e-38, %v2248_v33  ;;  %vm2247_vm15 = vcmp.eq.f32.partialorder %v2246_v34, 8.507059e+37 }
 0xcab   : > { %v2215_v9 = vmul.f32 %v2808_v7, %v2213_v62  ;;  %vm2220_vm6 = vweird.f32 %v2808_v7  ;;  %v2333_v62 = vld [vmem:[%s3649_s14 + $0x10] sm:$0xff] }
 0xcac   : > { %vm2221_vm8 = vmor %vm2219_vm7, %vm2220_vm6  ;;  %2351 = vmatpush.msra.mxu1 %v2333_v62 }
 0xcad   : > { %v2216_v11 = vsub.f32 1.0, %v2215_v9  ;;  %v2386_v9 = vlaneseq }
 0xcae   : > { %v2810_v10 = vpop.eup %2809  ;;  %2352 = vmatpush.msra.mxu1 %v2332_v3 }
 0xcaf   : > { %v2238_v12 = vmul.f32 %v2810_v10, %v2236_v4  ;;  %v2217_v47 = vmul.f32 %v2808_v7, %v2216_v11  ;;  %vm2243_vm10 = vweird.f32 %v2810_v10  ;;  %v2331_v4 = vld [vmem:[%s3649_s14] sm:$0xff]  ;;  %v2387_v63 = vand.u32 127, %v2386_v9 }
 0xcb0   : > { %vm2244_vm14 = vmor %vm2242_vm11, %vm2243_vm10  ;;  %2353 = vmatpush.msra.mxu1 %v2331_v4 }
 0xcb1   : > { %v2239_v1 = vsub.f32 1.0, %v2238_v12  ;;  %v2218_v16 = vadd.f32 %v2808_v7, %v2217_v47 }
 0xcb3   : > { %v2240_v18 = vmul.f32 %v2810_v10, %v2239_v1  ;;  %v2222_v25 = vsel %vm2221_vm8, %v2808_v7, %v2218_v16 }
 0xcb4   : > { %v2227_v30 = vsel %vm2224_vm9, %v2226_v28, %v2222_v25 }
 0xcb5   : > { %v2241_v31 = vadd.f32 %v2810_v10, %v2240_v18 }
 0xcb7   : > { %v2245_v20 = vsel %vm2244_vm14, %v2810_v10, %v2241_v31 }
 0xcb8   : > { %v2250_v53 = vsel %vm2247_vm15, %v2249_v52, %v2245_v20 }
 0xcb9   : > { %v2258_v54 = vsub.f32 1.0, %v2250_v53  ;;  %v2262_v23 = vmul.f32 %v2260_v48, %v2250_v53 }
 0xd15   : > { %v1931_v8 = vpop.f32.mrf.mxu3 }
 0xd16   : > { %1936 = vst.msk [vmem:[#allocation3 + $0x5] sm:$0x1] %vm964_vm12, %v1931_v8 }
 0xd1d   : > { %v2091_v13 = vpop.f32.mrf.mxu3 }
 0xd1e   : > { %v2094_v45 = vsel %vm929_vm13, %v2091_v13, -inf }
 0xd1f   : > { %2095 = vmax.xlane.f32.xlu0 %v2094_v45 }
 0xd25   : > { %v2203_v19 = vpop.f32.mrf.mxu3 }
 0xd26   : > { %v2204_v24 = vadd.f32 %v2646_v49, %v2203_v19 }
 0xd28   : > { %v2253_v14 = vrot.slane %v2204_v24, 1 }
 0xd2a   : > { %v2255_v26 = vmul.f32 %v2253_v14, %v2227_v30 }
 0xd2c   : > { %v2256_v36 = vadd.f32 %v2255_v26, %v3236_v40 }
 0xd2e   : > { %2811 = vtanh.f32 %v2256_v36 }
 0xd34   : > { %v2812_v32 = vpop.eup %2811 }
 0xd35   : > { %v2259_v22 = vmul.f32 %v2812_v32, %v2258_v54 }
 0xd37   : > { %v2263_v38 = vadd.f32 %v2262_v23, %v2259_v22 }
 0xd39   : > { %2323 = vst.msk [vmem:[#allocation2] sm:$0x80] %vm2322_vm0, %v2263_v38  ;;  %v2265_v46 = vrot.slane %v2263_v38, 7 }
 0xd40   : > { %v2325_v39 = vld [vmem:[#allocation2] sm:$0xff] }
 0xd41   : > { %2654 = vmatmul.msk.f32.vlgmr.msra.gmra.mxu3 %vm595_vm2, %v2325_v39 }
 0xd92   : > { %v2096_v41 = vpop.xlane.xlu0 %2095 }
 0xd93   : > { %v2097_v42 = vsub.f32 %v2091_v13, %v2096_v41 }
 0xd95   : > { %v2098_v40 = vmul.f32 1.442695, %v2097_v42 }
 0xd97   : > { %2813 = vpow2.f32 %v2098_v40 }
 0xd9d   : > { %v2814_v21 = vpop.eup %2813 }
 0xd9e   : > { %v2100_v35 = vsel %vm929_vm13, %v2814_v21, 0.0 }
 0xd9f   : > { %2101 = vadd.xlane.f32.xlu1 %v2100_v35 }
 0xdc4   : > { %v2378_v10 = vpop.f32.mrf.mxu3 }
 0xe12   : > { %v2102_v43 = vpop.xlane.xlu1 %2101 }
 0xe13   : > { %2815 = vrcp.f32 %v2102_v43 }
 0xe19   : > { %v2816_v51 = vpop.eup %2815 }
 0xe1a   : > { %v2104_v44 = vmul.f32 %v2816_v51, %v2814_v21 }
 0xe1c   : > { %2634 = vmatmul.msk.f32.vlgmr.msra.gmra.mxu0 %vm566_vm1, %v2104_v44 }
 0xe24   : > { %2651 = vmatmul.msk.f32.vlgmr.msrb.gmra.mxu0 %vm595_vm2, %v2265_v46 }
 0xe99   : > { %v2125_v56 = vpop.f32.mrf.mxu0 }
 0xe9a   : > { %2130 = vst.msk [vmem:[#allocation3 + $0x6] sm:$0x1] %vm964_vm12, %v2125_v56 }
 0xea1   : > { %v2285_v57 = vpop.f32.mrf.mxu0 }
 0xea2   : > { %v2288_v55 = vsel %vm929_vm13, %v2285_v57, -inf }
 0xea3   : > { %2289 = vmax.xlane.f32.xlu2 %v2288_v55 }
 0xf16   : > { %v2290_v58 = vpop.xlane.xlu2 %2289 }
 0xf17   : > { %v2291_v27 = vsub.f32 %v2285_v57, %v2290_v58 }
 0xf19   : > { %v2292_v60 = vmul.f32 1.442695, %v2291_v27 }
 0xf1b   : > { %2817 = vpow2.f32 %v2292_v60 }
 0xf21   : > { %v2818_v37 = vpop.eup %2817 }
 0xf22   : > { %v2294_v29 = vsel %vm929_vm13, %v2818_v37, 0.0 }
 0xf23   : > { %2295 = vadd.xlane.f32.xlu0 %v2294_v29 }
 0xf96   : > { %v2296_v61 = vpop.xlane.xlu0 %2295 }
 0xf97   : > { %2819 = vrcp.f32 %v2296_v61 }
 0xf9d   : > { %v2820_v59 = vpop.eup %2819 }
 0xf9e   : > { %v2298_v0 = vmul.f32 %v2820_v59, %v2818_v37 }
 0xfa0   : > { %2652 = vmatmul.msk.f32.vlgmr.msrb.gmra.mxu2 %vm566_vm1, %v2298_v0  ;;  %vm2388_vm1 = vcmp.lt.s32.totalorder %v2387_v63, 20 }
0x1023   : > { %v2319_v7 = vpop.f32.mrf.mxu2 }
0x1024   : > { %2324 = vst.msk [vmem:[#allocation3 + $0x7] sm:$0x1] %vm964_vm12, %v2319_v7 }
0x102b   : > { %v2326_v8 = vld [vmem:[#allocation3] sm:$0xff] }
0x102c   : > { %2653 = vmatmul.msk.f32.vlgmr.msra.gmra.mxu1 %vm595_vm2, %v2326_v8 }
0x10a9   : > { %v2355_v11 = vpop.f32.mrf.mxu1 }
0x10aa   : > { %v2379_v5 = vadd.f32 %v2378_v10, %v2355_v11 }
0x10ac   : > { %v2385_v12 = vadd.f32 %v2704_v6, %v2379_v5 }
0x10ae   : > { %v2389_v13 = vsel %vm2388_vm1, %v2385_v12, -1e+30 }
0x10af   : > { %2390 = vmax.xlane.f32.xlu1 %v2389_v13 }
0x1122   : > { %v2391_v15 = vpop.xlane.xlu1 %2390 }
0x1123   : > { %v2392_v45 = vsub.f32 %v2389_v13, %v2391_v15 }
0x1125   : > { %v2393_v47 = vmul.f32 1.442695, %v2392_v45 }
0x1127   : > { %2821 = vpow2.f32 %v2393_v47 }
0x112d   : > { %v2822_v1 = vpop.eup %2821 }
0x112e   : > { %2395 = vadd.xlane.f32.xlu2 %v2822_v1 }
0x11a1   : > { %v2396_v16 = vpop.xlane.xlu2 %2395 }
0x11a2   : > { %2823 = vlog2.f32 %v2396_v16 }
0x11a8   : > { %v2824_v49 = vpop.eup %2823 }
0x11a9   : > { %v2398_v50 = vmul.f32 0.6931472, %v2824_v49 }
0x11ab   : > { %v2399_v17 = vsub.f32 %v2392_v45, %v2398_v50 }
0x11ad   : > { %2400 = vst [vmem:[%s525_s30] sm:$0xff] %v2399_v17 }
0x11ae   : > { %2852 = shalt.err (!%p2849_p3)
}
0x11af   : > { %2659 = dma.vmem_to_hbm [thread:$0]  (%p3013_p5), %s2415_s18, 128, %s2417_s27, %s2402_s29  }
0x11b0 PF: > { %p2665_p4 = scmp.ge.s32.totalorder %s2887_s24, 2  ;;  %s2428_s23 = sand.u32 1, %s2875_s21  }
0x11b1   : > { %s2429_s30 = scalar_lea.sflag [#allocation5], %s2428_s23 }
0x11b2   : > { %p2662_p7 = pnand %p2665_p4, %p3017_p6 }
0x11b4   : > { %p2663_p8 = pneg %p2662_p7 }
0x11b6   : > { %2870 = dma.done.wait (%p2663_p8), %s2429_s30, 128  }
0x11b7   : > { %2872 = vsyncadd (%p2663_p8), %s2429_s30, 4294967168  ;;  %s3671_s24 = sld [smem:[#allocation8_spill]]  ;;  %s3674_s21 = smov %s2879_s22 }
0x11b8   : > { %s3672_s1 = sld [smem:[#allocation7_spill]] }
0x11b9   : > { %s3673_s23 = sld [smem:[#allocation9_spill]] }
0x11bd   : > { %p26_p9 = scmp.ge.s32.totalorder %s3671_s24, 4  }
0x11be   : > { %s3675_s22 = smov %s3672_s1 }
0x11bf   :  { %28 = sbr.rel (!%p26_p9) target bundleno = 7 (0x7), region = 130 }
0x11c4   :  { %2435 = vsyncpa [#allocation5], 1 }
0x11c5   :  { %2437 = vsyncpa [#allocation5 + $0x1], 1 }

</bundles_post_ra>
